<compile_context>
chip_gen: v6e
topology: v6e:2x2x1
jax: 0.10.0
libtpu: 0.0.40
codegen_flags: <defaults>
</compile_context>

<pallas_src>
import jax
import jax.numpy as jnp
from jax import lax
from jax.experimental import pallas as pl
from jax.experimental.pallas import tpu as pltpu

NUM_LAYERS = 2              # num_layers >= 2 required by the module
EMB_DIM = 128               # emb_dim (lane-dense)
N_PER_GRAPH = 16            # nodes per graph
E_PER_GRAPH = 32            # edges per graph
GRAPHS_PER_BLOCK = 8        # graphs packed block-diagonally per grid step
NUM_BLOCKS = 2              # grid size (groups of graphs)
BN_NODES = GRAPHS_PER_BLOCK * N_PER_GRAPH     # 128 nodes per block
BE_EDGES = GRAPHS_PER_BLOCK * E_PER_GRAPH     # 256 edges per block
BOND_VOCAB = 5
BOND_FEATS = 3
ATTR_W = 32                 # 3 bond features x 8-wide one-hot slots (vocab 5 padded)
XYZ_PAD = 8                 # 3 coords zero-padded to 8 columns
BIAS_ROWS = 8               # row0=b3, rows 1..L=b1f, rows 1+L..2L=b2f, rest zero
BN_EPS = 1e-5


def gnn3d_kernel(eps_ref, xyz_ref, w3_ref, src_ref, dst_ref, attr_ref,
                 bond_ref, w1_ref, w2_ref, bias_ref, out_ref):
    D = EMB_DIM

    # ---- gather / scatter one-hot operators built on-chip from int32 ids ----
    node_lane = lax.broadcasted_iota(jnp.int32, (BE_EDGES, BN_NODES), 1)
    src_oh = jnp.where(src_ref[...] == node_lane, 1.0, 0.0).astype(jnp.bfloat16)   # (BE, BN)
    node_sub = lax.broadcasted_iota(jnp.int32, (BN_NODES, BE_EDGES), 0)
    dst_oh_t = jnp.where(dst_ref[...] == node_sub, 1.0, 0.0).astype(jnp.bfloat16)  # (BN, BE)
    attr_mh = attr_ref[...]                                                        # (BE, 32) bf16

    # ---- threed2embedding: Linear(3 -> D) as three exact f32 broadcast-FMAs ----
    xyz = xyz_ref[...]                          # (BN, 8) f32, cols 3..7 are zero pad
    w3 = w3_ref[...]                            # (8, D) f32, rows 3..7 are zero pad
    b3 = bias_ref[0:1, :D]                      # (1, D) f32
    h = (xyz[:, 0:1] * w3[0:1, :]
         + xyz[:, 1:2] * w3[1:2, :]
         + xyz[:, 2:3] * w3[2:3, :] + b3)       # (BN, D) f32

    for l in range(NUM_LAYERS):
        eps = eps_ref[l]                                           # SMEM scalar
        b1 = bias_ref[1 + l:2 + l, :]                              # (1, 2D)
        b2 = bias_ref[1 + NUM_LAYERS + l:2 + NUM_LAYERS + l, :D]   # (1, D)

        # BondEncoder for this layer: (BE, 32) multi-hot @ (32, D) table
        eemb = jnp.dot(attr_mh, bond_ref[l],
                       preferred_element_type=jnp.float32)         # (BE, D) f32

        # --- GINConv message passing ---
        x_j = jnp.dot(src_oh, h.astype(jnp.bfloat16),
                      preferred_element_type=jnp.float32)          # gather h[src]
        msg = jnp.maximum(x_j + eemb, 0.0)                         # relu(x_j + edge_emb)
        agg = jnp.dot(dst_oh_t, msg.astype(jnp.bfloat16),
                      preferred_element_type=jnp.float32)          # scatter-add on dst
        z = (1.0 + eps) * h + agg

        # GIN MLP: Linear(D,2D) -> BN -> ReLU -> Linear(2D,D), then outer
        # BatchNorm1d; eval-mode BN affines are folded into w1/w2 and biases.
        z1 = jnp.maximum(
            jnp.dot(z.astype(jnp.bfloat16), w1_ref[l],
                    preferred_element_type=jnp.float32) + b1, 0.0)
        hb = jnp.dot(z1.astype(jnp.bfloat16), w2_ref[l],
                     preferred_element_type=jnp.float32) + b2
        if l == NUM_LAYERS - 1:
            h = hb                       # TODO(synk): dropout is identity (eval mode)
        else:
            h = jnp.maximum(hb, 0.0)     # ReLU, then dropout identity (eval mode)
        # residual=False, JK='last'

    out_ref[...] = h


def gnn3d_forward(eps, xyz, w3, src_ids, dst_ids, attr_mh, bond_tbl,
                  w1_slab, w2_slab, bias):
    G, D, L = NUM_BLOCKS, EMB_DIM, NUM_LAYERS
    BN, BE = BN_NODES, BE_EDGES

    flops_per_block = (
        2 * BN * 3 * D                        # 3 -> D embedding
        + L * (2 * BE * ATTR_W * D            # bond embedding
               + 2 * BE * BN * D              # gather
               + 2 * BN * BE * D              # scatter-add
               + 2 * BN * D * (2 * D)         # MLP linear 1
               + 2 * BN * (2 * D) * D))       # MLP linear 2
    bytes_accessed = sum(int(a.size) * a.dtype.itemsize
                         for a in (eps, xyz, w3, src_ids, dst_ids, attr_mh,
                                   bond_tbl, w1_slab, w2_slab, bias))
    bytes_accessed += G * BN * D * 4          # f32 output

    in_specs = [
        pl.BlockSpec(memory_space=pltpu.MemorySpace.SMEM),             # eps (L,)
        pl.BlockSpec((None, BN, XYZ_PAD), lambda g: (g, 0, 0)),        # xyz f32
        pl.BlockSpec((XYZ_PAD, D), lambda g: (0, 0)),                  # w3 f32
        pl.BlockSpec((None, BE, 1), lambda g: (g, 0, 0)),              # src ids int32
        pl.BlockSpec((None, 1, BE), lambda g: (g, 0, 0)),              # dst ids int32
        pl.BlockSpec((None, BE, ATTR_W), lambda g: (g, 0, 0)),         # edge multi-hot bf16
        pl.BlockSpec((L, ATTR_W, D), lambda g: (0, 0, 0)),             # bond tables bf16
        pl.BlockSpec((L, D, 2 * D), lambda g: (0, 0, 0)),              # MLP W1 (BN folded)
        pl.BlockSpec((L, 2 * D, D), lambda g: (0, 0, 0)),              # MLP W2 (BN folded)
        pl.BlockSpec((BIAS_ROWS, 2 * D), lambda g: (0, 0)),            # packed biases f32
    ]
    out_specs = pl.BlockSpec((None, BN, D), lambda g: (g, 0, 0))

    return pl.pallas_call(
        gnn3d_kernel,
        out_shape=jax.ShapeDtypeStruct((G, BN, D), jnp.float32),
        grid=(G,),
        in_specs=in_specs,
        out_specs=out_specs,
        compiler_params=pltpu.CompilerParams(
            dimension_semantics=("parallel",)),
        cost_estimate=pl.CostEstimate(
            flops=int(G * flops_per_block),
            transcendentals=0,
            bytes_accessed=int(bytes_accessed)),
    )(eps, xyz, w3, src_ids, dst_ids, attr_mh, bond_tbl, w1_slab, w2_slab, bias)


# ----------------------------- reference ------------------------------------

def _round_bf16(a):
    return a.astype(jnp.bfloat16).astype(jnp.float32)


def reference(eps, xyz, w3, src_ids, dst_ids, attr_mh, bond_tbl,
              w1_slab, w2_slab, bias):
    """Plain-JAX mirror of the kernel math (same bf16 operand rounding)."""
    D, L = EMB_DIM, NUM_LAYERS
    b3 = bias[0:1, :D]
    outs = []
    for g in range(NUM_BLOCKS):
        x = xyz[g]
        h = (x[:, 0:1] * w3[0:1, :] + x[:, 1:2] * w3[1:2, :]
             + x[:, 2:3] * w3[2:3, :] + b3)
        src = src_ids[g, :, 0]
        dst = dst_ids[g, 0, :]
        amh = attr_mh[g].astype(jnp.float32)
        for l in range(L):
            b1 = bias[1 + l:2 + l, :]
            b2 = bias[1 + L + l:2 + L + l, :D]
            eemb = amh @ bond_tbl[l].astype(jnp.float32)
            x_j = _round_bf16(h)[src]                               # gather
            msg = jnp.maximum(x_j + eemb, 0.0)
            agg = jnp.zeros((BN_NODES, D), jnp.float32).at[dst].add(
                _round_bf16(msg))                                   # scatter-add
            z = (1.0 + eps[l]) * h + agg
            z1 = jnp.maximum(
                _round_bf16(z) @ w1_slab[l].astype(jnp.float32) + b1, 0.0)
            hb = _round_bf16(z1) @ w2_slab[l].astype(jnp.float32) + b2
            h = hb if l == L - 1 else jnp.maximum(hb, 0.0)
        outs.append(h)
    return jnp.stack(outs)


def bn_affine(key, dim):
    """Deterministic eval-mode BatchNorm1d params folded into scale/shift."""
    k1, k2, k3, k4 = jax.random.split(key, 4)
    gamma = 1.0 + 0.1 * jax.random.normal(k1, (dim,), jnp.float32)
    beta = 0.1 * jax.random.normal(k2, (dim,), jnp.float32)
    running_mean = 0.1 * jax.random.normal(k3, (dim,), jnp.float32)
    running_var = 0.5 + jnp.abs(jax.random.normal(k4, (dim,), jnp.float32))
    scale = gamma / jnp.sqrt(running_var + BN_EPS)
    shift = beta - running_mean * scale
    return scale, shift


if __name__ == "__main__":
    key = jax.random.PRNGKey(0)
    keys = jax.random.split(key, 16)

    L, D = NUM_LAYERS, EMB_DIM
    N, E, B, G = N_PER_GRAPH, E_PER_GRAPH, GRAPHS_PER_BLOCK, NUM_BLOCKS
    BN, BE = BN_NODES, BE_EDGES

    # ---- synthetic batch of graphs: G groups x B graphs, N nodes / E edges ----
    xyz3 = jax.random.normal(keys[0], (G, BN, 3), jnp.float32)             # xyz.xyz (last dim == 3)
    edge_index = jax.random.randint(keys[1], (G, B, 2, E), 0, N)           # per-graph local indices
    edge_attr = jax.random.randint(keys[2], (G, B, E, BOND_FEATS), 0, BOND_VOCAB)
    # TODO(synk): AtomEncoder branch (xyz.xyz.size(-1)==9) not exercised; only
    # the 3-coordinate threed2embedding path is implemented.

    # block-diagonal global node ids inside each group
    offs = (jnp.arange(B) * N)[None, :, None]                              # (1, B, 1)
    src = (edge_index[:, :, 0, :] + offs).reshape(G, BE)
    dst = (edge_index[:, :, 1, :] + offs).reshape(G, BE)
    src_ids = src.reshape(G, BE, 1).astype(jnp.int32)                      # gather ids (column)
    dst_ids = dst.reshape(G, 1, BE).astype(jnp.int32)                      # scatter ids (row)

    # edge_attr -> per-edge multi-hot over the 3 bond features (vocab 5 -> slot 8)
    ea = edge_attr.reshape(G, BE, BOND_FEATS)
    slots = ea + (jnp.arange(BOND_FEATS) * 8)[None, None, :]
    attr_mh = jnp.sum(jax.nn.one_hot(slots, ATTR_W, dtype=jnp.float32),
                      axis=-2).astype(jnp.bfloat16)                        # (G, BE, 32)

    # threed2embedding: Linear(3, D); xyz padded 3 -> 8, w3 padded with zero rows
    xyz = jnp.pad(xyz3, ((0, 0), (0, 0), (0, XYZ_PAD - 3)))                # f32
    w3 = jnp.zeros((XYZ_PAD, D), jnp.float32).at[:3].set(
        0.1 * jax.random.normal(keys[3], (3, D), jnp.float32))
    b3 = 0.1 * jax.random.normal(keys[4], (D,), jnp.float32)

    # per-layer BondEncoder tables packed into one (L, 32, D) bf16 slab
    bond_tables = 0.1 * jax.random.normal(
        keys[5], (L, BOND_FEATS, BOND_VOCAB, D), jnp.float32)
    bond_tbl = jnp.zeros((L, ATTR_W, D), jnp.float32)
    for f in range(BOND_FEATS):
        bond_tbl = bond_tbl.at[:, f * 8:f * 8 + BOND_VOCAB, :].set(bond_tables[:, f])
    bond_tbl = bond_tbl.astype(jnp.bfloat16)

    # GINConv eps init = 0 (torch.Tensor([0])) -> SMEM scalars
    eps = jnp.zeros((L,), jnp.float32)

    # GIN MLP weights + BatchNorms (eval mode); fold BN affines into the Linears
    w1 = 0.1 * jax.random.normal(keys[6], (L, D, 2 * D), jnp.float32)
    b1 = 0.1 * jax.random.normal(keys[7], (L, 2 * D), jnp.float32)
    w2 = 0.1 * jax.random.normal(keys[8], (L, 2 * D, D), jnp.float32)
    b2 = 0.1 * jax.random.normal(keys[9], (L, D), jnp.float32)
    bn1 = [bn_affine(k, 2 * D) for k in jax.random.split(keys[10], L)]
    bno = [bn_affine(k, D) for k in jax.random.split(keys[11], L)]
    bn1s = jnp.stack([s for s, _ in bn1]); bn1b = jnp.stack([b for _, b in bn1])
    bnos = jnp.stack([s for s, _ in bno]); bnob = jnp.stack([b for _, b in bno])

    w1f = w1 * bn1s[:, None, :]            # inner BN folded into Linear(D,2D)
    b1f = b1 * bn1s + bn1b
    w2f = w2 * bnos[:, None, :]            # outer BatchNorm1d folded into Linear(2D,D)
    b2f = b2 * bnos + bnob

    w1_slab = w1f.astype(jnp.bfloat16)     # (L, D, 2D) bf16, no dead zero region
    w2_slab = w2f.astype(jnp.bfloat16)     # (L, 2D, D) bf16

    bias = jnp.zeros((BIAS_ROWS, 2 * D), jnp.float32)
    bias = bias.at[0, :D].set(b3)
    for l in range(L):
        bias = bias.at[1 + l, :].set(b1f[l]).at[1 + L + l, :D].set(b2f[l])

    args = (eps, xyz, w3, src_ids, dst_ids, attr_mh, bond_tbl,
            w1_slab, w2_slab, bias)

    out = jax.block_until_ready(gnn3d_forward(*args))
    ref = reference(*args)

    assert out.shape == (G, BN, D)
    assert bool(jnp.allclose(out, ref, atol=2e-2, rtol=2e-2)), \
        "mismatch vs JAX reference"

    print("KERNEL_OK")
</pallas_src>

<mosaic_0001>
module attributes {stable_mosaic.version = 11 : i64} {
  func.func @gnn3d_kernel(%arg0: i32, %arg1: memref<2xf32, #tpu.memory_space<smem>>, %arg2: memref<1x128x8xf32, #tpu.memory_space<vmem>>, %arg3: memref<8x128xf32, #tpu.memory_space<vmem>>, %arg4: memref<1x256x1xi32, #tpu.memory_space<vmem>>, %arg5: memref<1x1x256xi32, #tpu.memory_space<vmem>>, %arg6: memref<1x256x32xbf16, #tpu.memory_space<vmem>>, %arg7: memref<2x32x128xbf16, #tpu.memory_space<vmem>>, %arg8: memref<2x128x256xbf16, #tpu.memory_space<vmem>>, %arg9: memref<2x256x128xbf16, #tpu.memory_space<vmem>>, %arg10: memref<8x256xf32, #tpu.memory_space<vmem>>, %arg11: memref<1x128x128xf32, #tpu.memory_space<vmem>>) attributes {dimension_semantics = [#tpu.dimension_semantics<parallel>], iteration_bounds = array<i64: 2>, scalar_prefetch = 0 : i64, scratch_operands = 0 : i64, tpu.core_type = #tpu.core_type<tc>, window_params = [{transform_indices = @transform_0, window_bounds = array<i64: 2>}, {transform_indices = @transform_1, window_bounds = array<i64: 1, 128, 8>}, {pipeline_mode = #tpu.pipeline_mode<synchronous>, transform_indices = @transform_2, window_bounds = array<i64: 8, 128>}, {transform_indices = @transform_3, window_bounds = array<i64: 1, 256, 1>}, {transform_indices = @transform_4, window_bounds = array<i64: 1, 1, 256>}, {transform_indices = @transform_5, window_bounds = array<i64: 1, 256, 32>}, {pipeline_mode = #tpu.pipeline_mode<synchronous>, transform_indices = @transform_6, window_bounds = array<i64: 2, 32, 128>}, {pipeline_mode = #tpu.pipeline_mode<synchronous>, transform_indices = @transform_7, window_bounds = array<i64: 2, 128, 256>}, {pipeline_mode = #tpu.pipeline_mode<synchronous>, transform_indices = @transform_8, window_bounds = array<i64: 2, 256, 128>}, {pipeline_mode = #tpu.pipeline_mode<synchronous>, transform_indices = @transform_9, window_bounds = array<i64: 8, 256>}, {transform_indices = @transform_10, window_bounds = array<i64: 1, 128, 128>}]} {
    %0 = tpu.iota {dimensions = array<i32: 1>} : vector<256x128xi32>
    %c0 = arith.constant 0 : index
    %c0_0 = arith.constant 0 : index
    %c0_1 = arith.constant 0 : index
    %1 = vector.load %arg4[%c0, %c0_0, %c0_1] : memref<1x256x1xi32, #tpu.memory_space<vmem>>, vector<1x256x1xi32>
    %2 = vector.shape_cast %1 : vector<1x256x1xi32> to vector<256x1xi32>
    %3 = vector.broadcast %2 : vector<256x1xi32> to vector<256x128xi32>
    %4 = arith.cmpi eq, %3, %0 : vector<256x128xi32>
    %cst = arith.constant 1.000000e+00 : f32
    %cst_2 = arith.constant 0.000000e+00 : f32
    %5 = vector.broadcast %cst : f32 to vector<256x128xf32>
    %6 = vector.broadcast %cst_2 : f32 to vector<256x128xf32>
    %7 = arith.select %4, %5, %6 : vector<256x128xi1>, vector<256x128xf32>
    %8 = arith.truncf %7 : vector<256x128xf32> to vector<256x128xbf16>
    %9 = tpu.iota {dimensions = array<i32: 0>} : vector<128x256xi32>
    %c0_3 = arith.constant 0 : index
    %c0_4 = arith.constant 0 : index
    %c0_5 = arith.constant 0 : index
    %10 = vector.load %arg5[%c0_3, %c0_4, %c0_5] : memref<1x1x256xi32, #tpu.memory_space<vmem>>, vector<1x1x256xi32>
    %11 = vector.shape_cast %10 : vector<1x1x256xi32> to vector<1x256xi32>
    %12 = vector.broadcast %11 : vector<1x256xi32> to vector<128x256xi32>
    %13 = arith.cmpi eq, %12, %9 : vector<128x256xi32>
    %cst_6 = arith.constant 1.000000e+00 : f32
    %cst_7 = arith.constant 0.000000e+00 : f32
    %14 = vector.broadcast %cst_6 : f32 to vector<128x256xf32>
    %15 = vector.broadcast %cst_7 : f32 to vector<128x256xf32>
    %16 = arith.select %13, %14, %15 : vector<128x256xi1>, vector<128x256xf32>
    %17 = arith.truncf %16 : vector<128x256xf32> to vector<128x256xbf16>
    %c0_8 = arith.constant 0 : index
    %c0_9 = arith.constant 0 : index
    %c0_10 = arith.constant 0 : index
    %18 = vector.load %arg6[%c0_8, %c0_9, %c0_10] : memref<1x256x32xbf16, #tpu.memory_space<vmem>>, vector<1x256x32xbf16>
    %19 = vector.shape_cast %18 : vector<1x256x32xbf16> to vector<256x32xbf16>
    %c0_11 = arith.constant 0 : index
    %c0_12 = arith.constant 0 : index
    %c0_13 = arith.constant 0 : index
    %20 = vector.load %arg2[%c0_11, %c0_12, %c0_13] : memref<1x128x8xf32, #tpu.memory_space<vmem>>, vector<1x128x8xf32>
    %21 = vector.shape_cast %20 : vector<1x128x8xf32> to vector<128x8xf32>
    %c0_14 = arith.constant 0 : index
    %c0_15 = arith.constant 0 : index
    %22 = vector.load %arg3[%c0_14, %c0_15] : memref<8x128xf32, #tpu.memory_space<vmem>>, vector<8x128xf32>
    %c0_16 = arith.constant 0 : index
    %c0_17 = arith.constant 0 : index
    %23 = vector.load %arg10[%c0_16, %c0_17] : memref<8x256xf32, #tpu.memory_space<vmem>>, vector<1x128xf32>
    %24 = vector.extract_strided_slice %21 {offsets = [0, 0], sizes = [128, 1], strides = [1, 1]} : vector<128x8xf32> to vector<128x1xf32>
    %25 = vector.extract_strided_slice %22 {offsets = [0, 0], sizes = [1, 128], strides = [1, 1]} : vector<8x128xf32> to vector<1x128xf32>
    %26 = vector.broadcast %24 : vector<128x1xf32> to vector<128x128xf32>
    %27 = vector.broadcast %25 : vector<1x128xf32> to vector<128x128xf32>
    %28 = arith.mulf %26, %27 : vector<128x128xf32>
    %29 = vector.extract_strided_slice %21 {offsets = [0, 1], sizes = [128, 1], strides = [1, 1]} : vector<128x8xf32> to vector<128x1xf32>
    %30 = vector.extract_strided_slice %22 {offsets = [1, 0], sizes = [1, 128], strides = [1, 1]} : vector<8x128xf32> to vector<1x128xf32>
    %31 = vector.broadcast %29 : vector<128x1xf32> to vector<128x128xf32>
    %32 = vector.broadcast %30 : vector<1x128xf32> to vector<128x128xf32>
    %33 = arith.mulf %31, %32 : vector<128x128xf32>
    %34 = arith.addf %28, %33 : vector<128x128xf32>
    %35 = vector.extract_strided_slice %21 {offsets = [0, 2], sizes = [128, 1], strides = [1, 1]} : vector<128x8xf32> to vector<128x1xf32>
    %36 = vector.extract_strided_slice %22 {offsets = [2, 0], sizes = [1, 128], strides = [1, 1]} : vector<8x128xf32> to vector<1x128xf32>
    %37 = vector.broadcast %35 : vector<128x1xf32> to vector<128x128xf32>
    %38 = vector.broadcast %36 : vector<1x128xf32> to vector<128x128xf32>
    %39 = arith.mulf %37, %38 : vector<128x128xf32>
    %40 = arith.addf %34, %39 : vector<128x128xf32>
    %41 = vector.broadcast %23 : vector<1x128xf32> to vector<128x128xf32>
    %42 = arith.addf %40, %41 : vector<128x128xf32>
    %c0_18 = arith.constant 0 : index
    %43 = memref.load %arg1[%c0_18] : memref<2xf32, #tpu.memory_space<smem>>
    %c1 = arith.constant 1 : index
    %c0_19 = arith.constant 0 : index
    %44 = vector.load %arg10[%c1, %c0_19] : memref<8x256xf32, #tpu.memory_space<vmem>>, vector<1x256xf32>
    %c3 = arith.constant 3 : index
    %c0_20 = arith.constant 0 : index
    %45 = vector.load %arg10[%c3, %c0_20] : memref<8x256xf32, #tpu.memory_space<vmem>>, vector<1x128xf32>
    %c0_21 = arith.constant 0 : index
    %c0_22 = arith.constant 0 : index
    %c0_23 = arith.constant 0 : index
    %46 = vector.load %arg7[%c0_21, %c0_22, %c0_23] : memref<2x32x128xbf16, #tpu.memory_space<vmem>>, vector<1x32x128xbf16>
    %47 = vector.shape_cast %46 : vector<1x32x128xbf16> to vector<32x128xbf16>
    %cst_24 = arith.constant dense<0.000000e+00> : vector<256x128xf32>
    %48 = tpu.matmul %19, %47, %cst_24 {dimension_numbers = #tpu.dot_dimension_numbers<[1], [0], [0], [1], [0, 0, 1, 1], [], []>} : vector<256x32xbf16>, vector<32x128xbf16>, vector<256x128xf32> -> vector<256x128xf32>
    %49 = arith.truncf %42 : vector<128x128xf32> to vector<128x128xbf16>
    %cst_25 = arith.constant dense<0.000000e+00> : vector<256x128xf32>
    %50 = tpu.matmul %8, %49, %cst_25 {dimension_numbers = #tpu.dot_dimension_numbers<[1], [0], [0], [1], [0, 0, 1, 1], [], []>} : vector<256x128xbf16>, vector<128x128xbf16>, vector<256x128xf32> -> vector<256x128xf32>
    %51 = arith.addf %50, %48 : vector<256x128xf32>
    %cst_26 = arith.constant 0.000000e+00 : f32
    %52 = vector.broadcast %cst_26 : f32 to vector<256x128xf32>
    %53 = arith.maximumf %51, %52 : vector<256x128xf32>
    %54 = arith.truncf %53 : vector<256x128xf32> to vector<256x128xbf16>
    %cst_27 = arith.constant dense<0.000000e+00> : vector<128x128xf32>
    %55 = tpu.matmul %17, %54, %cst_27 {dimension_numbers = #tpu.dot_dimension_numbers<[1], [0], [0], [1], [0, 0, 1, 1], [], []>} : vector<128x256xbf16>, vector<256x128xbf16>, vector<128x128xf32> -> vector<128x128xf32>
    %cst_28 = arith.constant 1.000000e+00 : f32
    %56 = arith.addf %cst_28, %43 : f32
    %57 = vector.broadcast %56 : f32 to vector<128x128xf32>
    %58 = arith.mulf %57, %42 : vector<128x128xf32>
    %59 = arith.addf %58, %55 : vector<128x128xf32>
    %60 = arith.truncf %59 : vector<128x128xf32> to vector<128x128xbf16>
    %c0_29 = arith.constant 0 : index
    %c0_30 = arith.constant 0 : index
    %c0_31 = arith.constant 0 : index
    %61 = vector.load %arg8[%c0_29, %c0_30, %c0_31] : memref<2x128x256xbf16, #tpu.memory_space<vmem>>, vector<1x128x256xbf16>
    %62 = vector.shape_cast %61 : vector<1x128x256xbf16> to vector<128x256xbf16>
    %cst_32 = arith.constant dense<0.000000e+00> : vector<128x256xf32>
    %63 = tpu.matmul %60, %62, %cst_32 {dimension_numbers = #tpu.dot_dimension_numbers<[1], [0], [0], [1], [0, 0, 1, 1], [], []>} : vector<128x128xbf16>, vector<128x256xbf16>, vector<128x256xf32> -> vector<128x256xf32>
    %64 = vector.broadcast %44 : vector<1x256xf32> to vector<128x256xf32>
    %65 = arith.addf %63, %64 : vector<128x256xf32>
    %cst_33 = arith.constant 0.000000e+00 : f32
    %66 = vector.broadcast %cst_33 : f32 to vector<128x256xf32>
    %67 = arith.maximumf %65, %66 : vector<128x256xf32>
    %68 = arith.truncf %67 : vector<128x256xf32> to vector<128x256xbf16>
    %c0_34 = arith.constant 0 : index
    %c0_35 = arith.constant 0 : index
    %c0_36 = arith.constant 0 : index
    %69 = vector.load %arg9[%c0_34, %c0_35, %c0_36] : memref<2x256x128xbf16, #tpu.memory_space<vmem>>, vector<1x256x128xbf16>
    %70 = vector.shape_cast %69 : vector<1x256x128xbf16> to vector<256x128xbf16>
    %cst_37 = arith.constant dense<0.000000e+00> : vector<128x128xf32>
    %71 = tpu.matmul %68, %70, %cst_37 {dimension_numbers = #tpu.dot_dimension_numbers<[1], [0], [0], [1], [0, 0, 1, 1], [], []>} : vector<128x256xbf16>, vector<256x128xbf16>, vector<128x128xf32> -> vector<128x128xf32>
    %72 = vector.broadcast %45 : vector<1x128xf32> to vector<128x128xf32>
    %73 = arith.addf %71, %72 : vector<128x128xf32>
    %cst_38 = arith.constant 0.000000e+00 : f32
    %74 = vector.broadcast %cst_38 : f32 to vector<128x128xf32>
    %75 = arith.maximumf %73, %74 : vector<128x128xf32>
    %c1_39 = arith.constant 1 : index
    %76 = memref.load %arg1[%c1_39] : memref<2xf32, #tpu.memory_space<smem>>
    %c2 = arith.constant 2 : index
    %c0_40 = arith.constant 0 : index
    %77 = vector.load %arg10[%c2, %c0_40] : memref<8x256xf32, #tpu.memory_space<vmem>>, vector<1x256xf32>
    %c4 = arith.constant 4 : index
    %c0_41 = arith.constant 0 : index
    %78 = vector.load %arg10[%c4, %c0_41] : memref<8x256xf32, #tpu.memory_space<vmem>>, vector<1x128xf32>
    %c1_42 = arith.constant 1 : index
    %c0_43 = arith.constant 0 : index
    %c0_44 = arith.constant 0 : index
    %79 = vector.load %arg7[%c1_42, %c0_43, %c0_44] : memref<2x32x128xbf16, #tpu.memory_space<vmem>>, vector<1x32x128xbf16>
    %80 = vector.shape_cast %79 : vector<1x32x128xbf16> to vector<32x128xbf16>
    %cst_45 = arith.constant dense<0.000000e+00> : vector<256x128xf32>
    %81 = tpu.matmul %19, %80, %cst_45 {dimension_numbers = #tpu.dot_dimension_numbers<[1], [0], [0], [1], [0, 0, 1, 1], [], []>} : vector<256x32xbf16>, vector<32x128xbf16>, vector<256x128xf32> -> vector<256x128xf32>
    %82 = arith.truncf %75 : vector<128x128xf32> to vector<128x128xbf16>
    %cst_46 = arith.constant dense<0.000000e+00> : vector<256x128xf32>
    %83 = tpu.matmul %8, %82, %cst_46 {dimension_numbers = #tpu.dot_dimension_numbers<[1], [0], [0], [1], [0, 0, 1, 1], [], []>} : vector<256x128xbf16>, vector<128x128xbf16>, vector<256x128xf32> -> vector<256x128xf32>
    %84 = arith.addf %83, %81 : vector<256x128xf32>
    %cst_47 = arith.constant 0.000000e+00 : f32
    %85 = vector.broadcast %cst_47 : f32 to vector<256x128xf32>
    %86 = arith.maximumf %84, %85 : vector<256x128xf32>
    %87 = arith.truncf %86 : vector<256x128xf32> to vector<256x128xbf16>
    %cst_48 = arith.constant dense<0.000000e+00> : vector<128x128xf32>
    %88 = tpu.matmul %17, %87, %cst_48 {dimension_numbers = #tpu.dot_dimension_numbers<[1], [0], [0], [1], [0, 0, 1, 1], [], []>} : vector<128x256xbf16>, vector<256x128xbf16>, vector<128x128xf32> -> vector<128x128xf32>
    %cst_49 = arith.constant 1.000000e+00 : f32
    %89 = arith.addf %cst_49, %76 : f32
    %90 = vector.broadcast %89 : f32 to vector<128x128xf32>
    %91 = arith.mulf %90, %75 : vector<128x128xf32>
    %92 = arith.addf %91, %88 : vector<128x128xf32>
    %93 = arith.truncf %92 : vector<128x128xf32> to vector<128x128xbf16>
    %c1_50 = arith.constant 1 : index
    %c0_51 = arith.constant 0 : index
    %c0_52 = arith.constant 0 : index
    %94 = vector.load %arg8[%c1_50, %c0_51, %c0_52] : memref<2x128x256xbf16, #tpu.memory_space<vmem>>, vector<1x128x256xbf16>
    %95 = vector.shape_cast %94 : vector<1x128x256xbf16> to vector<128x256xbf16>
    %cst_53 = arith.constant dense<0.000000e+00> : vector<128x256xf32>
    %96 = tpu.matmul %93, %95, %cst_53 {dimension_numbers = #tpu.dot_dimension_numbers<[1], [0], [0], [1], [0, 0, 1, 1], [], []>} : vector<128x128xbf16>, vector<128x256xbf16>, vector<128x256xf32> -> vector<128x256xf32>
    %97 = vector.broadcast %77 : vector<1x256xf32> to vector<128x256xf32>
    %98 = arith.addf %96, %97 : vector<128x256xf32>
    %cst_54 = arith.constant 0.000000e+00 : f32
    %99 = vector.broadcast %cst_54 : f32 to vector<128x256xf32>
    %100 = arith.maximumf %98, %99 : vector<128x256xf32>
    %101 = arith.truncf %100 : vector<128x256xf32> to vector<128x256xbf16>
    %c1_55 = arith.constant 1 : index
    %c0_56 = arith.constant 0 : index
    %c0_57 = arith.constant 0 : index
    %102 = vector.load %arg9[%c1_55, %c0_56, %c0_57] : memref<2x256x128xbf16, #tpu.memory_space<vmem>>, vector<1x256x128xbf16>
    %103 = vector.shape_cast %102 : vector<1x256x128xbf16> to vector<256x128xbf16>
    %cst_58 = arith.constant dense<0.000000e+00> : vector<128x128xf32>
    %104 = tpu.matmul %101, %103, %cst_58 {dimension_numbers = #tpu.dot_dimension_numbers<[1], [0], [0], [1], [0, 0, 1, 1], [], []>} : vector<128x256xbf16>, vector<256x128xbf16>, vector<128x128xf32> -> vector<128x128xf32>
    %105 = vector.broadcast %78 : vector<1x128xf32> to vector<128x128xf32>
    %106 = arith.addf %104, %105 : vector<128x128xf32>
    %c0_59 = arith.constant 0 : index
    %c0_60 = arith.constant 0 : index
    %c0_61 = arith.constant 0 : index
    %107 = vector.load %arg11[%c0_59, %c0_60, %c0_61] : memref<1x128x128xf32, #tpu.memory_space<vmem>>, vector<1x128x128xf32>
    %108 = vector.shape_cast %107 : vector<1x128x128xf32> to vector<128x128xf32>
    %109 = vector.shape_cast %106 : vector<128x128xf32> to vector<1x128x128xf32>
    tpu.vector_store %arg11[%c0_59, %c0_60, %c0_61], %109 {strides = array<i32>} : memref<1x128x128xf32, #tpu.memory_space<vmem>>, vector<1x128x128xf32>,
    return
  }
  func.func @transform_0(%arg0: i32) -> i32 {
    %c0_i32 = arith.constant 0 : i32
    %c0_i32_0 = arith.constant 0 : i32
    return %c0_i32 : i32
  }
  func.func @transform_1(%arg0: i32) -> (i32, i32, i32) {
    %c0_i32 = arith.constant 0 : i32
    %c0_i32_0 = arith.constant 0 : i32
    %c0_i32_1 = arith.constant 0 : i32
    return %arg0, %c0_i32, %c0_i32_0 : i32, i32, i32
  }
  func.func @transform_2(%arg0: i32) -> (i32, i32) {
    %c0_i32 = arith.constant 0 : i32
    %c0_i32_0 = arith.constant 0 : i32
    %c0_i32_1 = arith.constant 0 : i32
    return %c0_i32, %c0_i32_0 : i32, i32
  }
  func.func @transform_3(%arg0: i32) -> (i32, i32, i32) {
    %c0_i32 = arith.constant 0 : i32
    %c0_i32_0 = arith.constant 0 : i32
    %c0_i32_1 = arith.constant 0 : i32
    return %arg0, %c0_i32, %c0_i32_0 : i32, i32, i32
  }
  func.func @transform_4(%arg0: i32) -> (i32, i32, i32) {
    %c0_i32 = arith.constant 0 : i32
    %c0_i32_0 = arith.constant 0 : i32
    %c0_i32_1 = arith.constant 0 : i32
    return %arg0, %c0_i32, %c0_i32_0 : i32, i32, i32
  }
  func.func @transform_5(%arg0: i32) -> (i32, i32, i32) {
    %c0_i32 = arith.constant 0 : i32
    %c0_i32_0 = arith.constant 0 : i32
    %c0_i32_1 = arith.constant 0 : i32
    return %arg0, %c0_i32, %c0_i32_0 : i32, i32, i32
  }
  func.func @transform_6(%arg0: i32) -> (i32, i32, i32) {
    %c0_i32 = arith.constant 0 : i32
    %c0_i32_0 = arith.constant 0 : i32
    %c0_i32_1 = arith.constant 0 : i32
    %c0_i32_2 = arith.constant 0 : i32
    return %c0_i32, %c0_i32_0, %c0_i32_1 : i32, i32, i32
  }
  func.func @transform_7(%arg0: i32) -> (i32, i32, i32) {
    %c0_i32 = arith.constant 0 : i32
    %c0_i32_0 = arith.constant 0 : i32
    %c0_i32_1 = arith.constant 0 : i32
    %c0_i32_2 = arith.constant 0 : i32
    return %c0_i32, %c0_i32_0, %c0_i32_1 : i32, i32, i32
  }
  func.func @transform_8(%arg0: i32) -> (i32, i32, i32) {
    %c0_i32 = arith.constant 0 : i32
    %c0_i32_0 = arith.constant 0 : i32
    %c0_i32_1 = arith.constant 0 : i32
    %c0_i32_2 = arith.constant 0 : i32
    return %c0_i32, %c0_i32_0, %c0_i32_1 : i32, i32, i32
  }
  func.func @transform_9(%arg0: i32) -> (i32, i32) {
    %c0_i32 = arith.constant 0 : i32
    %c0_i32_0 = arith.constant 0 : i32
    %c0_i32_1 = arith.constant 0 : i32
    return %c0_i32, %c0_i32_0 : i32, i32
  }
  func.func @transform_10(%arg0: i32) -> (i32, i32, i32) {
    %c0_i32 = arith.constant 0 : i32
    %c0_i32_0 = arith.constant 0 : i32
    %c0_i32_1 = arith.constant 0 : i32
    return %arg0, %c0_i32, %c0_i32_0 : i32, i32, i32
  }
}

</mosaic_0001>

<bundles_post_ra>
// kernel: tpu_custom_call.1
= control target key start
LH: loop header
LB: loop body
LE: loop exit
PB: predicated region body
PF: predicated region fallthrough
CT: control target
= control target key end

     0   :  { %15 = vsyncpa [#allocation4], 0  ;;  %s6253_s0 = inlined_call_operand.vmem [shape: f32[2], index: 0, kind: input, shape index: {}]   ;;  %s6254_s1 = inlined_call_operand.vmem [shape: f32[2,128,8], index: 1, kind: input, shape index: {}]   ;;  %s6255_s2 = inlined_call_operand.vmem [shape: f32[8,128], index: 2, kind: input, shape index: {}]   ;;  %s6256_s3 = inlined_call_operand.vmem [shape: s32[2,256,1], index: 3, kind: input, shape index: {}]   ;;  %s6257_s4 = inlined_call_operand.vmem [shape: s32[2,1,256], index: 4, kind: input, shape index: {}]   ;;  %s6258_s5 = inlined_call_operand.vmem [shape: bf16[2,256,32], index: 5, kind: input, shape index: {}]   ;;  %s6259_s6 = inlined_call_operand.vmem [shape: bf16[2,32,128], index: 6, kind: input, shape index: {}]   ;;  %s6260_s7 = inlined_call_operand.vmem [shape: bf16[2,128,256], index: 7, kind: input, shape index: {}]   ;;  %s6261_s8 = inlined_call_operand.vmem [shape: bf16[2,256,128], index: 8, kind: input, shape index: {}]   ;;  %s6262_s9 = inlined_call_operand.vmem [shape: f32[8,256], index: 9, kind: input, shape index: {}]   ;;  %s6263_s10 = inlined_call_operand.hbm [shape: f32[2,128,128], index: 10, kind: output, shape index: {}]  }
   0x1   :  { %16 = vsyncpa [#allocation3], 0 }
   0x2   :  { %18 = vsyncpa [#allocation3 + $0x1], 0  ;;  %s4650_s13 = smov 0   ;;  %s4652_s14 = smov 0  }
   0x3   :  { %s4654_s15 = smov 0   ;;  %s4656_s16 = smov 0  }
   0x4 LB: > { %s4671_s17 = sadd.s32 4294967295, %s4585_s16   ;;  %s3460_s18 = sadd.s32 4294967294, %s4585_s16   ;;  %s4585_s16 = sphi %s4656_s16, %s6667_s16   ;;  %s4581_s15 = sphi %s4654_s15, %s6666_s15   ;;  %s4577_s14 = sphi %s4652_s14, %s6665_s14   ;;  %s4573_s13 = sphi %s4650_s13, %s6664_s13  }
   0x5   : > { %s4675_s19 = sadd.s32 1, %s4585_s16   ;;  %s261_s20 = sadd.s32 1, %s4581_s15 }
   0x6   : > { %s258_s21 = ssub.s32 %s4585_s16, %s4675_s19  ;;  %p271_p0 = scmp.ne.s32.totalorder %s4581_s15, %s4577_s14 }
   0x7   : > { %p259_p1 = scmp.eq.s32.totalorder %s258_s21, 0  ;;  %p272_p2 = scmp.eq.s32.totalorder %s4671_s17, 1 }
   0x8   : > { %p277_p3 = scmp.ne.s32.totalorder %s4577_s14, %s4573_s13  ;;  %p278_p4 = scmp.eq.s32.totalorder %s3460_s18, 1 }
   0x9   : > { %s4686_s22 = scalar_select %p259_p1, %s4581_s15, %s261_s20  }
   0xa   : > { %p4688_p5 = por %p272_p2, %p271_p0  ;;  %p4692_p6 = por %p278_p4, %p277_p3 }
   0xb   : > { %p3461_p7 = scmp.ge.s32.totalorder %s4585_s16, 1  ;;  %p285_p8 = scmp.lt.s32.totalorder %s4585_s16, 3 }
   0xc   : > { %p4320_p9 = scmp.eq.s32.totalorder %s4671_s17, 0  ;;  %s298_s28 = sshll.u32 %s6253_s0, 4  ;;  %s299_s28 = int_to_ptr.vmem [resolvable:$true] %s298_s28 }
   0xd   : > { %p4699_p10 = pnand %p3461_p7, %p285_p8  ;;  %s4506_s29 = scalar_lea.vmem %s299_s28, 16 }
   0xe   : > { %p4507_p13 = scmp.ne.s32.totalorder %s299_s28, %s4506_s29  ;;  %p4514_p3 = scmp.lt.s32.totalorder %s299_s28, %s299_s28 }
   0xf   : > { %p4312_p11 = pneg %p4699_p10  ;;  %p4515_p4 = scmp.lt.s32.totalorder %s4506_s29, %s4506_s29 }
  0x11   : > { %p4313_p12 = pnand %p4320_p9, %p4312_p11  ;;  %p4516_p7 = por %p4515_p4, %p4514_p3 }
  0x13   : > { %p4508_p0 = pneg %p4313_p12 }
  0x15   : > { %p4509_p1 = pnand %p4508_p0, %p4507_p13 }
  0x17   : > { %p4510_p2 = pneg %p4509_p1 }
  0x19   : > { %p4517_p8 = pnand %p4516_p7, %p4510_p2 }
  0x1b   : > { %4520 = shalt.err (!%p4517_p8)
}
  0x1c   : > { %s4587_s30 = smov [#allocation2]   ;;  %357 = sbr.rel (%p4699_p10) target bundleno = 2296 (0x8f8), region = 60 }
  0x1d   : > { %4315 = dma.vmem_to_smem (!%p4313_p12), %s299_s28, 16, %s4587_s30, [#allocation4]  }
  0x21   : > { %4564 = dma.done.wait (%p4320_p9), [#allocation4], 16  }
  0x22   : > { %4566 = vsyncadd (%p4320_p9), [#allocation4], 4294967280 }
  0x23   : > { %363 = sfence }
  0x24   : > { %p410_p11 = scmp.lt.s32.totalorder %s4671_s17, 1  ;;  %v430_v0 = vlaneseq  ;;  %v4588_v1 = vmov 1   ;;  %v6271_v2 = vmov 0   ;;  %v4590_v12 = vmov 2   ;;  %v4390_v49 = vld [vmem:[%s6259_s6 + $0x8] sm:$0xff]   ;;  %v4391_v51 = vld [vmem:[%s6259_s6] sm:$0xff]  }
  0x25   : > { %4363 = vset.pattern.permute.xlu1 %v4588_v1  ;;  %4362 = vset.pattern.permute.xlu0 %v6271_v2  ;;  %vm6264_vm0 = vcmask 261120   ;;  %v794_v61 = vld [vmem:[%s6255_s2] sm:$0xff] }
  0x26   : > { %s4720_s11 = scalar_select %p410_p11, %s4671_s17, 1  ;;  %v4723_v3 = vshrl.u32 %v430_v0, 7  ;;  %4122 = vmatprep.subr.bf16.mxu0 %v4390_v49 }
  0x27   : > { %4123 = vmatpush3.bf16.msra.mxu0 %v4390_v49 }
  0x28   : > { %6387 = vst [vmem:[#allocation8_spill] sm:$0xff] %v4723_v3  ;;  %s3778_s12 = sshll.u32 %s4720_s11, 7  ;;  %s3471_s25 = sshll.u32 %s4720_s11, 1  ;;  %v4737_v5 = vsub.s32 0, %v4723_v3  ;;  %v4740_v6 = vsub.s32 1, %v4723_v3  ;;  %4124 = vmatprep.subr.bf16.mxu0 %v4391_v51  ;;  %v1062_v59 = vsub.s32 2, %v4723_v3 }
  0x29   : > { %s4729_s21 = scalar_lea.vmem %s6254_s1, %s3778_s12  ;;  %s423_s28 = scalar_lea.vmem %s6257_s4, %s3471_s25 }
  0x2a   : > { %v792_v4 = vld [vmem:[%s4729_s21 + $0x70] sm:$0xff]  ;;  %6388 = vst [vmem:[#allocation9_spill] sm:$0xff] %v4737_v5  ;;  %6389 = vst [vmem:[#allocation10_spill] sm:$0xff] %v4740_v6  ;;  %v657_v7 = vld [vmem:[%s423_s28] sm:$0x3]  ;;  %s4753_s18 = scalar_lea.vmem %s6258_s5, %s3778_s12  ;;  %s3779_s12 = sshll.u32 %s4720_s11, 8 }
  0x2b   : > { %953 = vperm.xlu1 %4363, %v792_v4   ;;  %868 = vperm.xlu0 %4362, %v792_v4   ;;  %v793_v8 = vld [vmem:[%s4729_s21 + $0x78] sm:$0xff]  ;;  %v4744_v9 = vrot.slane %v657_v7, %v4737_v5  ;;  %v4747_v10 = vrot.slane %v657_v7, %v4740_v6  ;;  %v791_v11 = vld [vmem:[%s4729_s21 + $0x68] sm:$0xff]  ;;  %v790_v14 = vld [vmem:[%s4729_s21 + $0x60] sm:$0xff]  ;;  %s4793_s26 = scalar_lea.vmem %s6256_s3, %s3779_s12  ;;  %v4867_v7 = vrot.slane %v794_v61, %v1062_v59  ;;  %s1112_s11 = sld [smem:[#allocation2]] }
  0x2c   : > { %v789_v13 = vld [vmem:[%s4729_s21 + $0x58] sm:$0xff]  ;;  %v787_v15 = vld [vmem:[%s4729_s21 + $0x48] sm:$0xff]  ;;  %v788_v20 = vld [vmem:[%s4729_s21 + $0x50] sm:$0xff]  ;;  %4125 = vmatpush3.bf16.msra.mxu0 %v4391_v51  ;;  %s407_s28 = sand.u32 1, %s4577_s14   ;;  %s3781_s25 = sshll.u32 %s4671_s17, 11 }
  0x2d   : > { %6390 = vst [vmem:[#allocation11_spill] sm:$0xff] %v4744_v9  ;;  %6391 = vst [vmem:[#allocation12_spill] sm:$0xff] %v4747_v10  ;;  %v785_v16 = vld [vmem:[%s4729_s21 + $0x38] sm:$0xff]  ;;  %v4763_v17 = vld [vmem:[%s4729_s21 + $0x28] sm:$0xff]  ;;  %s3466_s29 = sshll.u32 %s407_s28, 7  ;;  %s6213_s27 = scalar_lea.sflag [#allocation3], %s407_s28 }
  0x2e   : > { %v4767_v18 = vld [vmem:[%s4729_s21 + $0x18] sm:$0xff]  ;;  %v4771_v19 = vld [vmem:[%s4729_s21 + $0x8] sm:$0xff]  ;;  %v786_v21 = vld [vmem:[%s4729_s21 + $0x40] sm:$0xff]  ;;  %s6169_s20 = scalar_lea.vmem [#allocation5], %s3466_s29  ;;  %s4592_s29 = smov [#allocation5]  }
  0x2f   : > { %957 = vperm.xlu1 %4363, %v793_v8   ;;  %873 = vperm.xlu0 %4362, %v793_v8   ;;  %v784_v22 = vld [vmem:[%s4729_s21 + $0x30] sm:$0xff]  ;;  %v782_v23 = vld [vmem:[%s4729_s21 + $0x20] sm:$0xff]  ;;  %v433_v26 = vld [vmem:[%s4793_s26 + $0x8] sm:$0xff]  ;;  %s4525_s30 = sshll.u32 %s4592_s29, 4  ;;  %s4526_s30 = int_to_ptr.vmem [resolvable:$false] %s4525_s30 }
  0x30   : > { %v780_v24 = vld [vmem:[%s4729_s21 + $0x10] sm:$0xff]  ;;  %v4788_v25 = vld [vmem:[%s4729_s21] sm:$0xff]  ;;  %v4393_v56 = vld [vmem:[%s4753_s18 + $0x8] sm:$0xff]   ;;  %s4527_s12 = scalar_lea.vmem %s4526_s30, 4096 }
  0x31   : > { %v436_v27 = vld [vmem:[%s4793_s26 + $0x20] sm:$0xff]  ;;  %v438_v28 = vld [vmem:[%s4793_s26 + $0x30] sm:$0xff]  ;;  %s1736_s21 = sadd.f32 1.0, %s1112_s11 }
  0x32   : > { %v440_v29 = vld [vmem:[%s4793_s26 + $0x40] sm:$0xff]  ;;  %v442_v30 = vld [vmem:[%s4793_s26 + $0x50] sm:$0xff] }
  0x33   : > { %4364 = vset.pattern.permute.xlu1 %v4590_v12  ;;  %863 = vperm.xlu0 %4362, %v791_v11   ;;  %v444_v31 = vld [vmem:[%s4793_s26 + $0x60] sm:$0xff]  ;;  %v446_v32 = vld [vmem:[%s4793_s26 + $0x70] sm:$0xff] }
  0x34   : > { %1057 = vperm.xlu1 %4364, %v793_v8   ;;  %v448_v33 = vld [vmem:[%s4793_s26 + $0x80] sm:$0xff]  ;;  %v450_v34 = vld [vmem:[%s4793_s26 + $0x90] sm:$0xff]  ;;  %v435_v8 = vld [vmem:[%s4793_s26 + $0x18] sm:$0xff] }
  0x35   : > { %v452_v35 = vld [vmem:[%s4793_s26 + $0xa0] sm:$0xff]  ;;  %v454_v36 = vld [vmem:[%s4793_s26 + $0xb0] sm:$0xff] }
  0x36   : > { %v456_v37 = vld [vmem:[%s4793_s26 + $0xc0] sm:$0xff]  ;;  %v458_v38 = vld [vmem:[%s4793_s26 + $0xd0] sm:$0xff] }
  0x37   : > { %853 = vperm.xlu0 %4362, %v789_v13   ;;  %v460_v39 = vld [vmem:[%s4793_s26 + $0xe0] sm:$0xff]  ;;  %v462_v42 = vld [vmem:[%s4793_s26 + $0xf0] sm:$0xff] }
  0x38   : > { %4365 = vset.pattern.permute.xlu1 %v6271_v2  ;;  %v432_v54 = vld [vmem:[%s4793_s26] sm:$0xff]  ;;  %v434_v60 = vld [vmem:[%s4793_s26 + $0x10] sm:$0xff] }
  0x39   : > { %858 = vperm.xlu1 %4365, %v790_v14   ;;  %v4392_v55 = vld [vmem:[%s4753_s18] sm:$0xff]  }
  0x3a   : > { %4126 = vmatprep.mubr.msk.bf16.mxu0 %vm6264_vm0, %v4392_v55 }
  0x3b   : > { %843 = vperm.xlu0 %4362, %v787_v15   ;;  %4127 = vmatmul.mubr.msk.bf16.vlgmr.msra.gmra.mxu0 %vm6264_vm0, %v4393_v56  ;;  %v443_v56 = vld [vmem:[%s4793_s26 + $0x58] sm:$0xff] }
  0x3d   : > { %4366 = vset.pattern.permute.xlu1 %v4588_v1 }
  0x3e   : > { %945 = vperm.xlu1 %4366, %v790_v14  }
  0x3f   : > { %833 = vperm.xlu0 %4362, %v785_v16  }
  0x42   : > { %949 = vperm.xlu1 %4366, %v791_v11  }
  0x43   : > { %823 = vperm.xlu0 %4362, %v4763_v17  }
  0x46   : > { %4367 = vset.pattern.permute.xlu1 %v4590_v12 }
  0x47   : > { %1049 = vperm.xlu1 %4367, %v791_v11   ;;  %813 = vperm.xlu0 %4362, %v4767_v18   ;;  %v4394_v11 = vld [vmem:[%s4753_s18 + $0x10] sm:$0xff]  }
  0x48   : > { %4130 = vmatprep.mubr.msk.bf16.mxu0 %vm6264_vm0, %v4394_v11 }
  0x4b   : > { %4368 = vset.pattern.permute.xlu1 %v6271_v2  ;;  %803 = vperm.xlu0 %4362, %v4771_v19  }
  0x4c   : > { %848 = vperm.xlu1 %4368, %v788_v20  }
  0x4f   : > { %4384 = vset.pattern.permute.xlu0 %v4590_v12 }
  0x50   : > { %4369 = vset.pattern.permute.xlu1 %v4588_v1  ;;  %1053 = vperm.xlu0 %4384, %v792_v4   ;;  %v4865_v4 = vrot.slane %v794_v61, %v4740_v6 }
  0x51   : > { %937 = vperm.xlu1 %4369, %v788_v20  }
  0x54   : > { %1045 = vperm.xlu0 %4384, %v790_v14  }
  0x55   : > { %941 = vperm.xlu1 %4369, %v789_v13  }
  0x58   : > { %1037 = vperm.xlu0 %4384, %v788_v20  }
  0x59   : > { %4370 = vset.pattern.permute.xlu1 %v4590_v12 }
  0x5a   : > { %1041 = vperm.xlu1 %4370, %v789_v13  }
  0x5c   : > { %1029 = vperm.xlu0 %4384, %v786_v21  }
  0x5e   : > { %4371 = vset.pattern.permute.xlu1 %v6271_v2 }
  0x5f   : > { %838 = vperm.xlu1 %4371, %v786_v21  }
  0x60   : > { %1021 = vperm.xlu0 %4384, %v784_v22  }
  0x63   : > { %4372 = vset.pattern.permute.xlu1 %v4588_v1 }
  0x64   : > { %929 = vperm.xlu1 %4372, %v786_v21   ;;  %1013 = vperm.xlu0 %4384, %v782_v23  }
  0x68   : > { %933 = vperm.xlu1 %4372, %v787_v15   ;;  %1005 = vperm.xlu0 %4384, %v780_v24  }
  0x6c   : > { %4373 = vset.pattern.permute.xlu1 %v4590_v12  ;;  %997 = vperm.xlu0 %4384, %v4788_v25  }
  0x6d   : > { %1033 = vperm.xlu1 %4373, %v787_v15  }
  0x70   : > { %4388 = vset.pattern.permute.xlu0 %v6271_v2 }
  0x71   : > { %4374 = vset.pattern.permute.xlu1 %v6271_v2  ;;  %468 = vperm.xlu0 %4388, %v433_v26  }
  0x72   : > { %828 = vperm.xlu1 %4374, %v784_v22  }
  0x75   : > { %477 = vperm.xlu0 %4388, %v436_v27   ;;  %v439_v27 = vld [vmem:[%s4793_s26 + $0x38] sm:$0xff] }
  0x76   : > { %4375 = vset.pattern.permute.xlu1 %v4588_v1 }
  0x77   : > { %921 = vperm.xlu1 %4375, %v784_v22  }
  0x79   : > { %483 = vperm.xlu0 %4388, %v438_v28   ;;  %v4396_v28 = vld [vmem:[%s4753_s18 + $0x20] sm:$0xff]  }
  0x7b   : > { %925 = vperm.xlu1 %4375, %v785_v16  }
  0x7d   : > { %489 = vperm.xlu0 %4388, %v440_v29  }
  0x7f   : > { %4376 = vset.pattern.permute.xlu1 %v4590_v12 }
  0x80   : > { %1025 = vperm.xlu1 %4376, %v785_v16  }
  0x81   : > { %495 = vperm.xlu0 %4388, %v442_v30   ;;  %v4890_v30 = vld [vmem:[%s6262_s9] ss:$0 sm:$0xff] }
  0x84   : > { %4377 = vset.pattern.permute.xlu1 %v6271_v2 }
  0x85   : > { %818 = vperm.xlu1 %4377, %v782_v23   ;;  %501 = vperm.xlu0 %4388, %v444_v31  }
  0x89   : > { %4378 = vset.pattern.permute.xlu1 %v4588_v1  ;;  %507 = vperm.xlu0 %4388, %v446_v32  }
  0x8a   : > { %913 = vperm.xlu1 %4378, %v782_v23  }
  0x8d   : > { %513 = vperm.xlu0 %4388, %v448_v33  }
  0x8e   : > { %917 = vperm.xlu1 %4378, %v4763_v17  }
  0x91   : > { %519 = vperm.xlu0 %4388, %v450_v34   ;;  %v4397_v34 = vld [vmem:[%s4753_s18 + $0x28] sm:$0xff]  }
  0x92   : > { %4379 = vset.pattern.permute.xlu1 %v4590_v12 }
  0x93   : > { %1017 = vperm.xlu1 %4379, %v4763_v17  }
  0x95   : > { %525 = vperm.xlu0 %4388, %v452_v35  }
  0x97   : > { %4380 = vset.pattern.permute.xlu1 %v6271_v2 }
  0x98   : > { %808 = vperm.xlu1 %4380, %v780_v24  }
  0x99   : > { %531 = vperm.xlu0 %4388, %v454_v36  }
  0x9c   : > { %4381 = vset.pattern.permute.xlu1 %v4588_v1 }
  0x9d   : > { %905 = vperm.xlu1 %4381, %v780_v24   ;;  %537 = vperm.xlu0 %4388, %v456_v37  }
  0xa1   : > { %909 = vperm.xlu1 %4381, %v4767_v18   ;;  %543 = vperm.xlu0 %4388, %v458_v38  }
  0xa5   : > { %4382 = vset.pattern.permute.xlu1 %v4590_v12  ;;  %549 = vperm.xlu0 %4388, %v460_v39  }
  0xa6   : > { %v954_v40 = vpop.permute.xlu1 %953  ;;  %v869_v41 = vpop.permute.xlu0 %868  ;;  %1009 = vperm.xlu1 %4382, %v4767_v18   ;;  %v437_v18 = vld [vmem:[%s4793_s26 + $0x28] sm:$0xff] }
  0xa9   : > { %555 = vperm.xlu0 %4388, %v462_v42  }
  0xaa   : > { %v958_v43 = vpop.permute.xlu1 %957  ;;  %v874_v44 = vpop.permute.xlu0 %873  ;;  %4383 = vset.pattern.permute.xlu1 %v6271_v2 }
  0xab   : > { %798 = vperm.xlu1 %4383, %v4788_v25   ;;  %v979_v13 = vmul.f32 %v4865_v4, %v958_v43 }
  0xad   : > { %4389 = vset.pattern.permute.xlu0 %v4590_v12 }
  0xae   : > { %v864_v45 = vpop.permute.xlu0 %863 }
  0xaf   : > { %v1058_v46 = vpop.permute.xlu1 %1057  ;;  %4385 = vset.pattern.permute.xlu1 %v4588_v1  ;;  %v4862_v1 = vrot.slane %v794_v61, %v4737_v5 }
  0xb0   : > { %897 = vperm.xlu1 %4385, %v4788_v25   ;;  %v1079_v16 = vmul.f32 %v4867_v7, %v1058_v46 }
  0xb1   : > { %v895_v14 = vmul.f32 %v4862_v1, %v874_v44  ;;  %v894_v20 = vmul.f32 %v4862_v1, %v869_v41  ;;  %v893_v22 = vmul.f32 %v4862_v1, %v864_v45 }
  0xb2   : > { %v4831_v47 = vpop.permute.xlu0 %853 }
  0xb3   : > { %v995_v21 = vadd.f32 %v979_v13, %v895_v14 }
  0xb4   : > { %v859_v48 = vpop.permute.xlu1 %858  ;;  %901 = vperm.xlu1 %4385, %v4771_v19  }
  0xb5   : > { %v1095_v24 = vadd.f32 %v1079_v16, %v995_v21  ;;  %v892_v35 = vmul.f32 %v4862_v1, %v859_v48  ;;  %v891_v48 = vmul.f32 %v4862_v1, %v4831_v47  ;;  %v445_v16 = vld [vmem:[%s4793_s26 + $0x68] sm:$0xff]  ;;  %v447_v21 = vld [vmem:[%s4793_s26 + $0x78] sm:$0xff] }
  0xb6   : > { %v4837_v50 = vpop.permute.xlu0 %843 }
  0xb7   : > { %v4900_v41 = vadd.f32 %v1095_v24, %v4890_v30  ;;  %v4401_v24 = vld [vmem:[%s4753_s18 + $0x48] sm:$0xff]  }
  0xb8   : > { %4386 = vset.pattern.permute.xlu1 %v4590_v12  ;;  %v4395_v12 = vld [vmem:[%s4753_s18 + $0x18] sm:$0xff]  }
  0xb9   : > { %v946_v52 = vpop.permute.xlu1 %945  ;;  %1001 = vperm.xlu1 %4386, %v4771_v19   ;;  %4131 = vmatmul.mubr.msk.bf16.gmra.mxu0 %vm6264_vm0, %v4395_v12  ;;  %v978_v19 = vmul.f32 %v4865_v4, %v954_v40  ;;  %v441_v40 = vld [vmem:[%s4793_s26 + $0x48] sm:$0xff]  ;;  %6392 = vst [vmem:[#allocation13_spill] sm:$0xff] %v4900_v41 }
  0xba   : > { %v4844_v53 = vpop.permute.xlu0 %833  ;;  %v976_v25 = vmul.f32 %v4865_v4, %v946_v52  ;;  %4134 = vmatprep.mubr.msk.bf16.mxu0 %vm6264_vm0, %v4396_v28 }
  0xbb   : > { %v994_v29 = vadd.f32 %v978_v19, %v894_v20 }
  0xbc   : > { %v992_v38 = vadd.f32 %v976_v25, %v892_v35  ;;  %v889_v35 = vmul.f32 %v4862_v1, %v4837_v50 }
  0xbd   : > { %v950_v57 = vpop.permute.xlu1 %949  ;;  %4387 = vset.pattern.permute.xlu1 %v6271_v2 }
  0xbe   : > { %465 = vperm.xlu1 %4387, %v432_v54   ;;  %v4851_v58 = vpop.permute.xlu0 %823  ;;  %v977_v23 = vmul.f32 %v4865_v4, %v950_v57  ;;  %v4398_v57 = vld [vmem:[%s4753_s18 + $0x30] sm:$0xff]  }
  0xc0   : > { %v993_v36 = vadd.f32 %v977_v23, %v893_v22  ;;  %v4400_v22 = vld [vmem:[%s4753_s18 + $0x40] sm:$0xff]  }
  0xc1   : > { %4135 = vmatmul.mubr.msk.bf16.gmra.mxu0 %vm6264_vm0, %v4397_v34  ;;  %v4403_v34 = vld [vmem:[%s4753_s18 + $0x58] sm:$0xff]  }
  0xc2   : > { %v1050_v62 = vpop.permute.xlu1 %1049  ;;  %471 = vperm.xlu1 %4387, %v434_v60   ;;  %v4859_v63 = vpop.permute.xlu0 %813  ;;  %4138 = vmatprep.mubr.msk.bf16.mxu0 %vm6264_vm0, %v4398_v57 }
  0xc3   : > { %v1077_v31 = vmul.f32 %v4867_v7, %v1050_v62  ;;  %v4399_v62 = vld [vmem:[%s4753_s18 + $0x38] sm:$0xff]  }
  0xc5   : > { %v1093_v42 = vadd.f32 %v1077_v31, %v993_v36 }
  0xc6   : > { %474 = vperm.xlu1 %4387, %v435_v8   ;;  %v4875_v15 = vpop.permute.xlu0 %803 }
  0xc7   : > { %v849_v17 = vpop.permute.xlu1 %848  ;;  %v4916_v59 = vadd.f32 %v1093_v42, %v4890_v30 }
  0xc8   : > { %v890_v51 = vmul.f32 %v4862_v1, %v849_v17 }
  0xc9   : > { %6394 = vst [vmem:[#allocation15_spill] sm:$0xff] %v4916_v59  ;;  %4139 = vmatmul.mubr.msk.bf16.gmra.mxu0 %vm6264_vm0, %v4399_v62 }
  0xca   : > { %480 = vperm.xlu1 %4387, %v437_v18   ;;  %4142 = vmatprep.mubr.msk.bf16.mxu0 %vm6264_vm0, %v4400_v22 }
  0xcb   : > { %v1054_v26 = vpop.permute.xlu0 %1053 }
  0xcc   : > { %v1078_v32 = vmul.f32 %v4867_v7, %v1054_v26  ;;  %v938_v33 = vpop.permute.xlu1 %937  ;;  %v449_v26 = vld [vmem:[%s4793_s26 + $0x88] sm:$0xff] }
  0xcd   : > { %v974_v43 = vmul.f32 %v4865_v4, %v938_v33  ;;  %v4402_v33 = vld [vmem:[%s4753_s18 + $0x50] sm:$0xff]  }
  0xce   : > { %v1094_v37 = vadd.f32 %v1078_v32, %v994_v29  ;;  %486 = vperm.xlu1 %4387, %v439_v27   ;;  %v451_v32 = vld [vmem:[%s4793_s26 + $0x98] sm:$0xff] }
  0xcf   : > { %v1046_v39 = vpop.permute.xlu0 %1045  ;;  %v990_v60 = vadd.f32 %v974_v43, %v890_v51 }
  0xd0   : > { %v1076_v44 = vmul.f32 %v4867_v7, %v1046_v39  ;;  %v942_v45 = vpop.permute.xlu1 %941  ;;  %v4905_v46 = vadd.f32 %v1094_v37, %v4890_v30  ;;  %v453_v39 = vld [vmem:[%s4793_s26 + $0xa8] sm:$0xff] }
  0xd1   : > { %v975_v49 = vmul.f32 %v4865_v4, %v942_v45  ;;  %4143 = vmatmul.mubr.msk.bf16.gmra.mxu0 %vm6264_vm0, %v4401_v24  ;;  %v455_v45 = vld [vmem:[%s4793_s26 + $0xb8] sm:$0xff] }
  0xd2   : > { %6393 = vst [vmem:[#allocation14_spill] sm:$0xff] %v4905_v46  ;;  %v1092_v52 = vadd.f32 %v1076_v44, %v992_v38  ;;  %492 = vperm.xlu1 %4387, %v441_v40   ;;  %v1429_v54 = vpack.c.bf16 %v4900_v41, %v4905_v46  ;;  %4146 = vmatprep.mubr.msk.bf16.mxu0 %vm6264_vm0, %v4402_v33  ;;  %v4417_v41 = vld [vmem:[%s6260_s7 + $0x40] ss:$8 sps:$4 sm:$0xff]  }
  0xd3   : > { %v1038_v55 = vpop.permute.xlu0 %1037  ;;  %v991_v8 = vadd.f32 %v975_v49, %v891_v48  ;;  %v4404_v48 = vld [vmem:[%s4753_s18 + $0x60] sm:$0xff]   ;;  %v4405_v49 = vld [vmem:[%s4753_s18 + $0x68] sm:$0xff]  }
  0xd4   : > { %v4919_v61 = vadd.f32 %v1092_v52, %v4890_v30  ;;  %v1074_v47 = vmul.f32 %v4867_v7, %v1038_v55  ;;  %4158 = vmatprep.subr.bf16.mxu1 %v1429_v54 }
  0xd5   : > { %v1042_v11 = vpop.permute.xlu1 %1041  ;;  %4159 = vmatpush3.bf16.msra.mxu1 %v1429_v54 }
  0xd6   : > { %6395 = vst [vmem:[#allocation16_spill] sm:$0xff] %v4919_v61  ;;  %v1090_v12 = vadd.f32 %v1074_v47, %v990_v60  ;;  %v1075_v13 = vmul.f32 %v4867_v7, %v1042_v11  ;;  %498 = vperm.xlu1 %4387, %v443_v56   ;;  %v1428_v14 = vpack.c.bf16 %v4916_v59, %v4919_v61  ;;  %v457_v56 = vld [vmem:[%s4793_s26 + $0xc8] sm:$0xff]  ;;  %v459_v60 = vld [vmem:[%s4793_s26 + $0xd8] sm:$0xff]  ;;  %v4406_v47 = vld [vmem:[%s4753_s18 + $0x70] sm:$0xff]  }
  0xd7   : > { %v1030_v28 = vpop.permute.xlu0 %1029  ;;  %v4420_v61 = vld [vmem:[%s6260_s7 + $0x30] ss:$8 sps:$4 sm:$0xff]  }
  0xd8   : > { %v1091_v17 = vadd.f32 %v1075_v13, %v991_v8  ;;  %4160 = vmatprep.subr.bf16.mxu1 %v1428_v14  ;;  %v4930_v18 = vadd.f32 %v1090_v12, %v4890_v30  ;;  %v1072_v37 = vmul.f32 %v4867_v7, %v1030_v28  ;;  %v4407_v8 = vld [vmem:[%s4753_s18 + $0x78] sm:$0xff]  }
  0xd9   : > { %4161 = vmatpush3.bf16.msra.mxu1 %v1428_v14  ;;  %4147 = vmatmul.mubr.msk.bf16.gmra.mxu0 %vm6264_vm0, %v4403_v34  ;;  %v461_v14 = vld [vmem:[%s4793_s26 + $0xe8] sm:$0xff] }
  0xda   : > { %6396 = vst [vmem:[#allocation17_spill] sm:$0xff] %v4930_v18  ;;  %v4933_v19 = vadd.f32 %v1091_v17, %v4890_v30  ;;  %v839_v20 = vpop.permute.xlu1 %838  ;;  %504 = vperm.xlu1 %4387, %v445_v16   ;;  %4150 = vmatprep.mubr.msk.bf16.mxu0 %vm6264_vm0, %v4404_v48  ;;  %v887_v16 = vmul.f32 %v4862_v1, %v4844_v53 }
  0xdb   : > { %v888_v29 = vmul.f32 %v4862_v1, %v839_v20  ;;  %v1022_v11 = vpop.permute.xlu0 %1021 }
  0xdc   : > { %6397 = vst [vmem:[#allocation18_spill] sm:$0xff] %v4933_v19  ;;  %v1427_v23 = vpack.c.bf16 %v4933_v19, %v4930_v18  ;;  %v1070_v20 = vmul.f32 %v4867_v7, %v1022_v11 }
  0xde   : > { %4162 = vmatprep.subr.bf16.mxu1 %v1427_v23  ;;  %510 = vperm.xlu1 %4387, %v447_v21  }
  0xdf   : > { %v930_v25 = vpop.permute.xlu1 %929  ;;  %4163 = vmatpush3.bf16.msra.mxu1 %v1427_v23  ;;  %v463_v23 = vld [vmem:[%s4793_s26 + $0xf8] sm:$0xff]  ;;  %s3605_s26 = sld [smem:[#allocation2 + $0x1]] }
  0xe0   : > { %v972_v27 = vmul.f32 %v4865_v4, %v930_v25 }
  0xe1   : > { %4151 = vmatmul.mubr.msk.bf16.gmra.mxu0 %vm6264_vm0, %v4405_v49 }
  0xe2   : > { %516 = vperm.xlu1 %4387, %v449_v26   ;;  %v988_v36 = vadd.f32 %v972_v27, %v888_v29  ;;  %4154 = vmatprep.mubr.msk.bf16.mxu0 %vm6264_vm0, %v4406_v47 }
  0xe3   : > { %v934_v31 = vpop.permute.xlu1 %933 }
  0xe4   : > { %v973_v38 = vmul.f32 %v4865_v4, %v934_v31  ;;  %v1088_v42 = vadd.f32 %v1072_v37, %v988_v36  ;;  %v1014_v36 = vpop.permute.xlu0 %1013 }
  0xe5   : > { %v1068_v37 = vmul.f32 %v4867_v7, %v1014_v36  ;;  %v881_v36 = vmul.f32 %v4862_v1, %v4875_v15  ;;  %v6408_v15 = vmov 0  ;;  %s2783_s11 = sadd.f32 1.0, %s3605_s26  ;;  %s3350_s26 = sshll.u32 %s6169_s20, 4  ;;  %s6207_s26 = int_to_ptr.vmem [resolvable:$true] %s3350_s26 }
  0xe6   : > { %522 = vperm.xlu1 %4387, %v451_v32   ;;  %v989_v43 = vadd.f32 %v973_v38, %v889_v35  ;;  %v4960_v51 = vadd.f32 %v1088_v42, %v4890_v30  ;;  %s4521_s17 = scalar_lea.vmem %s6207_s26, 2048  ;;  %p4528_p13 = scmp.lt.s32.totalorder %s6207_s26, %s4526_s30 }
  0xe7   : > { %p4522_p9 = scmp.ne.s32.totalorder %s6207_s26, %s4521_s17  ;;  %p4529_p0 = scmp.lt.s32.totalorder %s4527_s12, %s4521_s17 }
  0xe8   : > { %v1034_v40 = vpop.permute.xlu1 %1033  ;;  %6398 = vst [vmem:[#allocation19_spill] sm:$0xff] %v4960_v51 }
  0xe9   : > { %v1073_v44 = vmul.f32 %v4867_v7, %v1034_v40  ;;  %4155 = vmatmul.mubr.msk.bf16.gmra.mxu0 %vm6264_vm0, %v4407_v8  ;;  %v885_v40 = vmul.f32 %v4862_v1, %v4851_v58  ;;  %p4523_p10 = pnand %p4522_p9, %p4688_p5  ;;  %p4530_p1 = por %p4529_p0, %p4528_p13 }
  0xea   : > { %528 = vperm.xlu1 %4387, %v453_v39  }
  0xeb   : > { %v1089_v50 = vadd.f32 %v1073_v44, %v989_v43  ;;  %p4524_p12 = pneg %p4523_p10 }
  0xed   : > { %v4963_v52 = vadd.f32 %v1089_v50, %v4890_v30  ;;  %v829_v54 = vpop.permute.xlu1 %828  ;;  %p4531_p2 = pnand %p4530_p1, %p4524_p12 }
  0xee   : > { %534 = vperm.xlu1 %4387, %v455_v45   ;;  %v886_v12 = vmul.f32 %v4862_v1, %v829_v54 }
  0xef   : > { %6399 = vst [vmem:[#allocation20_spill] sm:$0xff] %v4963_v52  ;;  %v1426_v55 = vpack.c.bf16 %v4963_v52, %v4960_v51 }
  0xf1   : > { %4164 = vmatprep.subr.bf16.mxu1 %v1426_v55 }
  0xf2   : > { %v922_v57 = vpop.permute.xlu1 %921  ;;  %4165 = vmatpush3.bf16.msra.mxu1 %v1426_v55  ;;  %540 = vperm.xlu1 %4387, %v457_v56   ;;  %v1006_v56 = vpop.permute.xlu0 %1005 }
  0xf3   : > { %v970_v62 = vmul.f32 %v4865_v4, %v922_v57  ;;  %v1066_v8 = vmul.f32 %v4867_v7, %v1006_v56 }
  0xf5   : > { %v986_v17 = vadd.f32 %v970_v62, %v886_v12 }
  0xf6   : > { %v926_v13 = vpop.permute.xlu1 %925  ;;  %546 = vperm.xlu1 %4387, %v459_v60   ;;  %v998_v62 = vpop.permute.xlu0 %997 }
  0xf7   : > { %v971_v21 = vmul.f32 %v4865_v4, %v926_v13  ;;  %v1086_v24 = vadd.f32 %v1070_v20, %v986_v17  ;;  %v883_v13 = vmul.f32 %v4862_v1, %v4859_v63 }
  0xf9   : > { %v987_v25 = vadd.f32 %v971_v21, %v887_v16  ;;  %v4985_v28 = vadd.f32 %v1086_v24, %v4890_v30 }
  0xfa   : > { %552 = vperm.xlu1 %4387, %v461_v14   ;;  %v469_v21 = vpop.permute.xlu0 %468 }
  0xfb   : > { %v1026_v22 = vpop.permute.xlu1 %1025  ;;  %6400 = vst [vmem:[#allocation21_spill] sm:$0xff] %v4985_v28 }
  0xfc   : > { %v1071_v26 = vmul.f32 %v4867_v7, %v1026_v22 }
  0xfe   : > { %v1087_v27 = vadd.f32 %v1071_v26, %v987_v25  ;;  %558 = vperm.xlu1 %4387, %v463_v23  }
 0x100   : > { %v4988_v29 = vadd.f32 %v1087_v27, %v4890_v30  ;;  %v819_v53 = vpop.permute.xlu1 %818  ;;  %v478_v27 = vpop.permute.xlu0 %477 }
 0x101   : > { %v884_v34 = vmul.f32 %v4862_v1, %v819_v53 }
 0x102   : > { %6401 = vst [vmem:[#allocation22_spill] sm:$0xff] %v4988_v29  ;;  %v1425_v31 = vpack.c.bf16 %v4988_v29, %v4985_v28 }
 0x104   : > { %4166 = vmatprep.subr.bf16.mxu1 %v1425_v31 }
 0x105   : > { %v914_v32 = vpop.permute.xlu1 %913  ;;  %4167 = vmatpush3.bf16.msra.mxu1 %v1425_v31  ;;  %v484_v31 = vpop.permute.xlu0 %483 }
 0x106   : > { %v968_v33 = vmul.f32 %v4865_v4, %v914_v32 }
 0x108   : > { %v984_v38 = vadd.f32 %v968_v33, %v884_v34 }
 0x109   : > { %v918_v35 = vpop.permute.xlu1 %917 }
 0x10a   : > { %v969_v39 = vmul.f32 %v4865_v4, %v918_v35  ;;  %v1084_v43 = vadd.f32 %v1068_v37, %v984_v38  ;;  %v1064_v37 = vmul.f32 %v4867_v7, %v998_v62  ;;  %v5029_v38 = vand.u32 127, %v430_v0 }
 0x10c   : > { %v985_v44 = vadd.f32 %v969_v39, %v885_v40  ;;  %v5003_v54 = vadd.f32 %v1084_v43, %v4890_v30  ;;  %v490_v40 = vpop.permute.xlu0 %489  ;;  %vm561_vm1 = vcmp.eq.s32.totalorder %v469_v21, %v5029_v38  ;;  %vm564_vm7 = vcmp.eq.s32.totalorder %v478_v27, %v5029_v38 }
 0x10d   : > { %vm566_vm10 = vcmp.eq.s32.totalorder %v484_v31, %v5029_v38  ;;  %vm568_vm13 = vcmp.eq.s32.totalorder %v490_v40, %v5029_v38  ;;  %v6426_v21 = vmov 0 }
 0x10e   : > { %v1018_v42 = vpop.permute.xlu1 %1017  ;;  %6403 = vst [vmem:[#allocation24_spill] sm:$0xff] %v5003_v54 }
 0x10f   : > { %v1069_v50 = vmul.f32 %v4867_v7, %v1018_v42 }
 0x110   : > { %v496_v0 = vpop.permute.xlu0 %495 }
 0x111   : > { %v1085_v45 = vadd.f32 %v1069_v50, %v985_v44 }
 0x113   : > { %v5000_v48 = vadd.f32 %v1085_v45, %v4890_v30  ;;  %v809_v49 = vpop.permute.xlu1 %808 }
 0x114   : > { %v882_v60 = vmul.f32 %v4862_v1, %v809_v49  ;;  %v6273_v49 = vmov 1.0|1.0  }
 0x115   : > { %6402 = vst [vmem:[#allocation23_spill] sm:$0xff] %v5000_v48  ;;  %v1424_v55 = vpack.c.bf16 %v5000_v48, %v5003_v54 }
 0x117   : > { %4168 = vmatprep.subr.bf16.mxu1 %v1424_v55 }
 0x118   : > { %v906_v57 = vpop.permute.xlu1 %905  ;;  %4169 = vmatpush3.bf16.msra.mxu1 %v1424_v55 }
 0x119   : > { %v966_v58 = vmul.f32 %v4865_v4, %v906_v57  ;;  %v6411_v57 = vmov 0 }
 0x11b   : > { %v982_v11 = vadd.f32 %v966_v58, %v882_v60 }
 0x11c   : > { %v910_v47 = vpop.permute.xlu1 %909 }
 0x11d   : > { %v967_v12 = vmul.f32 %v4865_v4, %v910_v47  ;;  %v1082_v16 = vadd.f32 %v1066_v8, %v982_v11  ;;  %v6414_v47 = vmov 0  ;;  %v6417_v8 = vmov 0 }
 0x11f   : > { %v983_v17 = vadd.f32 %v967_v12, %v883_v13  ;;  %v5018_v25 = vadd.f32 %v1082_v16, %v4890_v30  ;;  %v6420_v13 = vmov 0 }
 0x121   : > { %v1010_v14 = vpop.permute.xlu1 %1009  ;;  %6405 = vst [vmem:[#allocation26_spill] sm:$0xff] %v5018_v25 }
 0x122   : > { %v1067_v20 = vmul.f32 %v4867_v7, %v1010_v14 }
 0x124   : > { %v1083_v22 = vadd.f32 %v1067_v20, %v983_v17  ;;  %v6423_v17 = vmov 0 }
 0x126   : > { %v5015_v23 = vadd.f32 %v1083_v22, %v4890_v30  ;;  %v799_v24 = vpop.permute.xlu1 %798 }
 0x127   : > { %v880_v32 = vmul.f32 %v4862_v1, %v799_v24 }
 0x128   : > { %6404 = vst [vmem:[#allocation25_spill] sm:$0xff] %v5015_v23  ;;  %v1423_v26 = vpack.c.bf16 %v5015_v23, %v5018_v25 }
 0x12a   : > { %4170 = vmatprep.subr.bf16.mxu1 %v1423_v26 }
 0x12b   : > { %4171 = vmatpush3.bf16.msra.mxu1 %v1423_v26  ;;  %v898_v63 = vpop.permute.xlu1 %897  ;;  %v6429_v26 = vmov 0 }
 0x12c   : > { %v964_v53 = vmul.f32 %v4865_v4, %v898_v63 }
 0x12e   : > { %v980_v34 = vadd.f32 %v964_v53, %v880_v32  ;;  %v6432_v53 = vmov 0  ;;  %v6435_v32 = vmov 0 }
 0x12f   : > { %v902_v33 = vpop.permute.xlu1 %901 }
 0x130   : > { %v965_v35 = vmul.f32 %v4865_v4, %v902_v33  ;;  %v1080_v42 = vadd.f32 %v1064_v37, %v980_v34 }
 0x132   : > { %v981_v43 = vadd.f32 %v965_v35, %v881_v36  ;;  %v5037_v1 = vadd.f32 %v1080_v42, %v4890_v30  ;;  %v6438_v35 = vmov 0  ;;  %v6444_v42 = vmov 0 }
 0x134   : > { %v1002_v39 = vpop.permute.xlu1 %1001  ;;  %6407 = vst [vmem:[#allocation28_spill] sm:$0xff] %v5037_v1 }
 0x135   : > { %v1065_v44 = vmul.f32 %v4867_v7, %v1002_v39  ;;  %v6441_v39 = vmov 0 }
 0x137   : > { %v1081_v50 = vadd.f32 %v1065_v44, %v981_v43 }
 0x139   : > { %v5034_v45 = vadd.f32 %v1081_v50, %v4890_v30  ;;  %v466_v4 = vpop.permute.xlu1 %465  ;;  %v502_v30 = vpop.permute.xlu0 %501  ;;  %v6447_v50 = vmov 0 }
 0x13a   : > { %vm560_vm2 = vcmp.eq.s32.totalorder %v466_v4, %v5029_v38 }
 0x13b   : > { %6406 = vst [vmem:[#allocation27_spill] sm:$0xff] %v5034_v45  ;;  %vm5040_vm3 = vmpackc.low %vm561_vm1, %vm560_vm2  ;;  %v1422_v7 = vpack.c.bf16 %v5034_v45, %v5037_v1  ;;  %vm570_vm1 = vcmp.eq.s32.totalorder %v496_v0, %v5029_v38 }
 0x13c   : > { %v6409_v15 = vsel %vm5040_vm3, 4294967295, %v6408_v15  ;;  %4174 = vmatprep.mubr.msk.bf16.mxu1 %vm5040_vm3, %v6273_v49 }
 0x13d   : > { %6410 = vst [vmem:[#allocation29_spill] sm:$0xff] %v6409_v15  ;;  %4172 = vmatprep.subr.bf16.mxu1 %v1422_v7  ;;  %v472_v55 = vpop.permute.xlu1 %471  ;;  %v508_v60 = vpop.permute.xlu0 %507 }
 0x13e   : > { %4173 = vmatpush3.bf16.msra.mxu1 %v1422_v7  ;;  %vm562_vm4 = vcmp.eq.s32.totalorder %v472_v55, %v5029_v38  ;;  %v6450_v7 = vmov 0 }
 0x141   : > { %v475_v56 = vpop.permute.xlu1 %474  ;;  %v514_v11 = vpop.permute.xlu0 %513 }
 0x142   : > { %vm563_vm5 = vcmp.eq.s32.totalorder %v475_v56, %v5029_v38  ;;  %v4128_v56 = vpop.f32.mrf.mxu0 }
 0x143   : > { %vm5051_vm6 = vmpackc.low %vm563_vm5, %vm562_vm4  ;;  %vm572_vm5 = vcmp.eq.s32.totalorder %v502_v30, %v5029_v38  ;;  %v6453_v30 = vmov 0 }
 0x144   : > { %v6412_v57 = vsel %vm5051_vm6, 4294967295, %v6411_v57  ;;  %4175 = vmatmul.mubr.msk.bf16.vlgmr.msra.gmra.mxu1 %vm5051_vm6, %v6273_v49 }
 0x145   : > { %6413 = vst [vmem:[#allocation30_spill] sm:$0xff] %v6412_v57  ;;  %v481_v58 = vpop.permute.xlu1 %480  ;;  %v520_v16 = vpop.permute.xlu0 %519 }
 0x146   : > { %vm565_vm8 = vcmp.eq.s32.totalorder %v481_v58, %v5029_v38  ;;  %v5185_v58 = vpop.f32.mrf.mxu0 }
 0x147   : > { %vm5060_vm9 = vmpackc.low %vm565_vm8, %vm564_vm7  ;;  %6456 = vst [vmem:[#allocation45_spill] sm:$0xff] %v5185_v58 }
 0x148   : > { %v6415_v47 = vsel %vm5060_vm9, 4294967295, %v6414_v47  ;;  %4178 = vmatprep.mubr.msk.bf16.mxu1 %vm5060_vm9, %v6273_v49 }
 0x149   : > { %6416 = vst [vmem:[#allocation31_spill] sm:$0xff] %v6415_v47  ;;  %v487_v62 = vpop.permute.xlu1 %486  ;;  %v526_v22 = vpop.permute.xlu0 %525  ;;  %v4416_v47 = vld [vmem:[%s6260_s7 + $0x54] ss:$8 sps:$4 sm:$0xff]  }
 0x14a   : > { %vm567_vm11 = vcmp.eq.s32.totalorder %v487_v62, %v5029_v38 }
 0x14b   : > { %vm5069_vm12 = vmpackc.low %vm567_vm11, %vm566_vm10  ;;  %vm574_vm10 = vcmp.eq.s32.totalorder %v508_v60, %v5029_v38  ;;  %v4129_v60 = vpop.f32.mrf.mxu0 }
 0x14c   : > { %v6418_v8 = vsel %vm5069_vm12, 4294967295, %v6417_v8  ;;  %4179 = vmatmul.mubr.msk.bf16.gmra.mxu1 %vm5069_vm12, %v6273_v49 }
 0x14d   : > { %6419 = vst [vmem:[#allocation32_spill] sm:$0xff] %v6418_v8  ;;  %v493_v12 = vpop.permute.xlu1 %492  ;;  %v532_v63 = vpop.permute.xlu0 %531  ;;  %v4411_v8 = vld [vmem:[%s6260_s7 + $0x60] ss:$8 sps:$4 sm:$0xff]  }
 0x14e   : > { %vm569_vm14 = vcmp.eq.s32.totalorder %v493_v12, %v5029_v38  ;;  %v5187_v62 = vpop.f32.mrf.mxu0 }
 0x14f   : > { %vm5078_vm15 = vmpackc.low %vm569_vm14, %vm568_vm13  ;;  %vm576_vm14 = vcmp.eq.s32.totalorder %v514_v11, %v5029_v38  ;;  %6457 = vst [vmem:[#allocation46_spill] sm:$0xff] %v5187_v62 }
 0x150   : > { %v6421_v13 = vsel %vm5078_vm15, 4294967295, %v6420_v13  ;;  %4182 = vmatprep.mubr.msk.bf16.mxu1 %vm5078_vm15, %v6273_v49 }
 0x151   : > { %6422 = vst [vmem:[#allocation33_spill] sm:$0xff] %v6421_v13  ;;  %v499_v14 = vpop.permute.xlu1 %498  ;;  %v538_v33 = vpop.permute.xlu0 %537 }
 0x152   : > { %vm571_vm2 = vcmp.eq.s32.totalorder %v499_v14, %v5029_v38 }
 0x153   : > { %vm5087_vm4 = vmpackc.low %vm571_vm2, %vm570_vm1 }
 0x154   : > { %v6424_v17 = vsel %vm5087_vm4, 4294967295, %v6423_v17  ;;  %4183 = vmatmul.mubr.msk.bf16.gmra.mxu1 %vm5087_vm4, %v6273_v49 }
 0x155   : > { %6425 = vst [vmem:[#allocation34_spill] sm:$0xff] %v6424_v17  ;;  %v505_v20 = vpop.permute.xlu1 %504  ;;  %v544_v37 = vpop.permute.xlu0 %543 }
 0x156   : > { %vm573_vm7 = vcmp.eq.s32.totalorder %v505_v20, %v5029_v38  ;;  %v6458_v20 = vmov 0 }
 0x157   : > { %vm5096_vm8 = vmpackc.low %vm573_vm7, %vm572_vm5  ;;  %vm578_vm5 = vcmp.eq.s32.totalorder %v520_v16, %v5029_v38  ;;  %v642_v16 = vadd.s32 8, %v4723_v3 }
 0x158   : > { %v6427_v21 = vsel %vm5096_vm8, 4294967295, %v6426_v21  ;;  %4186 = vmatprep.mubr.msk.bf16.mxu1 %vm5096_vm8, %v6273_v49 }
 0x159   : > { %6428 = vst [vmem:[#allocation35_spill] sm:$0xff] %v6427_v21  ;;  %v511_v24 = vpop.permute.xlu1 %510  ;;  %v550_v43 = vpop.permute.xlu0 %549 }
 0x15a   : > { %vm575_vm11 = vcmp.eq.s32.totalorder %v511_v24, %v5029_v38  ;;  %v6461_v24 = vmov 0 }
 0x15b   : > { %vm5105_vm13 = vmpackc.low %vm575_vm11, %vm574_vm10  ;;  %vm580_vm11 = vcmp.eq.s32.totalorder %v526_v22, %v5029_v38 }
 0x15c   : > { %v6430_v26 = vsel %vm5105_vm13, 4294967295, %v6429_v26  ;;  %4187 = vmatmul.mubr.msk.bf16.gmra.mxu1 %vm5105_vm13, %v6273_v49 }
 0x15d   : > { %6431 = vst [vmem:[#allocation36_spill] sm:$0xff] %v6430_v26  ;;  %v517_v27 = vpop.permute.xlu1 %516  ;;  %v556_v0 = vpop.permute.xlu0 %555 }
 0x15e   : > { %vm577_vm1 = vcmp.eq.s32.totalorder %v517_v27, %v5029_v38 }
 0x15f   : > { %vm5114_vm2 = vmpackc.low %vm577_vm1, %vm576_vm14 }
 0x160   : > { %v6433_v53 = vsel %vm5114_vm2, 4294967295, %v6432_v53  ;;  %4190 = vmatprep.mubr.msk.bf16.mxu1 %vm5114_vm2, %v6273_v49 }
 0x161   : > { %6434 = vst [vmem:[#allocation37_spill] sm:$0xff] %v6433_v53  ;;  %v523_v31 = vpop.permute.xlu1 %522 }
 0x162   : > { %vm579_vm7 = vcmp.eq.s32.totalorder %v523_v31, %v5029_v38 }
 0x163   : > { %vm5123_vm10 = vmpackc.low %vm579_vm7, %vm578_vm5  ;;  %vm582_vm5 = vcmp.eq.s32.totalorder %v532_v63, %v5029_v38 }
 0x164   : > { %v6436_v32 = vsel %vm5123_vm10, 4294967295, %v6435_v32  ;;  %4191 = vmatmul.mubr.msk.bf16.gmra.mxu1 %vm5123_vm10, %v6273_v49 }
 0x165   : > { %6437 = vst [vmem:[#allocation38_spill] sm:$0xff] %v6436_v32  ;;  %v529_v34 = vpop.permute.xlu1 %528 }
 0x166   : > { %vm581_vm14 = vcmp.eq.s32.totalorder %v529_v34, %v5029_v38 }
 0x167   : > { %vm5132_vm1 = vmpackc.low %vm581_vm14, %vm580_vm11  ;;  %vm584_vm11 = vcmp.eq.s32.totalorder %v538_v33, %v5029_v38 }
 0x168   : > { %v6439_v35 = vsel %vm5132_vm1, 4294967295, %v6438_v35  ;;  %4194 = vmatprep.mubr.msk.bf16.mxu1 %vm5132_vm1, %v6273_v49 }
 0x169   : > { %6440 = vst [vmem:[#allocation39_spill] sm:$0xff] %v6439_v35  ;;  %v535_v36 = vpop.permute.xlu1 %534 }
 0x16a   : > { %vm583_vm7 = vcmp.eq.s32.totalorder %v535_v36, %v5029_v38 }
 0x16b   : > { %vm5141_vm0 = vmpackc.low %vm583_vm7, %vm582_vm5  ;;  %vm586_vm5 = vcmp.eq.s32.totalorder %v544_v37, %v5029_v38 }
 0x16c   : > { %v6442_v39 = vsel %vm5141_vm0, 4294967295, %v6441_v39  ;;  %4195 = vmatmul.mubr.msk.bf16.gmra.mxu1 %vm5141_vm0, %v6273_v49 }
 0x16d   : > { %6443 = vst [vmem:[#allocation40_spill] sm:$0xff] %v6442_v39  ;;  %v541_v40 = vpop.permute.xlu1 %540 }
 0x16e   : > { %vm585_vm14 = vcmp.eq.s32.totalorder %v541_v40, %v5029_v38 }
 0x16f   : > { %vm5150_vm1 = vmpackc.low %vm585_vm14, %vm584_vm11  ;;  %vm588_vm11 = vcmp.eq.s32.totalorder %v550_v43, %v5029_v38 }
 0x170   : > { %v6445_v42 = vsel %vm5150_vm1, 4294967295, %v6444_v42  ;;  %4198 = vmatprep.mubr.msk.bf16.mxu1 %vm5150_vm1, %v6273_v49 }
 0x171   : > { %6446 = vst [vmem:[#allocation41_spill] sm:$0xff] %v6445_v42  ;;  %v547_v44 = vpop.permute.xlu1 %546 }
 0x172   : > { %vm587_vm7 = vcmp.eq.s32.totalorder %v547_v44, %v5029_v38 }
 0x173   : > { %vm5159_vm0 = vmpackc.low %vm587_vm7, %vm586_vm5  ;;  %vm590_vm5 = vcmp.eq.s32.totalorder %v556_v0, %v5029_v38 }
 0x174   : > { %v6448_v50 = vsel %vm5159_vm0, 4294967295, %v6447_v50  ;;  %4199 = vmatmul.mubr.msk.bf16.gmra.mxu1 %vm5159_vm0, %v6273_v49 }
 0x175   : > { %6449 = vst [vmem:[#allocation42_spill] sm:$0xff] %v6448_v50  ;;  %v553_v4 = vpop.permute.xlu1 %552 }
 0x176   : > { %vm589_vm14 = vcmp.eq.s32.totalorder %v553_v4, %v5029_v38 }
 0x177   : > { %vm5168_vm1 = vmpackc.low %vm589_vm14, %vm588_vm11  ;;  %vm667_vm11 = vcmp.eq.s32.totalorder %v4747_v10, %v4723_v3  ;;  %vm668_vm14 = vcmp.eq.s32.totalorder %v4744_v9, %v642_v16 }
 0x178   : > { %v6451_v7 = vsel %vm5168_vm1, 4294967295, %v6450_v7  ;;  %4202 = vmatprep.mubr.msk.bf16.mxu1 %vm5168_vm1, %v6273_v49 }
 0x179   : > { %6452 = vst [vmem:[#allocation43_spill] sm:$0xff] %v6451_v7  ;;  %v559_v55 = vpop.permute.xlu1 %558  ;;  %v4132_v11 = vpop.f32.mrf.mxu0 }
 0x17a   : > { %vm591_vm7 = vcmp.eq.s32.totalorder %v559_v55, %v5029_v38 }
 0x17b   : > { %vm5177_vm0 = vmpackc.low %vm591_vm7, %vm590_vm5  ;;  %v5189_v12 = vpop.f32.mrf.mxu0  ;;  %vm669_vm5 = vcmp.eq.s32.totalorder %v4747_v10, %v642_v16  ;;  %vm666_vm7 = vcmp.eq.s32.totalorder %v4744_v9, %v4723_v3 }
 0x17c   : > { %v6454_v30 = vsel %vm5177_vm0, 4294967295, %v6453_v30  ;;  %4203 = vmatmul.mubr.msk.bf16.gmra.mxu1 %vm5177_vm0, %v6273_v49  ;;  %vm5200_vm0 = vmpackc.low %vm669_vm5, %vm667_vm11 }
 0x17d   : > { %6455 = vst [vmem:[#allocation44_spill] sm:$0xff] %v6454_v30  ;;  %1917 = vmatprep.mubr.bf16.mxu1 %v6271_v2  ;;  %v4133_v38 = vpop.f32.mrf.mxu0  ;;  %v6459_v20 = vsel %vm5200_vm0, 4294967295, %v6458_v20  ;;  %3542 = vmatprep.mubr.msk.bf16.mxu0 %vm5200_vm0, %v6273_v49  ;;  %vm5209_vm1 = vmpackc.low %vm668_vm14, %vm666_vm7 }
 0x17e   : > { %6460 = vst [vmem:[#allocation47_spill] sm:$0xff] %v6459_v20  ;;  %v6462_v24 = vsel %vm5209_vm1, 4294967295, %v6461_v24 }
 0x17f   : > { %v5191_v14 = vpop.f32.mrf.mxu0  ;;  %6463 = vst [vmem:[#allocation48_spill] sm:$0xff] %v6462_v24 }
 0x181   : > { %v5204_v22 = vpop.f32.mrf.mxu0 }
 0x183   : > { %v5213_v27 = vpop.f32.mrf.mxu0 }
 0x185   : > { %v5215_v63 = vpop.f32.mrf.mxu0 }
 0x187   : > { %v5217_v31 = vpop.f32.mrf.mxu0 }
 0x189   : > { %v5219_v33 = vpop.f32.mrf.mxu0 }
 0x18b   : > { %v5221_v34 = vpop.f32.mrf.mxu0 }
 0x18d   : > { %v5223_v36 = vpop.f32.mrf.mxu0 }
 0x18f   : > { %v5225_v37 = vpop.f32.mrf.mxu0 }
 0x191   : > { %v5229_v44 = vpop.f32.mrf.mxu0 }
 0x193   : > { %v5233_v2 = vpop.f32.mrf.mxu0 }
 0x194   : > { %6466 = vst [vmem:[#allocation51_spill] sm:$0xff] %v5233_v2 }
 0x195   : > { %v5239_v39 = vpop.f32.mrf.mxu0 }
 0x204   : > { %v4176_v40 = vpop.f32.mrf.mxu1 }
 0x205   : > { %v1473_v4 = vadd.f32 %v4176_v40, %v4128_v56  ;;  %v5243_v56 = vpop.f32.mrf.mxu0 }
 0x206   : > { %v5227_v43 = vpop.f32.mrf.mxu1 }
 0x207   : > { %6464 = vst [vmem:[#allocation49_spill] sm:$0xff] %v5227_v43  ;;  %v1593_v49 = vmax.f32 %v1473_v4, 0.0 }
 0x208   : > { %v4177_v0 = vpop.f32.mrf.mxu1 }
 0x209   : > { %v1476_v55 = vadd.f32 %v4177_v0, %v4129_v60 }
 0x20a   : > { %v5231_v16 = vpop.f32.mrf.mxu1 }
 0x20b   : > { %6465 = vst [vmem:[#allocation50_spill] sm:$0xff] %v5231_v16  ;;  %v1594_v30 = vmax.f32 %v1476_v55, 0.0 }
 0x20c   : > { %v4180_v7 = vpop.f32.mrf.mxu1 }
 0x20d   : > { %v5235_v50 = vpack.c.bf16 %v1594_v30, %v1593_v49  ;;  %v1489_v35 = vadd.f32 %v4180_v7, %v4132_v11  ;;  %v5251_v49 = vpop.f32.mrf.mxu0 }
 0x20e   : > { %v5237_v42 = vpop.f32.mrf.mxu1 }
 0x20f   : > { %6467 = vst [vmem:[#allocation52_spill] sm:$0xff] %v5235_v50  ;;  %v1597_v60 = vmax.f32 %v1489_v35, 0.0  ;;  %v5257_v7 = vpop.f32.mrf.mxu0  ;;  %v4410_v35 = vld [vmem:[%s6260_s7 + $0x74] ss:$8 sps:$4 sm:$0xff]  }
 0x210   : > { %v4181_v32 = vpop.f32.mrf.mxu1  ;;  %1885 = vmatprep.subr.bf16.mxu1 %v4410_v35  ;;  %v4414_v35 = vld [vmem:[%s6260_s7 + $0x50] ss:$8 sps:$4 sm:$0xff]  }
 0x211   : > { %v1492_v53 = vadd.f32 %v4181_v32, %v4133_v38  ;;  %v5259_v38 = vpop.f32.mrf.mxu0 }
 0x212   : > { %v5241_v26 = vpop.f32.mrf.mxu1 }
 0x213   : > { %v1598_v40 = vmax.f32 %v1492_v53, 0.0  ;;  %v4408_v53 = vld [vmem:[%s6260_s7 + $0x70] ss:$8 sps:$4 sm:$0xff]   ;;  %v5270_v13 = vpop.f32.mrf.mxu0 }
 0x214   : > { %v5245_v0 = vpop.f32.mrf.mxu1  ;;  %1886 = vmatpush1.bf16.msra.mxu1 %v4408_v53  ;;  %v4419_v53 = vld [vmem:[%s6260_s7 + $0x44] ss:$8 sps:$4 sm:$0xff]  }
 0x215   : > { %v5247_v4 = vpack.c.bf16 %v1598_v40, %v1597_v60  ;;  %v4413_v40 = vld [vmem:[%s6260_s7 + $0x64] ss:$8 sps:$4 sm:$0xff]   ;;  %v4152_v15 = vpop.f32.mrf.mxu0 }
 0x216   : > { %v5249_v55 = vpop.f32.mrf.mxu1  ;;  %1887 = vmatprep.subr.bf16.mxu1 %v4413_v40 }
 0x217   : > { %v1391_v6 = vpop.f32.mrf.mxu0 }
 0x218   : > { %v5253_v30 = vpop.f32.mrf.mxu1  ;;  %1888 = vmatpush1.bf16.msra.mxu1 %v4411_v8  ;;  %v4422_v8 = vld [vmem:[%s6260_s7 + $0x34] ss:$8 sps:$4 sm:$0xff]  }
 0x219   : > { %1889 = vmatprep.subr.bf16.mxu1 %v4416_v47  ;;  %v4153_v59 = vpop.f32.mrf.mxu0 }
 0x21a   : > { %v5255_v21 = vpop.f32.mrf.mxu1 }
 0x21b   : > { %v1394_v18 = vpop.f32.mrf.mxu0 }
 0x21c   : > { %v4188_v32 = vpop.f32.mrf.mxu1  ;;  %1890 = vmatpush1.bf16.msra.mxu1 %v4414_v35 }
 0x21d   : > { %1891 = vmatprep.subr.bf16.mxu1 %v4419_v53  ;;  %v4156_v53 = vpop.f32.mrf.mxu0  ;;  %v1521_v1 = vadd.f32 %v4188_v32, %v5219_v33 }
 0x21e   : > { %v1512_v11 = vpop.f32.mrf.mxu1 }
 0x21f   : > { %v1407_v28 = vpop.f32.mrf.mxu0 }
 0x220   : > { %v4189_v60 = vpop.f32.mrf.mxu1  ;;  %1892 = vmatpush1.bf16.msra.mxu1 %v4417_v41 }
 0x221   : > { %1893 = vmatprep.subr.bf16.mxu1 %v4422_v8  ;;  %v1524_v23 = vadd.f32 %v4189_v60, %v5223_v36  ;;  %v4157_v25 = vpop.f32.mrf.mxu0  ;;  %v1513_v36 = vadd.f32 %v1512_v11, %v5221_v34 }
 0x222   : > { %v1515_v17 = vpop.f32.mrf.mxu1 }
 0x223   : > { %v1606_v10 = vmax.f32 %v1524_v23, 0.0  ;;  %v1410_v50 = vpop.f32.mrf.mxu0 }
 0x224   : > { %v5278_v57 = vpop.f32.mrf.mxu1  ;;  %1894 = vmatpush1.bf16.msra.mxu1 %v4420_v61  ;;  %v1516_v61 = vadd.f32 %v1515_v17, %v5225_v37 }
 0x226   : > { %v5280_v20 = vpop.f32.mrf.mxu1  ;;  %v1604_v23 = vmax.f32 %v1516_v61, 0.0 }
 0x227   : > { %6468 = vst [vmem:[#allocation53_spill] sm:$0xff] %v5280_v20  ;;  %v1605_v20 = vmax.f32 %v1521_v1, 0.0  ;;  %v1500_v1 = vadd.f32 %v5255_v21, %v5217_v31 }
 0x228   : > { %v5288_v40 = vpop.f32.mrf.mxu1 }
 0x229   : > { %v1540_v37 = vadd.f32 %v5288_v40, %v5239_v39  ;;  %v6473_v40 = vld [vmem:[#allocation45_spill] sm:$0xff] }
 0x22a   : > { %v5290_v5 = vpop.f32.mrf.mxu1 }
 0x22c   : > { %v4196_v47 = vpop.f32.mrf.mxu1 }
 0x22e   : > { %v5298_v46 = vpop.f32.mrf.mxu1 }
 0x22f   : > { %v1545_v31 = vadd.f32 %v5298_v46, %v5257_v7  ;;  %v6470_v7 = vld [vmem:[#allocation53_spill] sm:$0xff] }
 0x230   : > { %v4197_v35 = vpop.f32.mrf.mxu1 }
 0x232   : > { %v1547_v19 = vpop.f32.mrf.mxu1 }
 0x234   : > { %v4200_v52 = vpop.f32.mrf.mxu1 }
 0x235   : > { %v1569_v60 = vadd.f32 %v4200_v52, %v4152_v15 }
 0x236   : > { %v1560_v51 = vpop.f32.mrf.mxu1 }
 0x238   : > { %v4201_v29 = vpop.f32.mrf.mxu1 }
 0x239   : > { %v1572_v43 = vadd.f32 %v4201_v29, %v4153_v59  ;;  %v1505_v59 = vadd.f32 %v5245_v0, %v5204_v22  ;;  %v1617_v29 = vmax.f32 %v1569_v60, 0.0  ;;  %v1548_v22 = vadd.f32 %v1547_v19, %v5270_v13  ;;  %v6476_v60 = vld [vmem:[#allocation52_spill] sm:$0xff] }
 0x23a   : > { %v1563_v48 = vpop.f32.mrf.mxu1  ;;  %v1481_v19 = vadd.f32 %v5237_v42, %v5189_v12  ;;  %v1537_v13 = vadd.f32 %v5278_v57, %v5229_v44  ;;  %v1611_v0 = vmax.f32 %v1545_v31, 0.0  ;;  %v6471_v42 = vld [vmem:[#allocation46_spill] sm:$0xff]  ;;  %v6517_v31 = vmov 0 }
 0x23b   : > { %v1564_v17 = vadd.f32 %v1563_v48, %v1394_v18  ;;  %v1601_v18 = vmax.f32 %v1505_v59, 0.0  ;;  %v1553_v48 = vadd.f32 %v4196_v47, %v5251_v49  ;;  %v6472_v12 = vld [vmem:[#allocation50_spill] sm:$0xff]  ;;  %v6474_v47 = vld [vmem:[#allocation49_spill] sm:$0xff]  ;;  %v6484_v59 = vmov 0 }
 0x23c   : > { %v4204_v54 = vpop.f32.mrf.mxu1  ;;  %v1595_v49 = vmax.f32 %v1481_v19, 0.0  ;;  %v1609_v39 = vmax.f32 %v1537_v13, 0.0  ;;  %v1468_v11 = vadd.f32 %v6472_v12, %v6471_v42  ;;  %v4431_v19 = vld [vmem:[%s6260_s7 + $0x4] ss:$8 sps:$4 sm:$0xff]   ;;  %v4429_v13 = vld [vmem:[%s6260_s7] ss:$8 sps:$4 sm:$0xff]  }
 0x23d   : > { %v1585_v45 = vadd.f32 %v4204_v54, %v4156_v53 }
 0x23e   : > { %v1576_v41 = vpop.f32.mrf.mxu1 }
 0x23f   : > { %v1577_v8 = vadd.f32 %v1576_v41, %v1407_v28  ;;  %v1621_v58 = vmax.f32 %v1585_v45, 0.0  ;;  %v1508_v28 = vadd.f32 %v5253_v30, %v5215_v63  ;;  %v1561_v45 = vadd.f32 %v1560_v51, %v1391_v6  ;;  %v6469_v30 = vld [vmem:[#allocation51_spill] sm:$0xff]  ;;  %v6475_v41 = vld [vmem:[#allocation8_spill] sm:$0xff] }
 0x240   : > { %v4205_v9 = vpop.f32.mrf.mxu1  ;;  %v1600_v51 = vmax.f32 %v1500_v1, 0.0  ;;  %v1613_v63 = vmax.f32 %v1553_v48, 0.0  ;;  %v1529_v32 = vadd.f32 %v6470_v7, %v6469_v30  ;;  %v6493_v1 = vmov 0  ;;  %v4439_v30 = vld [vmem:[%s6261_s8 + $0x20] sm:$0xff]   ;;  %v4440_v7 = vld [vmem:[%s6261_s8 + $0x58] sm:$0xff]  }
 0x241   : > { %v1588_v24 = vadd.f32 %v4205_v9, %v4157_v25  ;;  %v1619_v2 = vmax.f32 %v1577_v8, 0.0  ;;  %v1630_v9 = vpack.c.bf16 %v1606_v10, %v1605_v20  ;;  %v1618_v25 = vmax.f32 %v1572_v43, 0.0 }
 0x242   : > { %v1579_v3 = vpop.f32.mrf.mxu1  ;;  %v1602_v52 = vmax.f32 %v1508_v28, 0.0  ;;  %v1556_v10 = vadd.f32 %v4197_v35, %v5259_v38  ;;  %v1465_v35 = vadd.f32 %v6474_v47, %v6473_v40  ;;  %v644_v8 = vadd.s32 24, %v6475_v41  ;;  %v6523_v40 = vld [vmem:[#allocation28_spill] sm:$0xff] }
 0x243   : > { %v1622_v16 = vmax.f32 %v1588_v24, 0.0  ;;  %v1580_v62 = vadd.f32 %v1579_v3, %v1410_v50  ;;  %v1603_v3 = vmax.f32 %v1513_v36, 0.0  ;;  %v1636_v50 = vpack.c.bf16 %v1618_v25, %v1617_v29 }
 0x244   : > { %v1628_v6 = vpack.c.bf16 %v1602_v52, %v1601_v18  ;;  %v1614_v20 = vmax.f32 %v1556_v10, 0.0  ;;  %v1591_v36 = vmax.f32 %v1465_v35, 0.0  ;;  %v6478_v28 = vmov 0 }
 0x245   : > { %v1638_v54 = vpack.c.bf16 %v1622_v16, %v1621_v58  ;;  %v1620_v53 = vmax.f32 %v1580_v62, 0.0  ;;  %v1629_v15 = vpack.c.bf16 %v1604_v23, %v1603_v3  ;;  %v1616_v58 = vmax.f32 %v1564_v17, 0.0 }
 0x246   : > { %v1615_v62 = vmax.f32 %v1561_v45, 0.0  ;;  %v1634_v43 = vpack.c.bf16 %v1614_v20, %v1613_v63  ;;  %v1612_v16 = vmax.f32 %v1548_v22, 0.0  ;;  %v646_v23 = vadd.s32 40, %v6475_v41 }
 0x247   : > { %3824 = vmatprep.subr.bf16.mxu0 %v1638_v54  ;;  %v1637_v33 = vpack.c.bf16 %v1620_v53, %v1619_v2  ;;  %v1497_v2 = vadd.f32 %v5249_v55, %v5213_v27  ;;  %v1484_v27 = vadd.f32 %v5241_v26, %v5191_v14  ;;  %v1610_v55 = vmax.f32 %v1540_v37, 0.0  ;;  %v6477_v53 = vld [vmem:[#allocation12_spill] sm:$0xff] }
 0x248   : > { %3825 = vmatpush3.bf16.msra.mxu0 %v1630_v9  ;;  %v1635_v21 = vpack.c.bf16 %v1616_v58, %v1615_v62  ;;  %v1532_v26 = vadd.f32 %v5290_v5, %v5243_v56  ;;  %v1633_v14 = vpack.c.bf16 %v1612_v16, %v1611_v0  ;;  %v1607_v5 = vmax.f32 %v1529_v32, 0.0  ;;  %v4423_v37 = vld [vmem:[%s6260_s7 + $0x20] ss:$8 sps:$4 sm:$0xff]   ;;  %v4426_v16 = vld [vmem:[%s6260_s7 + $0x10] ss:$8 sps:$4 sm:$0xff]  }
 0x249   : > { %3826 = vmatprep.subr.bf16.mxu0 %v1637_v33  ;;  %v1599_v24 = vmax.f32 %v1497_v2, 0.0  ;;  %v1596_v46 = vmax.f32 %v1484_v27, 0.0  ;;  %v1632_v44 = vpack.c.bf16 %v1610_v55, %v1609_v39  ;;  %v1592_v56 = vmax.f32 %v1468_v11, 0.0  ;;  %v6483_v33 = vld [vmem:[#allocation11_spill] sm:$0xff]  ;;  %v4434_v55 = vld [vmem:[%s6261_s8 + $0x70] sm:$0xff]   ;;  %v4438_v39 = vld [vmem:[%s6261_s8 + $0x60] sm:$0xff]  }
 0x24a   : > { %v1608_v38 = vmax.f32 %v1532_v26, 0.0  ;;  %vm673_vm14 = vcmp.eq.s32.totalorder %v6477_v53, %v644_v8  ;;  %v645_v9 = vadd.s32 32, %v6475_v41  ;;  %v6481_v25 = vmov 1.0|1.0   ;;  %v4432_v0 = vld [vmem:[%s6261_s8 + $0x78] sm:$0xff]   ;;  %v4435_v26 = vld [vmem:[%s6261_s8 + $0x30] sm:$0xff]  }
 0x24b   : > { %v1627_v34 = vpack.c.bf16 %v1600_v51, %v1599_v24  ;;  %v1625_v57 = vpack.c.bf16 %v1596_v46, %v1595_v49  ;;  %v1623_v54 = vpack.c.bf16 %v1592_v56, %v1591_v36  ;;  %vm672_vm10 = vcmp.eq.s32.totalorder %v6483_v33, %v644_v8  ;;  %v4433_v46 = vld [vmem:[%s6261_s8 + $0x38] sm:$0xff]   ;;  %v4437_v49 = vld [vmem:[%s6261_s8 + $0x28] sm:$0xff]  }
 0x24c   : > { %3827 = vmatpush3.bf16.msra.mxu0 %v1629_v15  ;;  %v1631_v61 = vpack.c.bf16 %v1608_v38, %v1607_v5  ;;  %v6487_v3 = vmov 0  ;;  %v647_v29 = vadd.s32 48, %v6475_v41  ;;  %v648_v45 = vadd.s32 56, %v6475_v41  ;;  %v4441_v32 = vld [vmem:[%s6261_s8 + $0x18] sm:$0xff]  }
 0x24d   : > { %3828 = vmatprep.subr.bf16.mxu0 %v1636_v50  ;;  %v6490_v52 = vmov 0  ;;  %v649_v15 = vadd.s32 64, %v6475_v41  ;;  %v650_v10 = vadd.s32 72, %v6475_v41  ;;  %v6496_v50 = vmov 0  ;;  %v6524_v5 = vld [vmem:[#allocation27_spill] sm:$0xff] }
 0x24e   : > { %v6499_v58 = vmov 0  ;;  %v651_v18 = vadd.s32 80, %v6475_v41  ;;  %v652_v2 = vadd.s32 88, %v6475_v41  ;;  %v6502_v48 = vmov 0 }
 0x24f   : > { %v6505_v62 = vmov 0  ;;  %v654_v51 = vadd.s32 104, %v6475_v41  ;;  %v6508_v20 = vmov 0  ;;  %v6511_v22 = vmov 0 }
 0x250   : > { %3829 = vmatpush3.bf16.msra.mxu0 %v1628_v6  ;;  %v653_v6 = vadd.s32 96, %v6475_v41  ;;  %v656_v24 = vadd.s32 120, %v6475_v41  ;;  %v6514_v63 = vmov 0  ;;  %v6520_v27 = vmov 0 }
 0x251   : > { %3830 = vmatprep.subr.bf16.mxu0 %v1635_v21  ;;  %v655_v21 = vadd.s32 112, %v6475_v41 }
 0x254   : > { %3831 = vmatpush3.bf16.msra.mxu0 %v1627_v34  ;;  %v4425_v34 = vld [vmem:[%s6260_s7 + $0x24] ss:$8 sps:$4 sm:$0xff]  }
 0x255   : > { %3832 = vmatprep.subr.bf16.mxu0 %v1634_v43  ;;  %1895 = vmatprep.subr.bf16.mxu1 %v4425_v34  ;;  %v4428_v43 = vld [vmem:[%s6260_s7 + $0x14] ss:$8 sps:$4 sm:$0xff]  }
 0x256   : > { %1896 = vmatpush1.bf16.msra.mxu1 %v4423_v37  ;;  %v6528_v37 = vld [vmem:[#allocation24_spill] sm:$0xff] }
 0x257   : > { %1897 = vmatprep.subr.bf16.mxu1 %v4428_v43 }
 0x258   : > { %3833 = vmatpush3.bf16.msra.mxu0 %v5247_v4  ;;  %v643_v4 = vadd.s32 16, %v6475_v41 }
 0x259   : > { %3834 = vmatprep.subr.bf16.mxu0 %v1633_v14  ;;  %v4436_v14 = vld [vmem:[%s6261_s8 + $0x68] sm:$0xff]  }
 0x25a   : > { %vm671_vm11 = vcmp.eq.s32.totalorder %v6477_v53, %v643_v4  ;;  %vm670_vm7 = vcmp.eq.s32.totalorder %v6483_v33, %v643_v4  ;;  %1898 = vmatpush1.bf16.msra.mxu1 %v4426_v16 }
 0x25b   : > { %vm5342_vm5 = vmpackc.low %vm673_vm14, %vm671_vm11  ;;  %vm675_vm11 = vcmp.eq.s32.totalorder %v6477_v53, %v645_v9  ;;  %vm677_vm14 = vcmp.eq.s32.totalorder %v6477_v53, %v646_v23  ;;  %1899 = vmatprep.subr.bf16.mxu1 %v4431_v19  ;;  %v6529_v19 = vld [vmem:[#allocation23_spill] sm:$0xff] }
 0x25c   : > { %3835 = vmatpush3.bf16.msra.mxu0 %v1625_v57  ;;  %v6479_v28 = vsel %vm5342_vm5, 4294967295, %v6478_v28  ;;  %vm5358_vm2 = vmpackc.low %vm672_vm10, %vm670_vm7  ;;  %vm674_vm10 = vcmp.eq.s32.totalorder %v6483_v33, %v645_v9  ;;  %vm676_vm7 = vcmp.eq.s32.totalorder %v6483_v33, %v646_v23  ;;  %v6525_v9 = vmov 0   ;;  %v6526_v23 = vld [vmem:[#allocation26_spill] sm:$0xff] }
 0x25d   : > { %3836 = vmatprep.subr.bf16.mxu0 %v1632_v44  ;;  %6480 = vst [vmem:[#allocation51_spill] sm:$0xff] %v6479_v28  ;;  %v6485_v59 = vsel %vm5358_vm2, 4294967295, %v6484_v59  ;;  %vm5362_vm13 = vmpackc.low %vm677_vm14, %vm675_vm11  ;;  %vm679_vm11 = vcmp.eq.s32.totalorder %v6477_v53, %v647_v29  ;;  %vm681_vm14 = vcmp.eq.s32.totalorder %v6477_v53, %v648_v45  ;;  %v5529_v44 = vstv %s1736_s21 }
 0x25e   : > { %6486 = vst [vmem:[#allocation53_spill] sm:$0xff] %v6485_v59  ;;  %v6488_v3 = vsel %vm5362_vm13, 4294967295, %v6487_v3  ;;  %1900 = vmatpush1.bf16.msra.mxu1 %v4429_v13  ;;  %v1738_v47 = vmul.f32 %v5529_v44, %v6523_v40  ;;  %v1739_v56 = vmul.f32 %v5529_v44, %v6524_v5  ;;  %v1742_v43 = vmul.f32 %v5529_v44, %v6528_v37 }
 0x25f   : > { %6489 = vst [vmem:[#allocation46_spill] sm:$0xff] %v6488_v3  ;;  %v1743_v13 = vmul.f32 %v5529_v44, %v6529_v19 }
 0x260   : > { %3837 = vmatpush3.bf16.msra.mxu0 %v6476_v60 }
 0x261   : > { %3838 = vmatprep.subr.bf16.mxu0 %v1631_v61 }
 0x264   : > { %3839 = vmatpush3.bf16.msra.mxu0 %v1623_v54 }
 0x265   : > { %3888 = vmatprep.subr.bf16.mxu0 %v4432_v0 }
 0x267   : > { %3544 = vmatmul.mubr.msk.bf16.vlgmr.msra.gmra.mxu0 %vm5209_vm1, %v6481_v25  ;;  %vm5382_vm1 = vmpackc.low %vm681_vm14, %vm679_vm11  ;;  %vm683_vm11 = vcmp.eq.s32.totalorder %v6477_v53, %v649_v15  ;;  %vm685_vm14 = vcmp.eq.s32.totalorder %v6477_v53, %v650_v10 }
 0x268   : > { %3546 = vmatprep.mubr.msk.bf16.mxu0 %vm5342_vm5, %v6481_v25  ;;  %vm5378_vm5 = vmpackc.low %vm676_vm7, %vm674_vm10  ;;  %v6494_v1 = vsel %vm5382_vm1, 4294967295, %v6493_v1  ;;  %vm678_vm10 = vcmp.eq.s32.totalorder %v6483_v33, %v647_v29  ;;  %vm680_vm7 = vcmp.eq.s32.totalorder %v6483_v33, %v648_v45  ;;  %3889 = vmatpush3.bf16.msra.mxu0 %v4433_v46  ;;  %v6527_v45 = vld [vmem:[#allocation25_spill] sm:$0xff] }
 0x269   : > { %v6491_v52 = vsel %vm5378_vm5, 4294967295, %v6490_v52  ;;  %6495 = vst [vmem:[#allocation45_spill] sm:$0xff] %v6494_v1  ;;  %3890 = vmatprep.subr.bf16.mxu0 %v4434_v55 }
 0x26a   : > { %6492 = vst [vmem:[#allocation50_spill] sm:$0xff] %v6491_v52 }
 0x26c   : > { %3891 = vmatpush3.bf16.msra.mxu0 %v4435_v26 }
 0x26d   : > { %3892 = vmatprep.subr.bf16.mxu0 %v4436_v14 }
 0x26f   : > { %3548 = vmatmul.mubr.msk.bf16.gmra.mxu0 %vm5358_vm2, %v6481_v25  ;;  %vm5402_vm2 = vmpackc.low %vm685_vm14, %vm683_vm11  ;;  %vm687_vm11 = vcmp.eq.s32.totalorder %v6477_v53, %v651_v18  ;;  %vm689_vm14 = vcmp.eq.s32.totalorder %v6477_v53, %v652_v2 }
 0x270   : > { %3550 = vmatprep.mubr.msk.bf16.mxu0 %vm5362_vm13, %v6481_v25  ;;  %vm5398_vm13 = vmpackc.low %vm680_vm7, %vm678_vm10  ;;  %v6500_v58 = vsel %vm5402_vm2, 4294967295, %v6499_v58  ;;  %vm682_vm10 = vcmp.eq.s32.totalorder %v6483_v33, %v649_v15  ;;  %vm684_vm7 = vcmp.eq.s32.totalorder %v6483_v33, %v650_v10  ;;  %3893 = vmatpush3.bf16.msra.mxu0 %v4437_v49  ;;  %v1741_v15 = vmul.f32 %v5529_v44, %v6527_v45 }
 0x271   : > { %v6497_v50 = vsel %vm5398_vm13, 4294967295, %v6496_v50  ;;  %6501 = vst [vmem:[#allocation8_spill] sm:$0xff] %v6500_v58  ;;  %3894 = vmatprep.subr.bf16.mxu0 %v4438_v39 }
 0x272   : > { %6498 = vst [vmem:[#allocation49_spill] sm:$0xff] %v6497_v50 }
 0x274   : > { %3895 = vmatpush3.bf16.msra.mxu0 %v4439_v30 }
 0x275   : > { %3896 = vmatprep.subr.bf16.mxu0 %v4440_v7  ;;  %v6530_v7 = vld [vmem:[#allocation21_spill] sm:$0xff] }
 0x277   : > { %3552 = vmatmul.mubr.msk.bf16.gmra.mxu0 %vm5378_vm5, %v6481_v25  ;;  %vm5422_vm5 = vmpackc.low %vm689_vm14, %vm687_vm11  ;;  %vm691_vm11 = vcmp.eq.s32.totalorder %v6477_v53, %v653_v6  ;;  %vm693_vm14 = vcmp.eq.s32.totalorder %v6477_v53, %v654_v51 }
 0x278   : > { %3554 = vmatprep.mubr.msk.bf16.mxu0 %vm5382_vm1, %v6481_v25  ;;  %vm5418_vm1 = vmpackc.low %vm684_vm7, %vm682_vm10  ;;  %v6506_v62 = vsel %vm5422_vm5, 4294967295, %v6505_v62  ;;  %vm686_vm10 = vcmp.eq.s32.totalorder %v6483_v33, %v651_v18  ;;  %vm688_vm7 = vcmp.eq.s32.totalorder %v6483_v33, %v652_v2  ;;  %3897 = vmatpush3.bf16.msra.mxu0 %v4441_v32  ;;  %v1744_v32 = vmul.f32 %v5529_v44, %v6530_v7 }
 0x279   : > { %v6503_v48 = vsel %vm5418_vm1, 4294967295, %v6502_v48  ;;  %6507 = vst [vmem:[#allocation12_spill] sm:$0xff] %v6506_v62 }
 0x27a   : > { %6504 = vst [vmem:[#allocation52_spill] sm:$0xff] %v6503_v48 }
 0x27f   : > { %3556 = vmatmul.mubr.msk.bf16.gmra.mxu0 %vm5398_vm13, %v6481_v25  ;;  %vm5442_vm13 = vmpackc.low %vm693_vm14, %vm691_vm11  ;;  %vm695_vm11 = vcmp.eq.s32.totalorder %v6477_v53, %v655_v21  ;;  %vm697_vm14 = vcmp.eq.s32.totalorder %v6477_v53, %v656_v24 }
 0x280   : > { %3558 = vmatprep.mubr.msk.bf16.mxu0 %vm5402_vm2, %v6481_v25  ;;  %vm5438_vm2 = vmpackc.low %vm688_vm7, %vm686_vm10  ;;  %v6512_v22 = vsel %vm5442_vm13, 4294967295, %v6511_v22  ;;  %vm690_vm10 = vcmp.eq.s32.totalorder %v6483_v33, %v653_v6  ;;  %vm692_vm7 = vcmp.eq.s32.totalorder %v6483_v33, %v654_v51 }
 0x281   : > { %v6509_v20 = vsel %vm5438_vm2, 4294967295, %v6508_v20  ;;  %6513 = vst [vmem:[#allocation54_spill] sm:$0xff] %v6512_v22 }
 0x282   : > { %6510 = vst [vmem:[#allocation11_spill] sm:$0xff] %v6509_v20 }
 0x287   : > { %3560 = vmatmul.mubr.msk.bf16.gmra.mxu0 %vm5418_vm1, %v6481_v25  ;;  %vm5462_vm1 = vmpackc.low %vm697_vm14, %vm695_vm11 }
 0x288   : > { %3562 = vmatprep.mubr.msk.bf16.mxu0 %vm5422_vm5, %v6481_v25  ;;  %vm5458_vm5 = vmpackc.low %vm692_vm7, %vm690_vm10  ;;  %v6518_v31 = vsel %vm5462_vm1, 4294967295, %v6517_v31 }
 0x289   : > { %v6515_v63 = vsel %vm5458_vm5, 4294967295, %v6514_v63  ;;  %6519 = vst [vmem:[#allocation56_spill] sm:$0xff] %v6518_v31 }
 0x28a   : > { %6516 = vst [vmem:[#allocation55_spill] sm:$0xff] %v6515_v63 }
 0x28f   : > { %3564 = vmatmul.mubr.msk.bf16.gmra.mxu0 %vm5438_vm2, %v6481_v25  ;;  %vm696_vm2 = vcmp.eq.s32.totalorder %v6483_v33, %v656_v24 }
 0x290   : > { %3566 = vmatprep.mubr.msk.bf16.mxu0 %vm5442_vm13, %v6481_v25  ;;  %vm694_vm13 = vcmp.eq.s32.totalorder %v6483_v33, %v655_v21  ;;  %v1740_v33 = vmul.f32 %v5529_v44, %v6526_v23 }
 0x291   : > { %vm5474_vm10 = vmpackc.low %vm696_vm2, %vm694_vm13  ;;  %vm6540_vm13 = vcmask 261120  }
 0x292   : > { %v6521_v27 = vsel %vm5474_vm10, 4294967295, %v6520_v27  ;;  %vm6544_vm2 = vmmov %vm6540_vm13 }
 0x293   : > { %6522 = vst [vmem:[#allocation57_spill] sm:$0xff] %v6521_v27  ;;  %vm6546_vm7 = vmmov %vm6544_vm2 }
 0x294   : > { %vm6547_vm11 = vmmov %vm6544_vm2 }
 0x295   : > { %vm6548_vm14 = vmmov %vm6544_vm2 }
 0x297   : > { %3568 = vmatmul.mubr.msk.bf16.gmra.mxu0 %vm5458_vm5, %v6481_v25 }
 0x298   : > { %3570 = vmatprep.mubr.msk.bf16.mxu0 %vm5462_vm1, %v6481_v25 }
 0x29f   : > { %3572 = vmatmul.mubr.msk.bf16.gmra.mxu0 %vm5474_vm10, %v6481_v25  ;;  %vm6550_vm10 = vmmov %vm6544_vm2 }
 0x327   : > { %v3840_v42 = vpop.f32.mrf.mxu0 }
 0x329   : > { %v3841_v12 = vpop.f32.mrf.mxu0 }
 0x32a   : > { %v3842_v57 = vadd.f32 %v3841_v12, %v3840_v42  ;;  %v6531_v12 = vld [vmem:[#allocation22_spill] sm:$0xff] }
 0x32b   : > { %v3843_v11 = vpop.f32.mrf.mxu0 }
 0x32c   : > { %v1754_v4 = vadd.f32 %v3842_v57, %v1738_v47 }
 0x32d   : > { %v3844_v38 = vpop.f32.mrf.mxu0 }
 0x32e   : > { %v3845_v35 = vadd.f32 %v3844_v38, %v3843_v11  ;;  %v1745_v11 = vmul.f32 %v5529_v44, %v6531_v12 }
 0x32f   : > { %v3846_v41 = vpop.f32.mrf.mxu0 }
 0x330   : > { %v1755_v8 = vadd.f32 %v3845_v35, %v1739_v56 }
 0x331   : > { %v3847_v61 = vpop.f32.mrf.mxu0 }
 0x332   : > { %v1770_v36 = vpack.c.bf16 %v1755_v8, %v1754_v4  ;;  %v3848_v54 = vadd.f32 %v3847_v61, %v3846_v41  ;;  %v6532_v4 = vld [vmem:[#allocation19_spill] sm:$0xff] }
 0x333   : > { %v3849_v60 = vpop.f32.mrf.mxu0  ;;  %v1746_v8 = vmul.f32 %v5529_v44, %v6532_v4 }
 0x334   : > { %1918 = vmatmul.mubr.bf16.vlgmr.msra.gmra.mxu1 %v1770_v36  ;;  %v1756_v18 = vadd.f32 %v3848_v54, %v1740_v33  ;;  %v6533_v36 = vld [vmem:[#allocation20_spill] sm:$0xff] }
 0x335   : > { %v3850_v53 = vpop.f32.mrf.mxu0  ;;  %1927 = vmatprep.mubr.bf16.mxu1 %v6525_v9 }
 0x336   : > { %v3851_v29 = vadd.f32 %v3850_v53, %v3849_v60  ;;  %v1747_v60 = vmul.f32 %v5529_v44, %v6533_v36  ;;  %v4443_v36 = vld [vmem:[%s6261_s8 + $0x10] sm:$0xff]  }
 0x337   : > { %v3852_v10 = vpop.f32.mrf.mxu0 }
 0x338   : > { %v1757_v2 = vadd.f32 %v3851_v29, %v1741_v15 }
 0x339   : > { %v3853_v6 = vpop.f32.mrf.mxu0 }
 0x33a   : > { %v1771_v51 = vpack.c.bf16 %v1757_v2, %v1756_v18  ;;  %v3854_v24 = vadd.f32 %v3853_v6, %v3852_v10  ;;  %v6534_v18 = vld [vmem:[#allocation17_spill] sm:$0xff] }
 0x33b   : > { %v3855_v21 = vpop.f32.mrf.mxu0  ;;  %v1748_v2 = vmul.f32 %v5529_v44, %v6534_v18 }
 0x33c   : > { %1928 = vmatmul.mubr.bf16.gmra.mxu1 %v1771_v51  ;;  %v1758_v46 = vadd.f32 %v3854_v24, %v1742_v43  ;;  %v6535_v51 = vld [vmem:[#allocation18_spill] sm:$0xff] }
 0x33d   : > { %v3856_v34 = vpop.f32.mrf.mxu0  ;;  %1937 = vmatprep.mubr.bf16.mxu1 %v6525_v9 }
 0x33e   : > { %v3857_v16 = vadd.f32 %v3856_v34, %v3855_v21  ;;  %v1749_v21 = vmul.f32 %v5529_v44, %v6535_v51 }
 0x33f   : > { %v3858_v0 = vpop.f32.mrf.mxu0 }
 0x340   : > { %v1759_v55 = vadd.f32 %v3857_v16, %v1743_v13 }
 0x341   : > { %v3859_v26 = vpop.f32.mrf.mxu0 }
 0x342   : > { %v1772_v14 = vpack.c.bf16 %v1759_v55, %v1758_v46  ;;  %v3860_v39 = vadd.f32 %v3859_v26, %v3858_v0  ;;  %v6536_v46 = vld [vmem:[#allocation16_spill] sm:$0xff] }
 0x343   : > { %v3861_v49 = vpop.f32.mrf.mxu0  ;;  %v1750_v55 = vmul.f32 %v5529_v44, %v6536_v46 }
 0x344   : > { %1938 = vmatmul.mubr.bf16.gmra.mxu1 %v1772_v14  ;;  %v1760_v38 = vadd.f32 %v3860_v39, %v1744_v32  ;;  %v6537_v14 = vld [vmem:[#allocation15_spill] sm:$0xff] }
 0x345   : > { %v3862_v30 = vpop.f32.mrf.mxu0  ;;  %1947 = vmatprep.mubr.bf16.mxu1 %v6525_v9 }
 0x346   : > { %v3863_v42 = vadd.f32 %v3862_v30, %v3861_v49  ;;  %v1751_v49 = vmul.f32 %v5529_v44, %v6537_v14 }
 0x347   : > { %v3864_v57 = vpop.f32.mrf.mxu0 }
 0x348   : > { %v1761_v40 = vadd.f32 %v3863_v42, %v1745_v11 }
 0x349   : > { %v3865_v47 = vpop.f32.mrf.mxu0 }
 0x34a   : > { %v1773_v35 = vpack.c.bf16 %v1761_v40, %v1760_v38  ;;  %v3866_v56 = vadd.f32 %v3865_v47, %v3864_v57  ;;  %v6538_v38 = vld [vmem:[#allocation14_spill] sm:$0xff] }
 0x34b   : > { %v3867_v5 = vpop.f32.mrf.mxu0  ;;  %v1752_v40 = vmul.f32 %v5529_v44, %v6538_v38 }
 0x34c   : > { %1948 = vmatmul.mubr.bf16.gmra.mxu1 %v1773_v35  ;;  %v1762_v53 = vadd.f32 %v3866_v56, %v1746_v8  ;;  %v6539_v35 = vld [vmem:[#allocation13_spill] sm:$0xff]  ;;  %v4490_v8 = vld [vmem:[%s4753_s18] sm:$0xff]  }
 0x34d   : > { %v3868_v41 = vpop.f32.mrf.mxu0  ;;  %1957 = vmatprep.mubr.bf16.mxu1 %v6525_v9 }
 0x34e   : > { %v3869_v61 = vadd.f32 %v3868_v41, %v3867_v5  ;;  %v1753_v5 = vmul.f32 %v5529_v44, %v6539_v35  ;;  %v4444_v44 = vld [vmem:[%s6261_s8 + $0x48] sm:$0xff]  }
 0x34f   : > { %v3870_v54 = vpop.f32.mrf.mxu0 }
 0x350   : > { %v1763_v23 = vadd.f32 %v3869_v61, %v1747_v60  ;;  %v4442_v61 = vld [vmem:[%s6261_s8 + $0x50] sm:$0xff]   ;;  %v4445_v60 = vld [vmem:[%s6261_s8 + $0x8] sm:$0xff]  }
 0x351   : > { %v3871_v33 = vpop.f32.mrf.mxu0  ;;  %3898 = vmatprep.subr.bf16.mxu0 %v4442_v61 }
 0x352   : > { %v1774_v29 = vpack.c.bf16 %v1763_v23, %v1762_v53  ;;  %v3872_v15 = vadd.f32 %v3871_v33, %v3870_v54  ;;  %3899 = vmatpush3.bf16.msra.mxu0 %v4443_v36  ;;  %v4446_v54 = vld [vmem:[%s6261_s8 + $0x40] sm:$0xff]  }
 0x353   : > { %v3873_v45 = vpop.f32.mrf.mxu0  ;;  %3900 = vmatprep.subr.bf16.mxu0 %v4444_v44  ;;  %v4447_v53 = vld [vmem:[%s6261_s8] sm:$0xff]  }
 0x354   : > { %1958 = vmatmul.mubr.bf16.gmra.mxu1 %v1774_v29  ;;  %v1764_v34 = vadd.f32 %v3872_v15, %v1748_v2  ;;  %v3474_v23 = vld [vmem:[%s6262_s9 + $0x1] ss:$8 sm:$0x3]  ;;  %v6541_v29 = vld [vmem:[#allocation10_spill] sm:$0xff] }
 0x355   : > { %v3874_v10 = vpop.f32.mrf.mxu0  ;;  %1967 = vmatprep.mubr.bf16.mxu1 %v6525_v9  ;;  %v6542_v15 = vld [vmem:[#allocation9_spill] sm:$0xff] }
 0x356   : > { %v3875_v6 = vadd.f32 %v3874_v10, %v3873_v45  ;;  %3901 = vmatpush3.bf16.msra.mxu0 %v4445_v60  ;;  %v5594_v45 = vrot.slane %v3474_v23, %v6541_v29  ;;  %v5597_v10 = vrot.slane %v3474_v23, %v6542_v15 }
 0x357   : > { %v3876_v24 = vpop.f32.mrf.mxu0  ;;  %3902 = vmatprep.subr.bf16.mxu0 %v4446_v54 }
 0x358   : > { %v1765_v37 = vadd.f32 %v3875_v6, %v1749_v21 }
 0x359   : > { %v3877_v43 = vpop.f32.mrf.mxu0 }
 0x35a   : > { %v1775_v16 = vpack.c.bf16 %v1765_v37, %v1764_v34  ;;  %v3878_v13 = vadd.f32 %v3877_v43, %v3876_v24  ;;  %3903 = vmatpush3.bf16.msra.mxu0 %v4447_v53 }
 0x35b   : > { %v3879_v19 = vpop.f32.mrf.mxu0 }
 0x35c   : > { %1968 = vmatmul.mubr.bf16.gmra.mxu1 %v1775_v16  ;;  %v1766_v30 = vadd.f32 %v3878_v13, %v1750_v55 }
 0x35d   : > { %v3880_v0 = vpop.f32.mrf.mxu0  ;;  %1977 = vmatprep.mubr.bf16.mxu1 %v6525_v9 }
 0x35e   : > { %v3881_v26 = vadd.f32 %v3880_v0, %v3879_v19 }
 0x35f   : > { %v3882_v39 = vpop.f32.mrf.mxu0 }
 0x360   : > { %v1767_v7 = vadd.f32 %v3881_v26, %v1751_v49 }
 0x361   : > { %v3883_v32 = vpop.f32.mrf.mxu0 }
 0x362   : > { %v1776_v42 = vpack.c.bf16 %v1767_v7, %v1766_v30  ;;  %v3884_v11 = vadd.f32 %v3883_v32, %v3882_v39 }
 0x363   : > { %v3885_v12 = vpop.f32.mrf.mxu0 }
 0x364   : > { %1978 = vmatmul.mubr.bf16.gmra.mxu1 %v1776_v42  ;;  %v1768_v56 = vadd.f32 %v3884_v11, %v1752_v40 }
 0x365   : > { %v3886_v57 = vpop.f32.mrf.mxu0  ;;  %1987 = vmatprep.mubr.bf16.mxu1 %v6525_v9 }
 0x366   : > { %v3887_v47 = vadd.f32 %v3886_v57, %v3885_v12 }
 0x368   : > { %v1769_v41 = vadd.f32 %v3887_v47, %v1753_v5 }
 0x36a   : > { %v1777_v4 = vpack.c.bf16 %v1769_v41, %v1768_v56 }
 0x36c   : > { %1988 = vmatmul.mubr.bf16.gmra.mxu1 %v1777_v4 }
 0x36d   : > { %4210 = vmatprep.mubr.msk.bf16.mxu1 %vm6540_vm13, %v4490_v8  ;;  %vm6549_vm13 = vmmov %vm6544_vm2 }
 0x3f4   : > { %v1919_v33 = vpop.f32.mrf.mxu1 }
 0x3f5   : > { %v1920_v21 = vadd.f32 %v1919_v33, %v5597_v10 }
 0x3f6   : > { %v1921_v18 = vpop.f32.mrf.mxu1 }
 0x3f7   : > { %v1922_v6 = vadd.f32 %v1921_v18, %v5594_v45  ;;  %v1998_v13 = vmax.f32 %v1920_v21, 0.0 }
 0x3f8   : > { %v1923_v2 = vpop.f32.mrf.mxu1 }
 0x3f9   : > { %v1924_v51 = vadd.f32 %v1923_v2, %v5597_v10  ;;  %v1999_v16 = vmax.f32 %v1922_v6, 0.0 }
 0x3fa   : > { %v1925_v24 = vpop.f32.mrf.mxu1 }
 0x3fb   : > { %v1926_v34 = vadd.f32 %v1925_v24, %v5594_v45  ;;  %v2000_v37 = vmax.f32 %v1924_v51, 0.0 }
 0x3fc   : > { %v1929_v43 = vpop.f32.mrf.mxu1 }
 0x3fd   : > { %v2001_v19 = vmax.f32 %v1926_v34, 0.0  ;;  %v2030_v55 = vpack.c.bf16 %v2000_v37, %v1998_v13  ;;  %v1930_v39 = vadd.f32 %v1929_v43, %v5597_v10 }
 0x3fe   : > { %v1931_v0 = vpop.f32.mrf.mxu1 }
 0x3ff   : > { %v2031_v46 = vpack.c.bf16 %v2001_v19, %v1999_v16  ;;  %v1932_v14 = vadd.f32 %v1931_v0, %v5594_v45  ;;  %v2002_v57 = vmax.f32 %v1930_v39, 0.0 }
 0x400   : > { %v1933_v26 = vpop.f32.mrf.mxu1 }
 0x401   : > { %v1934_v49 = vadd.f32 %v1933_v26, %v5597_v10  ;;  %2206 = vmatprep.mubr.bf16.mxu0 %v2031_v46  ;;  %v2003_v12 = vmax.f32 %v1932_v14, 0.0 }
 0x402   : > { %v1935_v30 = vpop.f32.mrf.mxu1  ;;  %2207 = vmatmul.mubr.bf16.vlgmr.msra.gmra.mxu0 %v2030_v55 }
 0x403   : > { %v1936_v7 = vadd.f32 %v1935_v30, %v5594_v45  ;;  %v2004_v32 = vmax.f32 %v1934_v49, 0.0 }
 0x404   : > { %v1939_v42 = vpop.f32.mrf.mxu1 }
 0x405   : > { %v2005_v11 = vmax.f32 %v1936_v7, 0.0  ;;  %v2032_v47 = vpack.c.bf16 %v2004_v32, %v2002_v57  ;;  %v1940_v41 = vadd.f32 %v1939_v42, %v5597_v10 }
 0x406   : > { %v1941_v38 = vpop.f32.mrf.mxu1 }
 0x407   : > { %v2033_v40 = vpack.c.bf16 %v2005_v11, %v2003_v12  ;;  %v1942_v5 = vadd.f32 %v1941_v38, %v5594_v45  ;;  %v2006_v54 = vmax.f32 %v1940_v41, 0.0 }
 0x408   : > { %v1943_v35 = vpop.f32.mrf.mxu1 }
 0x409   : > { %v1944_v56 = vadd.f32 %v1943_v35, %v5597_v10  ;;  %2214 = vmatprep.mubr.bf16.mxu0 %v2033_v40  ;;  %v2007_v44 = vmax.f32 %v1942_v5, 0.0 }
 0x40a   : > { %v1945_v4 = vpop.f32.mrf.mxu1  ;;  %2215 = vmatmul.mubr.bf16.gmra.mxu0 %v2032_v47 }
 0x40b   : > { %v1946_v8 = vadd.f32 %v1945_v4, %v5594_v45  ;;  %v2008_v61 = vmax.f32 %v1944_v56, 0.0 }
 0x40c   : > { %v1949_v36 = vpop.f32.mrf.mxu1 }
 0x40d   : > { %v2009_v60 = vmax.f32 %v1946_v8, 0.0  ;;  %v2034_v33 = vpack.c.bf16 %v2008_v61, %v2006_v54  ;;  %v1950_v51 = vadd.f32 %v1949_v36, %v5597_v10 }
 0x40e   : > { %v1951_v53 = vpop.f32.mrf.mxu1 }
 0x40f   : > { %v2035_v23 = vpack.c.bf16 %v2009_v60, %v2007_v44  ;;  %v1952_v2 = vadd.f32 %v1951_v53, %v5594_v45  ;;  %v2010_v19 = vmax.f32 %v1950_v51, 0.0 }
 0x410   : > { %v1953_v18 = vpop.f32.mrf.mxu1 }
 0x411   : > { %v1954_v6 = vadd.f32 %v1953_v18, %v5597_v10  ;;  %2222 = vmatprep.mubr.bf16.mxu0 %v2035_v23  ;;  %v2011_v43 = vmax.f32 %v1952_v2, 0.0 }
 0x412   : > { %v1955_v21 = vpop.f32.mrf.mxu1  ;;  %2223 = vmatmul.mubr.bf16.gmra.mxu0 %v2034_v33 }
 0x413   : > { %v1956_v24 = vadd.f32 %v1955_v21, %v5594_v45  ;;  %v2012_v34 = vmax.f32 %v1954_v6, 0.0 }
 0x414   : > { %v1959_v37 = vpop.f32.mrf.mxu1 }
 0x415   : > { %v2013_v16 = vmax.f32 %v1956_v24, 0.0  ;;  %v2036_v46 = vpack.c.bf16 %v2012_v34, %v2010_v19  ;;  %v1960_v49 = vadd.f32 %v1959_v37, %v5597_v10 }
 0x416   : > { %v1961_v13 = vpop.f32.mrf.mxu1 }
 0x417   : > { %v2037_v0 = vpack.c.bf16 %v2013_v16, %v2011_v43  ;;  %v1962_v26 = vadd.f32 %v1961_v13, %v5594_v45  ;;  %v2014_v11 = vmax.f32 %v1960_v49, 0.0 }
 0x418   : > { %v1963_v55 = vpop.f32.mrf.mxu1 }
 0x419   : > { %v1964_v14 = vadd.f32 %v1963_v55, %v5597_v10  ;;  %2230 = vmatprep.mubr.bf16.mxu0 %v2037_v0  ;;  %v2015_v42 = vmax.f32 %v1962_v26, 0.0 }
 0x41a   : > { %v1965_v39 = vpop.f32.mrf.mxu1  ;;  %2231 = vmatmul.mubr.bf16.gmra.mxu0 %v2036_v46 }
 0x41b   : > { %v1966_v30 = vadd.f32 %v1965_v39, %v5594_v45  ;;  %v2016_v7 = vmax.f32 %v1964_v14, 0.0 }
 0x41c   : > { %v1969_v32 = vpop.f32.mrf.mxu1 }
 0x41d   : > { %v2017_v12 = vmax.f32 %v1966_v30, 0.0  ;;  %v2038_v40 = vpack.c.bf16 %v2016_v7, %v2014_v11  ;;  %v1970_v56 = vadd.f32 %v1969_v32, %v5597_v10 }
 0x41e   : > { %v1971_v57 = vpop.f32.mrf.mxu1 }
 0x41f   : > { %v2039_v38 = vpack.c.bf16 %v2017_v12, %v2015_v42  ;;  %v1972_v35 = vadd.f32 %v1971_v57, %v5594_v45  ;;  %v2018_v60 = vmax.f32 %v1970_v56, 0.0  ;;  %v4496_v56 = vld [vmem:[%s4753_s18 + $0x30] sm:$0xff]  }
 0x420   : > { %v1973_v47 = vpop.f32.mrf.mxu1 }
 0x421   : > { %v1974_v5 = vadd.f32 %v1973_v47, %v5597_v10  ;;  %2238 = vmatprep.mubr.bf16.mxu0 %v2039_v38  ;;  %v2019_v36 = vmax.f32 %v1972_v35, 0.0  ;;  %v4491_v38 = vld [vmem:[%s4753_s18 + $0x8] sm:$0xff]   ;;  %v4493_v47 = vld [vmem:[%s4753_s18 + $0x18] sm:$0xff]   ;;  %v4494_v35 = vld [vmem:[%s4753_s18 + $0x20] sm:$0xff]  }
 0x422   : > { %v1975_v41 = vpop.f32.mrf.mxu1  ;;  %2239 = vmatmul.mubr.bf16.gmra.mxu0 %v2038_v40  ;;  %v4492_v40 = vld [vmem:[%s4753_s18 + $0x10] sm:$0xff]  }
 0x423   : > { %v1976_v4 = vadd.f32 %v1975_v41, %v5594_v45  ;;  %v2020_v8 = vmax.f32 %v1974_v5, 0.0  ;;  %v4495_v5 = vld [vmem:[%s4753_s18 + $0x28] sm:$0xff]   ;;  %v4497_v41 = vld [vmem:[%s4753_s18 + $0x38] sm:$0xff]  }
 0x424   : > { %v1979_v61 = vpop.f32.mrf.mxu1 }
 0x425   : > { %v2021_v44 = vmax.f32 %v1976_v4, 0.0  ;;  %v2040_v23 = vpack.c.bf16 %v2020_v8, %v2018_v60  ;;  %v1980_v6 = vadd.f32 %v1979_v61, %v5597_v10  ;;  %v4498_v4 = vld [vmem:[%s4753_s18 + $0x40] sm:$0xff]   ;;  %v4500_v60 = vld [vmem:[%s4753_s18 + $0x50] sm:$0xff]  }
 0x426   : > { %v1981_v54 = vpop.f32.mrf.mxu1 }
 0x427   : > { %v2041_v53 = vpack.c.bf16 %v2021_v44, %v2019_v36  ;;  %v1982_v18 = vadd.f32 %v1981_v54, %v5594_v45  ;;  %v2022_v16 = vmax.f32 %v1980_v6, 0.0  ;;  %v4499_v36 = vld [vmem:[%s4753_s18 + $0x48] sm:$0xff]   ;;  %v5663_v54 = vld [vmem:[%s6262_s9 + $0x3] ss:$0 sm:$0xff] }
 0x428   : > { %v1983_v33 = vpop.f32.mrf.mxu1 }
 0x429   : > { %v1984_v2 = vadd.f32 %v1983_v33, %v5597_v10  ;;  %2246 = vmatprep.mubr.bf16.mxu0 %v2041_v53  ;;  %v2023_v37 = vmax.f32 %v1982_v18, 0.0 }
 0x42a   : > { %v1985_v51 = vpop.f32.mrf.mxu1  ;;  %2247 = vmatmul.mubr.bf16.gmra.mxu0 %v2040_v23 }
 0x42b   : > { %v1986_v21 = vadd.f32 %v1985_v51, %v5594_v45  ;;  %v2024_v24 = vmax.f32 %v1984_v2, 0.0 }
 0x42c   : > { %v1989_v34 = vpop.f32.mrf.mxu1 }
 0x42d   : > { %v2025_v43 = vmax.f32 %v1986_v21, 0.0  ;;  %v2042_v0 = vpack.c.bf16 %v2024_v24, %v2022_v16  ;;  %v1990_v14 = vadd.f32 %v1989_v34, %v5597_v10  ;;  %v4501_v21 = vld [vmem:[%s4753_s18 + $0x58] sm:$0xff]  }
 0x42e   : > { %v1991_v19 = vpop.f32.mrf.mxu1 }
 0x42f   : > { %v2043_v13 = vpack.c.bf16 %v2025_v43, %v2023_v37  ;;  %v1992_v55 = vadd.f32 %v1991_v19, %v5594_v45  ;;  %v2026_v42 = vmax.f32 %v1990_v14, 0.0  ;;  %v4502_v43 = vld [vmem:[%s4753_s18 + $0x60] sm:$0xff]  }
 0x430   : > { %v1993_v46 = vpop.f32.mrf.mxu1 }
 0x431   : > { %v1994_v26 = vadd.f32 %v1993_v46, %v5597_v10  ;;  %2254 = vmatprep.mubr.bf16.mxu0 %v2043_v13  ;;  %v2027_v7 = vmax.f32 %v1992_v55, 0.0  ;;  %v4449_v10 = vld [vmem:[%s6259_s6 + $0x10] sm:$0xff]  }
 0x432   : > { %v1995_v49 = vpop.f32.mrf.mxu1  ;;  %2255 = vmatmul.mubr.bf16.gmra.mxu0 %v2042_v0 }
 0x433   : > { %v1996_v39 = vadd.f32 %v1995_v49, %v5594_v45  ;;  %v2028_v30 = vmax.f32 %v1994_v26, 0.0  ;;  %v4448_v45 = vld [vmem:[%s6259_s6 + $0x18] sm:$0xff]   ;;  %v4503_v49 = vld [vmem:[%s4753_s18 + $0x68] sm:$0xff]  }
 0x434   : > { %4206 = vmatprep.subr.bf16.mxu1 %v4448_v45 }
 0x435   : > { %v2029_v32 = vmax.f32 %v1996_v39, 0.0  ;;  %v2044_v11 = vpack.c.bf16 %v2028_v30, %v2026_v42  ;;  %4207 = vmatpush3.bf16.msra.mxu1 %v4448_v45  ;;  %v4505_v45 = vld [vmem:[%s4753_s18 + $0x78] sm:$0xff]  }
 0x436   : > { %4208 = vmatprep.subr.bf16.mxu1 %v4449_v10 }
 0x437   : > { %v2045_v12 = vpack.c.bf16 %v2029_v32, %v2027_v7  ;;  %v4504_v7 = vld [vmem:[%s4753_s18 + $0x70] sm:$0xff]   ;;  %s6205_s18 = scalar_lea.hbm %s6263_s10, %s3781_s25 }
 0x439   : > { %2262 = vmatprep.mubr.bf16.mxu0 %v2045_v12  ;;  %4209 = vmatpush3.bf16.msra.mxu1 %v4449_v10 }
 0x43a   : > { %2263 = vmatmul.mubr.bf16.gmra.mxu0 %v2044_v11 }
 0x43b   : > { %4258 = vmatprep.mubr.msk.bf16.mxu0 %vm5040_vm3, %v6481_v25  ;;  %vm6545_vm3 = vmmov %vm6544_vm2 }
 0x43c   : > { %4211 = vmatmul.mubr.msk.bf16.vlgmr.msra.gmra.mxu1 %vm6544_vm2, %v4491_v38 }
 0x43d   : > { %4214 = vmatprep.mubr.msk.bf16.mxu1 %vm6545_vm3, %v4492_v40  ;;  %vm6551_vm3 = vmmov %vm6544_vm2 }
 0x444   : > { %4215 = vmatmul.mubr.msk.bf16.gmra.mxu1 %vm6546_vm7, %v4493_v47  ;;  %vm6552_vm7 = vmmov %vm6544_vm2 }
 0x445   : > { %4218 = vmatprep.mubr.msk.bf16.mxu1 %vm6547_vm11, %v4494_v35  ;;  %vm6556_vm11 = vmmov %vm6544_vm2 }
 0x44c   : > { %4219 = vmatmul.mubr.msk.bf16.gmra.mxu1 %vm6548_vm14, %v4495_v5  ;;  %vm6559_vm14 = vmmov %vm6544_vm2 }
 0x44d   : > { %4222 = vmatprep.mubr.msk.bf16.mxu1 %vm6549_vm13, %v4496_v56  ;;  %vm6560_vm13 = vmmov %vm6544_vm2 }
 0x454   : > { %4223 = vmatmul.mubr.msk.bf16.gmra.mxu1 %vm6550_vm10, %v4497_v41  ;;  %vm6555_vm10 = vmmov %vm6544_vm2 }
 0x455   : > { %4226 = vmatprep.mubr.msk.bf16.mxu1 %vm6544_vm2, %v4498_v4 }
 0x45c   : > { %4227 = vmatmul.mubr.msk.bf16.gmra.mxu1 %vm6551_vm3, %v4499_v36 }
 0x45d   : > { %4230 = vmatprep.mubr.msk.bf16.mxu1 %vm6552_vm7, %v4500_v60 }
 0x464   : > { %4231 = vmatmul.mubr.msk.bf16.gmra.mxu1 %vm6555_vm10, %v4501_v21 }
 0x465   : > { %4234 = vmatprep.mubr.msk.bf16.mxu1 %vm6556_vm11, %v4502_v43 }
 0x46c   : > { %4235 = vmatmul.mubr.msk.bf16.gmra.mxu1 %vm6559_vm14, %v4503_v49 }
 0x46d   : > { %4238 = vmatprep.mubr.msk.bf16.mxu1 %vm6560_vm13, %v4504_v7 }
 0x474   : > { %4239 = vmatmul.mubr.msk.bf16.gmra.mxu1 %vm6544_vm2, %v4505_v45 }
 0x475   : > { %3662 = vmatprep.mubr.msk.bf16.mxu1 %vm5200_vm0, %v6481_v25 }
 0x4c2   : > { %v3904_v8 = vpop.f32.mrf.mxu0 }
 0x4c4   : > { %v3905_v61 = vpop.f32.mrf.mxu0 }
 0x4c5   : > { %v3906_v44 = vadd.f32 %v3905_v61, %v3904_v8 }
 0x4c6   : > { %v3907_v53 = vpop.f32.mrf.mxu0 }
 0x4c7   : > { %v5666_v33 = vadd.f32 %v3906_v44, %v5663_v54 }
 0x4c8   : > { %v3908_v23 = vpop.f32.mrf.mxu0 }
 0x4c9   : > { %6553 = vst [vmem:[#allocation28_spill] sm:$0xff] %v5666_v33  ;;  %v3909_v18 = vadd.f32 %v3908_v23, %v3907_v53  ;;  %v6351_v24 = vmax.f32 %v5666_v33, 0.0 }
 0x4ca   : > { %v3910_v2 = vpop.f32.mrf.mxu0 }
 0x4cb   : > { %v5669_v6 = vadd.f32 %v3909_v18, %v5663_v54 }
 0x4cc   : > { %v3911_v51 = vpop.f32.mrf.mxu0 }
 0x4cd   : > { %6554 = vst [vmem:[#allocation27_spill] sm:$0xff] %v5669_v6  ;;  %v6350_v34 = vmax.f32 %v5669_v6, 0.0  ;;  %v3912_v37 = vadd.f32 %v3911_v51, %v3910_v2 }
 0x4ce   : > { %v3913_v16 = vpop.f32.mrf.mxu0 }
 0x4cf   : > { %v5681_v19 = vpack.c.bf16 %v6350_v34, %v6351_v24  ;;  %v5684_v0 = vadd.f32 %v3912_v37, %v5663_v54 }
 0x4d0   : > { %v3914_v13 = vpop.f32.mrf.mxu0 }
 0x4d1   : > { %6557 = vst [vmem:[#allocation26_spill] sm:$0xff] %v5684_v0  ;;  %v3915_v46 = vadd.f32 %v3914_v13, %v3913_v16  ;;  %v6349_v39 = vmax.f32 %v5684_v0, 0.0 }
 0x4d2   : > { %v5686_v55 = vpop.f32.mrf.mxu0 }
 0x4d3   : > { %v5689_v26 = vadd.f32 %v3915_v46, %v5663_v54 }
 0x4d4   : > { %v5691_v14 = vpop.f32.mrf.mxu0 }
 0x4d5   : > { %6558 = vst [vmem:[#allocation25_spill] sm:$0xff] %v5689_v26  ;;  %v6348_v30 = vmax.f32 %v5689_v26, 0.0 }
 0x4d6   : > { %v3919_v32 = vpop.f32.mrf.mxu0 }
 0x4d7   : > { %v5703_v42 = vpack.c.bf16 %v6348_v30, %v6349_v39 }
 0x4d8   : > { %v3920_v12 = vpop.f32.mrf.mxu0 }
 0x4da   : > { %v3922_v11 = vpop.f32.mrf.mxu0 }
 0x4dc   : > { %v3923_v57 = vpop.f32.mrf.mxu0 }
 0x4de   : > { %v3925_v38 = vpop.f32.mrf.mxu0 }
 0x4e0   : > { %v3926_v40 = vpop.f32.mrf.mxu0 }
 0x4e2   : > { %v3928_v47 = vpop.f32.mrf.mxu0 }
 0x4e4   : > { %v3929_v35 = vpop.f32.mrf.mxu0 }
 0x4e6   : > { %v3931_v5 = vpop.f32.mrf.mxu0 }
 0x4e8   : > { %v3932_v56 = vpop.f32.mrf.mxu0 }
 0x4ea   : > { %v3934_v41 = vpop.f32.mrf.mxu0 }
 0x4ec   : > { %v3935_v4 = vpop.f32.mrf.mxu0 }
 0x4ed   : > { %v3936_v7 = vadd.f32 %v3935_v4, %v3934_v41 }
 0x4ee   : > { %v3937_v8 = vpop.f32.mrf.mxu0 }
 0x4f0   : > { %v3938_v61 = vpop.f32.mrf.mxu0 }
 0x4f1   : > { %v3939_v16 = vadd.f32 %v3938_v61, %v3937_v8 }
 0x4f2   : > { %v3940_v36 = vpop.f32.mrf.mxu0 }
 0x4f4   : > { %v3941_v44 = vpop.f32.mrf.mxu0 }
 0x4f5   : > { %v3942_v37 = vadd.f32 %v3941_v44, %v3940_v36  ;;  %v3930_v44 = vadd.f32 %v3929_v35, %v3928_v47  ;;  %v3924_v35 = vadd.f32 %v3923_v57, %v3922_v11  ;;  %v3918_v11 = vadd.f32 %v5691_v14, %v5686_v55 }
 0x4f6   : > { %v3943_v60 = vpop.f32.mrf.mxu0 }
 0x4f7   : > { %v5717_v45 = vadd.f32 %v3942_v37, %v5663_v54  ;;  %v5759_v57 = vadd.f32 %v3924_v35, %v5663_v54  ;;  %v6580_v35 = vld [vmem:[#allocation36_spill] sm:$0xff] }
 0x4f8   : > { %v3944_v53 = vpop.f32.mrf.mxu0  ;;  %vm6581_vm0 = vnez %v6580_v35 }
 0x4f9   : > { %v3945_v2 = vadd.f32 %v3944_v53, %v3943_v60  ;;  %6564 = vst [vmem:[#allocation21_spill] sm:$0xff] %v5717_v45  ;;  %v3933_v60 = vadd.f32 %v3932_v56, %v3931_v5  ;;  %v5723_v53 = vadd.f32 %v3939_v16, %v5663_v54  ;;  %v6339_v41 = vmax.f32 %v5717_v45, 0.0  ;;  %6571 = vst [vmem:[#allocation15_spill] sm:$0xff] %v5759_v57 }
 0x4fa   : > { %v3946_v23 = vpop.f32.mrf.mxu0  ;;  %v3927_v56 = vadd.f32 %v3926_v40, %v3925_v38  ;;  %v3921_v38 = vadd.f32 %v3920_v12, %v3919_v32  ;;  %v6345_v55 = vmax.f32 %v5759_v57, 0.0 }
 0x4fb   : > { %v5711_v13 = vadd.f32 %v3945_v2, %v5663_v54  ;;  %6566 = vst [vmem:[#allocation19_spill] sm:$0xff] %v5723_v53  ;;  %v5737_v4 = vadd.f32 %v3933_v60, %v5663_v54  ;;  %v5745_v2 = vadd.f32 %v3930_v44, %v5663_v54  ;;  %v6594_v44 = vld [vmem:[#allocation43_spill] sm:$0xff] }
 0x4fc   : > { %v3947_v18 = vpop.f32.mrf.mxu0  ;;  %v5749_v40 = vadd.f32 %v3927_v56, %v5663_v54  ;;  %v5763_v32 = vadd.f32 %v3921_v38, %v5663_v54  ;;  %v6582_v38 = vld [vmem:[#allocation37_spill] sm:$0xff]  ;;  %vm6595_vm3 = vnez %v6594_v44  ;;  %v4212_v56 = vpop.f32.mrf.mxu1 }
 0x4fd   : > { %v3948_v51 = vadd.f32 %v3947_v18, %v3946_v23  ;;  %6562 = vst [vmem:[#allocation24_spill] sm:$0xff] %v5711_v13  ;;  %v6338_v8 = vmax.f32 %v5711_v13, 0.0  ;;  %v5729_v23 = vadd.f32 %v3936_v7, %v5663_v54  ;;  %6568 = vst [vmem:[#allocation17_spill] sm:$0xff] %v5737_v4  ;;  %v6340_v18 = vmax.f32 %v5723_v53, 0.0 }
 0x4fe   : > { %v3949_v21 = vpop.f32.mrf.mxu0  ;;  %6569 = vst [vmem:[#allocation18_spill] sm:$0xff] %v5745_v2  ;;  %6570 = vst [vmem:[#allocation16_spill] sm:$0xff] %v5749_v40  ;;  %v6344_v12 = vmax.f32 %v5749_v40, 0.0  ;;  %v6346_v14 = vmax.f32 %v5763_v32, 0.0 }
 0x4ff   : > { %v5714_v46 = vadd.f32 %v3948_v51, %v5663_v54  ;;  %6567 = vst [vmem:[#allocation20_spill] sm:$0xff] %v5729_v23  ;;  %v2475_v47 = vpack.c.bf16 %v6338_v8, %v6339_v41  ;;  %v6341_v51 = vmax.f32 %v5729_v23, 0.0  ;;  %6572 = vst [vmem:[#allocation14_spill] sm:$0xff] %v5763_v32  ;;  %v4462_v32 = vld [vmem:[%s6260_s7 + $0xb0] ss:$8 sps:$4 sm:$0xff]  }
 0x500   : > { %v3950_v43 = vpop.f32.mrf.mxu0  ;;  %v2472_v7 = vpack.c.bf16 %v6344_v12, %v6345_v55 }
 0x501   : > { %6563 = vst [vmem:[#allocation23_spill] sm:$0xff] %v5714_v46  ;;  %v3951_v49 = vadd.f32 %v3950_v43, %v3949_v21  ;;  %v6337_v61 = vmax.f32 %v5714_v46, 0.0  ;;  %v6342_v21 = vmax.f32 %v5737_v4, 0.0  ;;  %v2474_v37 = vpack.c.bf16 %v6340_v18, %v6341_v51 }
 0x502   : > { %v6343_v43 = vmax.f32 %v5745_v2, 0.0  ;;  %v4459_v2 = vld [vmem:[%s6260_s7 + $0xc0] ss:$8 sps:$4 sm:$0xff]  }
 0x503   : > { %v5720_v10 = vadd.f32 %v3951_v49, %v5663_v54  ;;  %v5771_v49 = vadd.f32 %v3918_v11, %v5663_v54  ;;  %v6586_v11 = vld [vmem:[#allocation39_spill] sm:$0xff] }
 0x504   : > { %v2473_v16 = vpack.c.bf16 %v6342_v21, %v6343_v43 }
 0x505   : > { %6565 = vst [vmem:[#allocation22_spill] sm:$0xff] %v5720_v10  ;;  %v6336_v36 = vmax.f32 %v5720_v10, 0.0  ;;  %6573 = vst [vmem:[#allocation13_spill] sm:$0xff] %v5771_v49  ;;  %v6347_v60 = vmax.f32 %v5771_v49, 0.0 }
 0x507   : > { %v2476_v5 = vpack.c.bf16 %v6336_v36, %v6337_v61  ;;  %v2471_v54 = vpack.c.bf16 %v6346_v14, %v6347_v60 }
 0x509   : > { %4242 = vmatprep.subr.bf16.mxu0 %v2476_v5 }
 0x50a   : > { %4243 = vmatpush3.bf16.msra.mxu0 %v2476_v5  ;;  %v6596_v5 = vld [vmem:[#allocation44_spill] sm:$0xff] }
 0x50b   : > { %4244 = vmatprep.subr.bf16.mxu0 %v2475_v47  ;;  %vm6597_vm7 = vnez %v6596_v5 }
 0x50e   : > { %4245 = vmatpush3.bf16.msra.mxu0 %v2475_v47  ;;  %v2342_v47 = vpop.f32.mrf.mxu1 }
 0x50f   : > { %4246 = vmatprep.subr.bf16.mxu0 %v2474_v37 }
 0x512   : > { %4247 = vmatpush3.bf16.msra.mxu0 %v2474_v37  ;;  %v6584_v37 = vld [vmem:[#allocation38_spill] sm:$0xff] }
 0x513   : > { %4248 = vmatprep.subr.bf16.mxu0 %v2473_v16 }
 0x516   : > { %4249 = vmatpush3.bf16.msra.mxu0 %v2473_v16  ;;  %v6588_v16 = vld [vmem:[#allocation40_spill] sm:$0xff] }
 0x517   : > { %4250 = vmatprep.subr.bf16.mxu0 %v2472_v7 }
 0x51a   : > { %4251 = vmatpush3.bf16.msra.mxu0 %v2472_v7  ;;  %v6590_v7 = vld [vmem:[#allocation41_spill] sm:$0xff] }
 0x51b   : > { %4252 = vmatprep.subr.bf16.mxu0 %v2471_v54 }
 0x51e   : > { %4253 = vmatpush3.bf16.msra.mxu0 %v2471_v54  ;;  %v6592_v54 = vld [vmem:[#allocation42_spill] sm:$0xff] }
 0x51f   : > { %4254 = vmatprep.subr.bf16.mxu0 %v5703_v42 }
 0x522   : > { %4255 = vmatpush3.bf16.msra.mxu0 %v5703_v42  ;;  %v4213_v42 = vpop.f32.mrf.mxu1 }
 0x523   : > { %4256 = vmatprep.subr.bf16.mxu0 %v5681_v19 }
 0x526   : > { %4257 = vmatpush3.bf16.msra.mxu0 %v5681_v19  ;;  %v2345_v19 = vpop.f32.mrf.mxu1 }
 0x528   : > { %v4216_v35 = vpop.f32.mrf.mxu1 }
 0x529   : > { %4259 = vmatmul.mubr.msk.bf16.vlgmr.msra.gmra.mxu0 %vm5051_vm6, %v6481_v25  ;;  %vm6583_vm6 = vnez %v6582_v38 }
 0x52a   : > { %4262 = vmatprep.mubr.msk.bf16.mxu0 %vm5060_vm9, %v6481_v25  ;;  %vm6585_vm9 = vnez %v6584_v37  ;;  %v2358_v38 = vpop.f32.mrf.mxu1 }
 0x52c   : > { %v4217_v37 = vpop.f32.mrf.mxu1 }
 0x531   : > { %4263 = vmatmul.mubr.msk.bf16.gmra.mxu0 %vm5069_vm12, %v6481_v25  ;;  %vm6587_vm12 = vnez %v6586_v11  ;;  %v2361_v11 = vpop.f32.mrf.mxu1 }
 0x532   : > { %4266 = vmatprep.mubr.msk.bf16.mxu0 %vm5078_vm15, %v6481_v25  ;;  %vm6589_vm15 = vnez %v6588_v16 }
 0x533   : > { %v5834_v16 = vpop.f32.mrf.mxu1 }
 0x539   : > { %4267 = vmatmul.mubr.msk.bf16.gmra.mxu0 %vm5087_vm4, %v6481_v25  ;;  %vm6591_vm4 = vnez %v6590_v7  ;;  %v5836_v7 = vpop.f32.mrf.mxu1 }
 0x53a   : > { %4270 = vmatprep.mubr.msk.bf16.mxu0 %vm5096_vm8, %v6481_v25  ;;  %vm6593_vm8 = vnez %v6592_v54 }
 0x53b   : > { %v5838_v54 = vpop.f32.mrf.mxu1 }
 0x53d   : > { %v5840_v44 = vpop.f32.mrf.mxu1 }
 0x53f   : > { %v5842_v5 = vpop.f32.mrf.mxu1 }
 0x541   : > { %4271 = vmatmul.mubr.msk.bf16.gmra.mxu0 %vm6581_vm0, %v6481_v25  ;;  %v5844_v36 = vpop.f32.mrf.mxu1 }
 0x542   : > { %4274 = vmatprep.mubr.msk.bf16.mxu0 %vm6583_vm6, %v6481_v25 }
 0x543   : > { %v5846_v61 = vpop.f32.mrf.mxu1 }
 0x545   : > { %v5848_v8 = vpop.f32.mrf.mxu1 }
 0x547   : > { %v5850_v51 = vpop.f32.mrf.mxu1 }
 0x549   : > { %4275 = vmatmul.mubr.msk.bf16.gmra.mxu0 %vm6585_vm9, %v6481_v25  ;;  %v5852_v60 = vpop.f32.mrf.mxu1 }
 0x54a   : > { %4278 = vmatprep.mubr.msk.bf16.mxu0 %vm6587_vm12, %v6481_v25 }
 0x54b   : > { %v5856_v13 = vpop.f32.mrf.mxu1 }
 0x551   : > { %4279 = vmatmul.mubr.msk.bf16.gmra.mxu0 %vm6589_vm15, %v6481_v25 }
 0x552   : > { %4282 = vmatprep.mubr.msk.bf16.mxu0 %vm6591_vm4, %v6481_v25 }
 0x559   : > { %4283 = vmatmul.mubr.msk.bf16.gmra.mxu0 %vm6593_vm8, %v6481_v25 }
 0x55a   : > { %4286 = vmatprep.mubr.msk.bf16.mxu0 %vm6595_vm3, %v6481_v25 }
 0x561   : > { %4287 = vmatmul.mubr.msk.bf16.gmra.mxu0 %vm6597_vm7, %v6481_v25 }
 0x562   : > { %2965 = vmatprep.mubr.bf16.mxu0 %v6525_v9 }
 0x5e9   : > { %v4260_v41 = vpop.f32.mrf.mxu0 }
 0x5ea   : > { %v2520_v21 = vadd.f32 %v4260_v41, %v4212_v56 }
 0x5eb   : > { %v2511_v18 = vpop.f32.mrf.mxu0 }
 0x5ec   : > { %v2512_v12 = vadd.f32 %v2511_v18, %v2342_v47  ;;  %v2640_v30 = vmax.f32 %v2520_v21, 0.0 }
 0x5ed   : > { %v4261_v43 = vpop.f32.mrf.mxu0 }
 0x5ee   : > { %v2523_v55 = vadd.f32 %v4261_v43, %v4213_v42  ;;  %v2638_v15 = vmax.f32 %v2512_v12, 0.0  ;;  %v5860_v42 = vpop.f32.mrf.mxu1 }
 0x5ef   : > { %v2514_v14 = vpop.f32.mrf.mxu0 }
 0x5f0   : > { %v2641_v39 = vmax.f32 %v2523_v55, 0.0  ;;  %v2515_v34 = vadd.f32 %v2514_v14, %v2345_v19 }
 0x5f1   : > { %v4264_v24 = vpop.f32.mrf.mxu0 }
 0x5f2   : > { %v5854_v29 = vpack.c.bf16 %v2641_v39, %v2640_v30  ;;  %v2639_v10 = vmax.f32 %v2515_v34, 0.0  ;;  %v2536_v41 = vadd.f32 %v4264_v24, %v4216_v35 }
 0x5f3   : > { %v2527_v46 = vpop.f32.mrf.mxu0 }
 0x5f4   : > { %v5858_v45 = vpack.c.bf16 %v2639_v10, %v2638_v15  ;;  %v2528_v18 = vadd.f32 %v2527_v46, %v2358_v38  ;;  %v2644_v21 = vmax.f32 %v2536_v41, 0.0  ;;  %v5868_v15 = vpop.f32.mrf.mxu1  ;;  %v4450_v41 = vld [vmem:[%s6260_s7 + $0xf0] ss:$8 sps:$4 sm:$0xff]  }
 0x5f5   : > { %v4265_v56 = vpop.f32.mrf.mxu0 }
 0x5f6   : > { %6598 = vst [vmem:[#allocation29_spill] sm:$0xff] %v5858_v45  ;;  %v2539_v43 = vadd.f32 %v4265_v56, %v4217_v37  ;;  %v2642_v39 = vmax.f32 %v2528_v18, 0.0  ;;  %v5876_v35 = vpop.f32.mrf.mxu1  ;;  %v4452_v56 = vld [vmem:[%s6260_s7 + $0xf4] ss:$8 sps:$4 sm:$0xff]  }
 0x5f7   : > { %v2530_v47 = vpop.f32.mrf.mxu0  ;;  %2933 = vmatprep.subr.bf16.mxu0 %v4452_v56  ;;  %v4456_v56 = vld [vmem:[%s6260_s7 + $0xd0] ss:$8 sps:$4 sm:$0xff]  }
 0x5f8   : > { %v2645_v55 = vmax.f32 %v2539_v43, 0.0  ;;  %v2531_v14 = vadd.f32 %v2530_v47, %v2361_v11  ;;  %v5878_v11 = vpop.f32.mrf.mxu1  ;;  %v4455_v43 = vld [vmem:[%s6260_s7 + $0xe4] ss:$8 sps:$4 sm:$0xff]   ;;  %2934 = vmatpush1.bf16.msra.mxu0 %v4450_v41 }
 0x5f9   : > { %v5862_v19 = vpop.f32.mrf.mxu0  ;;  %2935 = vmatprep.subr.bf16.mxu0 %v4455_v43  ;;  %v4461_v41 = vld [vmem:[%s6260_s7 + $0xc4] ss:$8 sps:$4 sm:$0xff]  }
 0x5fa   : > { %v5864_v30 = vpack.c.bf16 %v2645_v55, %v2644_v21  ;;  %v2643_v34 = vmax.f32 %v2531_v14, 0.0  ;;  %v5889_v21 = vpop.f32.mrf.mxu1  ;;  %v4453_v55 = vld [vmem:[%s6260_s7 + $0xe0] ss:$8 sps:$4 sm:$0xff]   ;;  %v4458_v14 = vld [vmem:[%s6260_s7 + $0xd4] ss:$8 sps:$4 sm:$0xff]  }
 0x5fb   : > { %v5866_v12 = vpop.f32.mrf.mxu0 }
 0x5fc   : > { %v5870_v24 = vpack.c.bf16 %v2643_v34, %v2642_v39  ;;  %v4236_v53 = vpop.f32.mrf.mxu1  ;;  %2936 = vmatpush1.bf16.msra.mxu0 %v4453_v55  ;;  %v4464_v55 = vld [vmem:[%s6260_s7 + $0xb4] ss:$8 sps:$4 sm:$0xff]  }
 0x5fd   : > { %v5872_v46 = vpop.f32.mrf.mxu0  ;;  %2937 = vmatprep.subr.bf16.mxu0 %v4458_v14 }
 0x5fe   : > { %v2438_v4 = vpop.f32.mrf.mxu1 }
 0x5ff   : > { %v5874_v10 = vpop.f32.mrf.mxu0 }
 0x600   : > { %2938 = vmatpush1.bf16.msra.mxu0 %v4456_v56  ;;  %v4237_v57 = vpop.f32.mrf.mxu1 }
 0x601   : > { %v4272_v38 = vpop.f32.mrf.mxu0  ;;  %2939 = vmatprep.subr.bf16.mxu0 %v4461_v41 }
 0x602   : > { %v2441_v26 = vpop.f32.mrf.mxu1  ;;  %v2568_v62 = vadd.f32 %v4272_v38, %v5842_v5 }
 0x603   : > { %v2559_v37 = vpop.f32.mrf.mxu0 }
 0x604   : > { %2940 = vmatpush1.bf16.msra.mxu0 %v4459_v2  ;;  %v4240_v41 = vpop.f32.mrf.mxu1  ;;  %v2652_v25 = vmax.f32 %v2568_v62, 0.0 }
 0x605   : > { %v4273_v18 = vpop.f32.mrf.mxu0  ;;  %2941 = vmatprep.subr.bf16.mxu0 %v4464_v55 }
 0x606   : > { %v2454_v33 = vpop.f32.mrf.mxu1  ;;  %v2571_v63 = vadd.f32 %v4273_v18, %v5846_v61  ;;  %v2560_v61 = vadd.f32 %v2559_v37, %v5844_v36 }
 0x607   : > { %v2562_v47 = vpop.f32.mrf.mxu0 }
 0x608   : > { %2942 = vmatpush1.bf16.msra.mxu0 %v4462_v32  ;;  %v4241_v22 = vpop.f32.mrf.mxu1  ;;  %v2653_v50 = vmax.f32 %v2571_v63, 0.0  ;;  %v2563_v32 = vadd.f32 %v2562_v47, %v5848_v8  ;;  %v6611_v47 = vld [vmem:[#allocation45_spill] sm:$0xff] }
 0x609   : > { %v5897_v39 = vpop.f32.mrf.mxu0  ;;  %vm6612_vm0 = vnez %v6611_v47 }
 0x60a   : > { %v2457_v1 = vpop.f32.mrf.mxu1 }
 0x60b   : > { %v5899_v34 = vpop.f32.mrf.mxu0 }
 0x60d   : > { %v5907_v43 = vpop.f32.mrf.mxu0 }
 0x60f   : > { %v5909_v23 = vpop.f32.mrf.mxu0 }
 0x611   : > { %v4280_v14 = vpop.f32.mrf.mxu0 }
 0x613   : > { %v5917_v40 = vpop.f32.mrf.mxu0 }
 0x615   : > { %v4281_v56 = vpop.f32.mrf.mxu0 }
 0x617   : > { %v2594_v49 = vpop.f32.mrf.mxu0 }
 0x619   : > { %v4284_v0 = vpop.f32.mrf.mxu0 }
 0x61a   : > { %v2616_v18 = vadd.f32 %v4284_v0, %v4236_v53  ;;  %v2595_v53 = vadd.f32 %v2594_v49, %v5889_v21  ;;  %v6613_v21 = vld [vmem:[#allocation49_spill] sm:$0xff] }
 0x61b   : > { %v2607_v9 = vpop.f32.mrf.mxu0  ;;  %vm6614_vm6 = vnez %v6613_v21 }
 0x61c   : > { %v2608_v62 = vadd.f32 %v2607_v9, %v2438_v4 }
 0x61d   : > { %v4285_v6 = vpop.f32.mrf.mxu0 }
 0x61e   : > { %v2619_v3 = vadd.f32 %v4285_v6, %v4237_v57  ;;  %v2600_v6 = vadd.f32 %v4280_v14, %v5868_v15  ;;  %v2662_v0 = vmax.f32 %v2608_v62, 0.0  ;;  %v6621_v14 = vld [vmem:[#allocation11_spill] sm:$0xff]  ;;  %v4481_v62 = vld [vmem:[%s6261_s8 + $0xa0] sm:$0xff]  }
 0x61f   : > { %v2610_v27 = vpop.f32.mrf.mxu0  ;;  %vm6622_vm4 = vnez %v6621_v14 }
 0x620   : > { %v2665_v63 = vmax.f32 %v2619_v3, 0.0  ;;  %v2611_v8 = vadd.f32 %v2610_v27, %v2441_v26  ;;  %v2544_v27 = vadd.f32 %v5866_v12, %v5836_v7  ;;  %v2660_v57 = vmax.f32 %v2600_v6, 0.0  ;;  %v6629_v6 = vld [vmem:[#allocation28_spill] sm:$0xff] }
 0x621   : > { %v4288_v31 = vpop.f32.mrf.mxu0  ;;  %v2587_v7 = vadd.f32 %v5907_v43, %v5856_v13  ;;  %v2584_v12 = vadd.f32 %v5897_v39, %v5850_v51  ;;  %v6615_v39 = vld [vmem:[#allocation8_spill] sm:$0xff] }
 0x622   : > { %v2632_v20 = vadd.f32 %v4288_v31, %v4240_v41  ;;  %v2663_v3 = vmax.f32 %v2611_v8, 0.0  ;;  %v2646_v4 = vmax.f32 %v2544_v27, 0.0  ;;  %vm6616_vm9 = vnez %v6615_v39  ;;  %v6619_v43 = vld [vmem:[#allocation12_spill] sm:$0xff]  ;;  %v4476_v8 = vld [vmem:[%s6261_s8 + $0xf0] sm:$0xff]  }
 0x623   : > { %v2623_v2 = vpop.f32.mrf.mxu0  ;;  %v2657_v49 = vmax.f32 %v2587_v7, 0.0  ;;  %vm6620_vm15 = vnez %v6619_v43 }
 0x624   : > { %v2624_v55 = vadd.f32 %v2623_v2, %v2454_v33  ;;  %v2668_v59 = vmax.f32 %v2632_v20, 0.0  ;;  %v2555_v33 = vadd.f32 %v5872_v46, %v5838_v54  ;;  %v2682_v36 = vpack.c.bf16 %v2663_v3, %v2662_v0 }
 0x625   : > { %v4289_v48 = vpop.f32.mrf.mxu0  ;;  %v2579_v46 = vadd.f32 %v5909_v23, %v5860_v42  ;;  %v6600_v23 = vmov 1.0|1.0   ;;  %v6601_v42 = vld [vmem:[#allocation48_spill] sm:$0xff]  ;;  %v6630_v0 = vmax.f32 %v6629_v6, 0.0 }
 0x626   : > { %v2635_v58 = vadd.f32 %v4289_v48, %v4241_v22  ;;  %v2666_v45 = vmax.f32 %v2624_v55, 0.0  ;;  %v2677_v48 = vpack.c.bf16 %v2653_v50, %v2652_v25  ;;  %v2651_v22 = vmax.f32 %v2563_v32, 0.0  ;;  %v6627_v32 = vld [vmem:[#allocation57_spill] sm:$0xff] }
 0x627   : > { %v2626_v52 = vpop.f32.mrf.mxu0  ;;  %v2649_v20 = vmax.f32 %v2555_v33, 0.0  ;;  %v2603_v25 = vadd.f32 %v4281_v56, %v5878_v11  ;;  %v2655_v38 = vmax.f32 %v2579_v46, 0.0  ;;  %v6599_v11 = vld [vmem:[#allocation29_spill] sm:$0xff]  ;;  %vm6602_vm10 = vnez %v6601_v42  ;;  %v6623_v56 = vld [vmem:[#allocation54_spill] sm:$0xff] }
 0x628   : > { %v2669_v28 = vmax.f32 %v2635_v58, 0.0  ;;  %v2627_v17 = vadd.f32 %v2626_v52, %v2457_v1  ;;  %v2552_v58 = vadd.f32 %v5862_v19, %v5834_v16  ;;  %v2650_v52 = vmax.f32 %v2560_v61, 0.0  ;;  %v4465_v61 = vld [vmem:[%s6260_s7 + $0xa0] ss:$8 sps:$4 sm:$0xff]   ;;  %v4473_v33 = vld [vmem:[%s6260_s7 + $0x84] ss:$8 sps:$4 sm:$0xff]  }
 0x629   : > { %v2664_v1 = vmax.f32 %v2616_v18, 0.0  ;;  %v2592_v16 = vadd.f32 %v5917_v40, %v5876_v35  ;;  %v2659_v19 = vmax.f32 %v2595_v53, 0.0  ;;  %v2656_v40 = vmax.f32 %v2584_v12, 0.0  ;;  %v4467_v18 = vld [vmem:[%s6260_s7 + $0xa4] ss:$8 sps:$4 sm:$0xff]  }
 0x62a   : > { %v2685_v31 = vpack.c.bf16 %v2669_v28, %v2668_v59  ;;  %v2667_v41 = vmax.f32 %v2627_v17, 0.0  ;;  %v2547_v28 = vadd.f32 %v5874_v10, %v5840_v44  ;;  %v2676_v17 = vpack.c.bf16 %v2651_v22, %v2650_v52  ;;  %2943 = vmatprep.subr.bf16.mxu0 %v4467_v18  ;;  %v4474_v22 = vld [vmem:[%s6261_s8 + $0xf8] sm:$0xff]   ;;  %v4479_v52 = vld [vmem:[%s6261_s8 + $0xa8] sm:$0xff]  }
 0x62b   : > { %v2683_v59 = vpack.c.bf16 %v2665_v63, %v2664_v1  ;;  %v2648_v50 = vmax.f32 %v2552_v58, 0.0  ;;  %v2658_v15 = vmax.f32 %v2592_v16, 0.0  ;;  %v2576_v35 = vadd.f32 %v5899_v34, %v5852_v60  ;;  %v6605_v60 = vld [vmem:[#allocation53_spill] sm:$0xff]  ;;  %v6617_v34 = vld [vmem:[#allocation52_spill] sm:$0xff]  ;;  %2944 = vmatpush1.bf16.msra.mxu0 %v4465_v61  ;;  %v4475_v63 = vld [vmem:[%s6261_s8 + $0xb8] sm:$0xff]  }
 0x62c   : > { %v2684_v5 = vpack.c.bf16 %v2667_v41, %v2666_v45  ;;  %3994 = vmatprep.subr.bf16.mxu1 %v2685_v31  ;;  %v2647_v26 = vmax.f32 %v2547_v28, 0.0  ;;  %v2661_v45 = vmax.f32 %v2603_v25, 0.0  ;;  %v2679_v13 = vpack.c.bf16 %v2657_v49, %v2656_v40  ;;  %v4470_v31 = vld [vmem:[%s6260_s7 + $0x94] ss:$8 sps:$4 sm:$0xff]   ;;  %v4468_v41 = vld [vmem:[%s6260_s7 + $0x90] ss:$8 sps:$4 sm:$0xff]  }
 0x62d   : > { %3995 = vmatpush3.bf16.msra.mxu1 %v2677_v48  ;;  %v2675_v9 = vpack.c.bf16 %v2649_v20, %v2648_v50  ;;  %v2680_v10 = vpack.c.bf16 %v2659_v19, %v2658_v15  ;;  %v2654_v37 = vmax.f32 %v2576_v35, 0.0  ;;  %vm6606_vm14 = vnez %v6605_v60  ;;  %2945 = vmatprep.subr.bf16.mxu0 %v4470_v31  ;;  %v4471_v48 = vld [vmem:[%s6260_s7 + $0x80] ss:$8 sps:$4 sm:$0xff]   ;;  %v4482_v20 = vld [vmem:[%s6261_s8 + $0xd8] sm:$0xff]   ;;  %v6634_v49 = vld [vmem:[#allocation26_spill] sm:$0xff] }
 0x62e   : > { %3996 = vmatprep.subr.bf16.mxu1 %v2684_v5  ;;  %v2674_v54 = vpack.c.bf16 %v2647_v26, %v2646_v4  ;;  %v2681_v44 = vpack.c.bf16 %v2661_v45, %v2660_v57  ;;  %vm6618_vm12 = vnez %v6617_v34  ;;  %vm6624_vm8 = vnez %v6623_v56  ;;  %v4477_v5 = vld [vmem:[%s6261_s8 + $0xb0] sm:$0xff]   ;;  %v4478_v58 = vld [vmem:[%s6261_s8 + $0xe8] sm:$0xff]   ;;  %v4480_v1 = vld [vmem:[%s6261_s8 + $0xe0] sm:$0xff]  }
 0x62f   : > { %v2678_v51 = vpack.c.bf16 %v2655_v38, %v2654_v37  ;;  %vm6628_vm3 = vnez %v6627_v32  ;;  %2946 = vmatpush1.bf16.msra.mxu0 %v4468_v41  ;;  %v4483_v28 = vld [vmem:[%s6261_s8 + $0x98] sm:$0xff]   ;;  %v6633_v15 = vmov 0   ;;  %v6635_v46 = vmax.f32 %v6634_v49, 0.0  ;;  %v6636_v35 = vld [vmem:[#allocation25_spill] sm:$0xff]  ;;  %v6640_v34 = vld [vmem:[#allocation14_spill] sm:$0xff] }
 0x630   : > { %2947 = vmatprep.subr.bf16.mxu0 %v4473_v33  ;;  %v6631_v45 = vld [vmem:[#allocation27_spill] sm:$0xff]  ;;  %v6641_v43 = vmax.f32 %v6640_v34, 0.0 }
 0x631   : > { %3997 = vmatpush3.bf16.msra.mxu1 %v2676_v17  ;;  %v6632_v53 = vmax.f32 %v6631_v45, 0.0  ;;  %v6642_v33 = vld [vmem:[#allocation15_spill] sm:$0xff] }
 0x632   : > { %3998 = vmatprep.subr.bf16.mxu1 %v2683_v59  ;;  %v6044_v59 = vstv %s2783_s11 }
 0x633   : > { %2948 = vmatpush1.bf16.msra.mxu0 %v4471_v48  ;;  %v2790_v14 = vmul.f32 %v6044_v59, %v6641_v43  ;;  %v6643_v48 = vmax.f32 %v6642_v33, 0.0 }
 0x634   : > { %4058 = vmatprep.subr.bf16.mxu0 %v4474_v22 }
 0x635   : > { %3999 = vmatpush3.bf16.msra.mxu1 %v2675_v9  ;;  %v2785_v9 = vmul.f32 %v6044_v59, %v6630_v0 }
 0x636   : > { %4000 = vmatprep.subr.bf16.mxu1 %v2682_v36  ;;  %v2786_v36 = vmul.f32 %v6044_v59, %v6632_v53 }
 0x639   : > { %4001 = vmatpush3.bf16.msra.mxu1 %v2674_v54 }
 0x63a   : > { %4002 = vmatprep.subr.bf16.mxu1 %v2681_v44 }
 0x63d   : > { %4003 = vmatpush3.bf16.msra.mxu1 %v5864_v30  ;;  %v6603_v30 = vld [vmem:[#allocation51_spill] sm:$0xff] }
 0x63e   : > { %4004 = vmatprep.subr.bf16.mxu1 %v2680_v10  ;;  %vm6604_vm11 = vnez %v6603_v30  ;;  %v2787_v10 = vmul.f32 %v6044_v59, %v6635_v46 }
 0x641   : > { %4005 = vmatpush3.bf16.msra.mxu1 %v5870_v24  ;;  %v6607_v24 = vld [vmem:[#allocation46_spill] sm:$0xff] }
 0x642   : > { %4006 = vmatprep.subr.bf16.mxu1 %v2679_v13  ;;  %vm6608_vm13 = vnez %v6607_v24  ;;  %v6637_v13 = vmax.f32 %v6636_v35, 0.0 }
 0x644   : > { %v2788_v38 = vmul.f32 %v6044_v59, %v6637_v13 }
 0x645   : > { %4007 = vmatpush3.bf16.msra.mxu1 %v5854_v29  ;;  %v6609_v29 = vld [vmem:[#allocation50_spill] sm:$0xff] }
 0x646   : > { %4008 = vmatprep.subr.bf16.mxu1 %v2678_v51  ;;  %vm6610_vm2 = vnez %v6609_v29  ;;  %v6638_v29 = vld [vmem:[#allocation13_spill] sm:$0xff] }
 0x647   : > { %v6639_v47 = vmax.f32 %v6638_v29, 0.0 }
 0x649   : > { %4009 = vmatpush3.bf16.msra.mxu1 %v6599_v11  ;;  %v2789_v21 = vmul.f32 %v6044_v59, %v6639_v47 }
 0x64a   : > { %4290 = vmatprep.subr.bf16.mxu1 %v4474_v22  ;;  %v2791_v22 = vmul.f32 %v6044_v59, %v6643_v48 }
 0x64c   : > { %3664 = vmatmul.mubr.msk.bf16.vlgmr.msra.gmra.mxu1 %vm6602_vm10, %v6600_v23 }
 0x64d   : > { %3666 = vmatprep.mubr.msk.bf16.mxu1 %vm6604_vm11, %v6600_v23  ;;  %4298 = vmatpush3.bf16.msra.mxu1 %v4475_v63 }
 0x64e   : > { %4291 = vmatprep.subr.bf16.mxu1 %v4476_v8 }
 0x651   : > { %4299 = vmatpush3.bf16.msra.mxu1 %v4477_v5 }
 0x652   : > { %4292 = vmatprep.subr.bf16.mxu1 %v4478_v58 }
 0x654   : > { %3668 = vmatmul.mubr.msk.bf16.gmra.mxu1 %vm6606_vm14, %v6600_v23 }
 0x655   : > { %3670 = vmatprep.mubr.msk.bf16.mxu1 %vm6608_vm13, %v6600_v23  ;;  %4300 = vmatpush3.bf16.msra.mxu1 %v4479_v52 }
 0x656   : > { %4293 = vmatprep.subr.bf16.mxu1 %v4480_v1 }
 0x659   : > { %4301 = vmatpush3.bf16.msra.mxu1 %v4481_v62 }
 0x65a   : > { %4294 = vmatprep.subr.bf16.mxu1 %v4482_v20 }
 0x65c   : > { %3672 = vmatmul.mubr.msk.bf16.gmra.mxu1 %vm6610_vm2, %v6600_v23 }
 0x65d   : > { %3674 = vmatprep.mubr.msk.bf16.mxu1 %vm6612_vm0, %v6600_v23  ;;  %4302 = vmatpush3.bf16.msra.mxu1 %v4483_v28 }
 0x664   : > { %3676 = vmatmul.mubr.msk.bf16.gmra.mxu1 %vm6614_vm6, %v6600_v23 }
 0x665   : > { %3678 = vmatprep.mubr.msk.bf16.mxu1 %vm6616_vm9, %v6600_v23 }
 0x66c   : > { %3680 = vmatmul.mubr.msk.bf16.gmra.mxu1 %vm6618_vm12, %v6600_v23 }
 0x66d   : > { %3682 = vmatprep.mubr.msk.bf16.mxu1 %vm6620_vm15, %v6600_v23 }
 0x674   : > { %3684 = vmatmul.mubr.msk.bf16.gmra.mxu1 %vm6622_vm4, %v6600_v23 }
 0x675   : > { %3686 = vmatprep.mubr.msk.bf16.mxu1 %vm6624_vm8, %v6600_v23 }
 0x67c   : > { %3688 = vmatmul.mubr.msk.bf16.gmra.mxu1 %vm5458_vm5, %v6600_v23 }
 0x67d   : > { %3690 = vmatprep.mubr.msk.bf16.mxu1 %vm5462_vm1, %v6600_v23 }
 0x684   : > { %3692 = vmatmul.mubr.msk.bf16.gmra.mxu1 %vm6628_vm3, %v6600_v23 }
 0x70c   : > { %v4010_v17 = vpop.f32.mrf.mxu1 }
 0x70e   : > { %v4011_v25 = vpop.f32.mrf.mxu1 }
 0x70f   : > { %v4012_v50 = vadd.f32 %v4011_v25, %v4010_v17 }
 0x710   : > { %v4013_v3 = vpop.f32.mrf.mxu1 }
 0x711   : > { %v2801_v57 = vadd.f32 %v4012_v50, %v2785_v9  ;;  %v6648_v9 = vld [vmem:[#allocation17_spill] sm:$0xff] }
 0x712   : > { %v4014_v27 = vpop.f32.mrf.mxu1 }
 0x713   : > { %v4015_v26 = vadd.f32 %v4014_v27, %v4013_v3 }
 0x714   : > { %v4016_v4 = vpop.f32.mrf.mxu1 }
 0x715   : > { %v2802_v16 = vadd.f32 %v4015_v26, %v2786_v36  ;;  %v6649_v26 = vmax.f32 %v6648_v9, 0.0 }
 0x716   : > { %v4017_v54 = vpop.f32.mrf.mxu1 }
 0x717   : > { %v2817_v7 = vpack.c.bf16 %v2802_v16, %v2801_v57  ;;  %v4018_v19 = vadd.f32 %v4017_v54, %v4016_v4  ;;  %v2794_v45 = vmul.f32 %v6044_v59, %v6649_v26 }
 0x718   : > { %v4019_v44 = vpop.f32.mrf.mxu1 }
 0x719   : > { %2966 = vmatmul.mubr.bf16.vlgmr.msra.gmra.mxu0 %v2817_v7  ;;  %v2803_v51 = vadd.f32 %v4018_v19, %v2787_v10  ;;  %v6650_v19 = vld [vmem:[#allocation20_spill] sm:$0xff]  ;;  %v6652_v10 = vld [vmem:[#allocation19_spill] sm:$0xff] }
 0x71a   : > { %v4020_v12 = vpop.f32.mrf.mxu1  ;;  %2975 = vmatprep.mubr.bf16.mxu0 %v6633_v15  ;;  %4059 = vmatpush3.bf16.msra.mxu0 %v4475_v63 }
 0x71b   : > { %v4021_v40 = vadd.f32 %v4020_v12, %v4019_v44  ;;  %4060 = vmatprep.subr.bf16.mxu0 %v4476_v8  ;;  %v6644_v8 = vld [vmem:[#allocation16_spill] sm:$0xff]  ;;  %v6651_v12 = vmax.f32 %v6650_v19, 0.0 }
 0x71c   : > { %v4022_v37 = vpop.f32.mrf.mxu1 }
 0x71d   : > { %v2804_v11 = vadd.f32 %v4021_v40, %v2788_v38  ;;  %v2795_v49 = vmul.f32 %v6044_v59, %v6651_v12  ;;  %v6653_v40 = vmax.f32 %v6652_v10, 0.0 }
 0x71e   : > { %v4023_v23 = vpop.f32.mrf.mxu1  ;;  %4061 = vmatpush3.bf16.msra.mxu0 %v4477_v5  ;;  %v6645_v5 = vmax.f32 %v6644_v8, 0.0 }
 0x71f   : > { %v2818_v42 = vpack.c.bf16 %v2804_v11, %v2803_v51  ;;  %4062 = vmatprep.subr.bf16.mxu0 %v4478_v58  ;;  %v4024_v60 = vadd.f32 %v4023_v23, %v4022_v37  ;;  %v2796_v35 = vmul.f32 %v6044_v59, %v6653_v40 }
 0x720   : > { %v4025_v30 = vpop.f32.mrf.mxu1  ;;  %v2792_v58 = vmul.f32 %v6044_v59, %v6645_v5 }
 0x721   : > { %2976 = vmatmul.mubr.bf16.gmra.mxu0 %v2818_v42  ;;  %v2805_v2 = vadd.f32 %v4024_v60, %v2789_v21  ;;  %v6654_v60 = vld [vmem:[#allocation21_spill] sm:$0xff]  ;;  %v6656_v21 = vld [vmem:[#allocation24_spill] sm:$0xff] }
 0x722   : > { %v4026_v24 = vpop.f32.mrf.mxu1  ;;  %2985 = vmatprep.mubr.bf16.mxu0 %v6633_v15  ;;  %4063 = vmatpush3.bf16.msra.mxu0 %v4479_v52 }
 0x723   : > { %v4027_v39 = vadd.f32 %v4026_v24, %v4025_v30  ;;  %4064 = vmatprep.subr.bf16.mxu0 %v4480_v1  ;;  %v6655_v24 = vmax.f32 %v6654_v60, 0.0 }
 0x724   : > { %v4028_v56 = vpop.f32.mrf.mxu1 }
 0x725   : > { %v2806_v55 = vadd.f32 %v4027_v39, %v2790_v14  ;;  %v2797_v29 = vmul.f32 %v6044_v59, %v6655_v24  ;;  %v6657_v39 = vmax.f32 %v6656_v21, 0.0 }
 0x726   : > { %v4029_v32 = vpop.f32.mrf.mxu1  ;;  %4065 = vmatpush3.bf16.msra.mxu0 %v4481_v62 }
 0x727   : > { %v2819_v61 = vpack.c.bf16 %v2806_v55, %v2805_v2  ;;  %4066 = vmatprep.subr.bf16.mxu0 %v4482_v20  ;;  %v4030_v31 = vadd.f32 %v4029_v32, %v4028_v56  ;;  %v2798_v34 = vmul.f32 %v6044_v59, %v6657_v39 }
 0x728   : > { %v4031_v18 = vpop.f32.mrf.mxu1 }
 0x729   : > { %2986 = vmatmul.mubr.bf16.gmra.mxu0 %v2819_v61  ;;  %v2807_v1 = vadd.f32 %v4030_v31, %v2791_v22  ;;  %v6658_v31 = vld [vmem:[#allocation23_spill] sm:$0xff]  ;;  %v6660_v22 = vld [vmem:[#allocation22_spill] sm:$0xff] }
 0x72a   : > { %v4032_v41 = vpop.f32.mrf.mxu1  ;;  %2995 = vmatprep.mubr.bf16.mxu0 %v6633_v15  ;;  %4067 = vmatpush3.bf16.msra.mxu0 %v4483_v28  ;;  %v6646_v28 = vld [vmem:[#allocation18_spill] sm:$0xff] }
 0x72b   : > { %v4033_v63 = vadd.f32 %v4032_v41, %v4031_v18  ;;  %v6647_v27 = vmax.f32 %v6646_v28, 0.0  ;;  %v6659_v41 = vmax.f32 %v6658_v31, 0.0 }
 0x72c   : > { %v4034_v52 = vpop.f32.mrf.mxu1 }
 0x72d   : > { %v2808_v62 = vadd.f32 %v4033_v63, %v2792_v58  ;;  %v2793_v6 = vmul.f32 %v6044_v59, %v6647_v27  ;;  %v2799_v33 = vmul.f32 %v6044_v59, %v6659_v41  ;;  %v6661_v63 = vmax.f32 %v6660_v22, 0.0  ;;  %v6663_v27 = vld [vmem:[#allocation9_spill] sm:$0xff] }
 0x72e   : > { %v4035_v20 = vpop.f32.mrf.mxu1 }
 0x72f   : > { %v2820_v17 = vpack.c.bf16 %v2808_v62, %v2807_v1  ;;  %v4036_v3 = vadd.f32 %v4035_v20, %v4034_v52  ;;  %v2800_v8 = vmul.f32 %v6044_v59, %v6661_v63  ;;  %v4484_v1 = vld [vmem:[%s6261_s8 + $0xd0] sm:$0xff]   ;;  %v4486_v59 = vld [vmem:[%s6261_s8 + $0xc8] sm:$0xff]   ;;  %v4488_v20 = vld [vmem:[%s6261_s8 + $0xc0] sm:$0xff]  }
 0x730   : > { %v4037_v25 = vpop.f32.mrf.mxu1  ;;  %4068 = vmatprep.subr.bf16.mxu0 %v4484_v1  ;;  %4295 = vmatprep.subr.bf16.mxu1 %v4484_v1  ;;  %v4487_v62 = vld [vmem:[%s6261_s8 + $0x88] sm:$0xff]  }
 0x731   : > { %2996 = vmatmul.mubr.bf16.gmra.mxu0 %v2820_v17  ;;  %v2809_v36 = vadd.f32 %v4036_v3, %v2793_v6  ;;  %v4489_v17 = vld [vmem:[%s6261_s8 + $0x80] sm:$0xff]  }
 0x732   : > { %v4038_v50 = vpop.f32.mrf.mxu1  ;;  %3005 = vmatprep.mubr.bf16.mxu0 %v6633_v15 }
 0x733   : > { %v4039_v0 = vadd.f32 %v4038_v50, %v4037_v25  ;;  %v3606_v25 = vld [vmem:[%s6262_s9 + $0x2] ss:$8 sm:$0x3]  ;;  %v6662_v50 = vld [vmem:[#allocation10_spill] sm:$0xff] }
 0x734   : > { %v4040_v53 = vpop.f32.mrf.mxu1  ;;  %v6123_v28 = vrot.slane %v3606_v25, %v6662_v50  ;;  %v6126_v6 = vrot.slane %v3606_v25, %v6663_v27 }
 0x735   : > { %v2810_v4 = vadd.f32 %v4039_v0, %v2794_v45 }
 0x736   : > { %v4041_v57 = vpop.f32.mrf.mxu1 }
 0x737   : > { %v2821_v16 = vpack.c.bf16 %v2810_v4, %v2809_v36  ;;  %v4042_v7 = vadd.f32 %v4041_v57, %v4040_v53 }
 0x738   : > { %v4043_v54 = vpop.f32.mrf.mxu1 }
 0x739   : > { %3006 = vmatmul.mubr.bf16.gmra.mxu0 %v2821_v16  ;;  %v2811_v38 = vadd.f32 %v4042_v7, %v2795_v49 }
 0x73a   : > { %v4044_v44 = vpop.f32.mrf.mxu1  ;;  %3015 = vmatprep.mubr.bf16.mxu0 %v6633_v15 }
 0x73b   : > { %v4045_v46 = vadd.f32 %v4044_v44, %v4043_v54 }
 0x73c   : > { %v4046_v13 = vpop.f32.mrf.mxu1 }
 0x73d   : > { %v2812_v37 = vadd.f32 %v4045_v46, %v2796_v35 }
 0x73e   : > { %v4047_v51 = vpop.f32.mrf.mxu1 }
 0x73f   : > { %v2822_v11 = vpack.c.bf16 %v2812_v37, %v2811_v38  ;;  %v4048_v42 = vadd.f32 %v4047_v51, %v4046_v13 }
 0x740   : > { %v4049_v23 = vpop.f32.mrf.mxu1 }
 0x741   : > { %3016 = vmatmul.mubr.bf16.gmra.mxu0 %v2822_v11  ;;  %v2813_v14 = vadd.f32 %v4048_v42, %v2797_v29 }
 0x742   : > { %v4050_v30 = vpop.f32.mrf.mxu1  ;;  %3025 = vmatprep.mubr.bf16.mxu0 %v6633_v15 }
 0x743   : > { %v4051_v47 = vadd.f32 %v4050_v30, %v4049_v23 }
 0x744   : > { %v4052_v43 = vpop.f32.mrf.mxu1 }
 0x745   : > { %v2814_v56 = vadd.f32 %v4051_v47, %v2798_v34 }
 0x746   : > { %v4053_v2 = vpop.f32.mrf.mxu1 }
 0x747   : > { %v2823_v55 = vpack.c.bf16 %v2814_v56, %v2813_v14  ;;  %v4054_v61 = vadd.f32 %v4053_v2, %v4052_v43 }
 0x748   : > { %v4055_v32 = vpop.f32.mrf.mxu1 }
 0x749   : > { %3026 = vmatmul.mubr.bf16.gmra.mxu0 %v2823_v55  ;;  %v2815_v5 = vadd.f32 %v4054_v61, %v2799_v33 }
 0x74a   : > { %v4056_v18 = vpop.f32.mrf.mxu1  ;;  %3035 = vmatprep.mubr.bf16.mxu0 %v6633_v15  ;;  %v4485_v15 = vld [vmem:[%s6261_s8 + $0x90] sm:$0xff]  }
 0x74b   : > { %v4057_v48 = vadd.f32 %v4056_v18, %v4055_v32  ;;  %4069 = vmatpush3.bf16.msra.mxu0 %v4485_v15  ;;  %4303 = vmatpush3.bf16.msra.mxu1 %v4485_v15 }
 0x74c   : > { %4070 = vmatprep.subr.bf16.mxu0 %v4486_v59  ;;  %4296 = vmatprep.subr.bf16.mxu1 %v4486_v59 }
 0x74d   : > { %v2816_v58 = vadd.f32 %v4057_v48, %v2800_v8 }
 0x74f   : > { %v2824_v52 = vpack.c.bf16 %v2816_v58, %v2815_v5  ;;  %4071 = vmatpush3.bf16.msra.mxu0 %v4487_v62  ;;  %4304 = vmatpush3.bf16.msra.mxu1 %v4487_v62 }
 0x750   : > { %4072 = vmatprep.subr.bf16.mxu0 %v4488_v20  ;;  %4297 = vmatprep.subr.bf16.mxu1 %v4488_v20 }
 0x751   : > { %3036 = vmatmul.mubr.bf16.gmra.mxu0 %v2824_v52 }
 0x753   : > { %4073 = vmatpush3.bf16.msra.mxu0 %v4489_v17  ;;  %4305 = vmatpush3.bf16.msra.mxu1 %v4489_v17 }
 0x7d9   : > { %v2967_v3 = vpop.f32.mrf.mxu0 }
 0x7da   : > { %v2968_v53 = vadd.f32 %v2967_v3, %v6126_v6 }
 0x7db   : > { %v2969_v0 = vpop.f32.mrf.mxu0 }
 0x7dc   : > { %v2970_v26 = vadd.f32 %v2969_v0, %v6123_v28  ;;  %v3046_v44 = vmax.f32 %v2968_v53, 0.0 }
 0x7dd   : > { %v2971_v9 = vpop.f32.mrf.mxu0 }
 0x7de   : > { %v2972_v45 = vadd.f32 %v2971_v9, %v6126_v6  ;;  %v3047_v54 = vmax.f32 %v2970_v26, 0.0 }
 0x7df   : > { %v2973_v36 = vpop.f32.mrf.mxu0 }
 0x7e0   : > { %v2974_v4 = vadd.f32 %v2973_v36, %v6123_v28  ;;  %v3048_v57 = vmax.f32 %v2972_v45, 0.0 }
 0x7e1   : > { %v2977_v16 = vpop.f32.mrf.mxu0 }
 0x7e2   : > { %v3049_v7 = vmax.f32 %v2974_v4, 0.0  ;;  %v3078_v49 = vpack.c.bf16 %v3048_v57, %v3046_v44  ;;  %v2978_v35 = vadd.f32 %v2977_v16, %v6126_v6 }
 0x7e3   : > { %v2979_v19 = vpop.f32.mrf.mxu0 }
 0x7e4   : > { %v3079_v12 = vpack.c.bf16 %v3049_v7, %v3047_v54  ;;  %v2980_v10 = vadd.f32 %v2979_v19, %v6123_v28  ;;  %v3050_v42 = vmax.f32 %v2978_v35, 0.0 }
 0x7e5   : > { %v2981_v46 = vpop.f32.mrf.mxu0 }
 0x7e6   : > { %v2982_v40 = vadd.f32 %v2981_v46, %v6126_v6  ;;  %3255 = vmatprep.mubr.bf16.mxu0 %v3079_v12  ;;  %v3051_v11 = vmax.f32 %v2980_v10, 0.0 }
 0x7e7   : > { %v2983_v13 = vpop.f32.mrf.mxu0  ;;  %3256 = vmatmul.mubr.bf16.vlgmr.msra.gmra.mxu0 %v3078_v49 }
 0x7e8   : > { %v2984_v38 = vadd.f32 %v2983_v13, %v6123_v28  ;;  %v3052_v37 = vmax.f32 %v2982_v40, 0.0 }
 0x7e9   : > { %v2987_v51 = vpop.f32.mrf.mxu0 }
 0x7ea   : > { %v3053_v23 = vmax.f32 %v2984_v38, 0.0  ;;  %v3080_v24 = vpack.c.bf16 %v3052_v37, %v3050_v42  ;;  %v2988_v39 = vadd.f32 %v2987_v51, %v6126_v6 }
 0x7eb   : > { %v2989_v30 = vpop.f32.mrf.mxu0 }
 0x7ec   : > { %v3081_v60 = vpack.c.bf16 %v3053_v23, %v3051_v11  ;;  %v2990_v47 = vadd.f32 %v2989_v30, %v6123_v28  ;;  %v3054_v32 = vmax.f32 %v2988_v39, 0.0 }
 0x7ed   : > { %v2991_v29 = vpop.f32.mrf.mxu0 }
 0x7ee   : > { %v2992_v21 = vadd.f32 %v2991_v29, %v6126_v6  ;;  %3263 = vmatprep.mubr.bf16.mxu1 %v3081_v60  ;;  %v3055_v2 = vmax.f32 %v2990_v47, 0.0 }
 0x7ef   : > { %v2993_v34 = vpop.f32.mrf.mxu0  ;;  %3264 = vmatmul.mubr.bf16.vlgmr.msra.gmra.mxu1 %v3080_v24 }
 0x7f0   : > { %v2994_v43 = vadd.f32 %v2993_v34, %v6123_v28  ;;  %v3056_v14 = vmax.f32 %v2992_v21, 0.0 }
 0x7f1   : > { %v2997_v56 = vpop.f32.mrf.mxu0 }
 0x7f2   : > { %v3057_v55 = vmax.f32 %v2994_v43, 0.0  ;;  %v3082_v31 = vpack.c.bf16 %v3056_v14, %v3054_v32  ;;  %v2998_v22 = vadd.f32 %v2997_v56, %v6126_v6 }
 0x7f3   : > { %v2999_v61 = vpop.f32.mrf.mxu0 }
 0x7f4   : > { %v3083_v18 = vpack.c.bf16 %v3057_v55, %v3055_v2  ;;  %v3000_v33 = vadd.f32 %v2999_v61, %v6123_v28  ;;  %v3058_v15 = vmax.f32 %v2998_v22, 0.0 }
 0x7f5   : > { %v3001_v41 = vpop.f32.mrf.mxu0 }
 0x7f6   : > { %v3002_v48 = vadd.f32 %v3001_v41, %v6126_v6  ;;  %3271 = vmatprep.mubr.bf16.mxu1 %v3083_v18  ;;  %v3059_v52 = vmax.f32 %v3000_v33, 0.0 }
 0x7f7   : > { %v3003_v63 = vpop.f32.mrf.mxu0  ;;  %3272 = vmatmul.mubr.bf16.gmra.mxu1 %v3082_v31 }
 0x7f8   : > { %v3004_v8 = vadd.f32 %v3003_v63, %v6123_v28  ;;  %v3060_v5 = vmax.f32 %v3002_v48, 0.0 }
 0x7f9   : > { %v3007_v58 = vpop.f32.mrf.mxu0 }
 0x7fa   : > { %v3061_v1 = vmax.f32 %v3004_v8, 0.0  ;;  %v3084_v20 = vpack.c.bf16 %v3060_v5, %v3058_v15  ;;  %v3008_v50 = vadd.f32 %v3007_v58, %v6126_v6 }
 0x7fb   : > { %v3009_v59 = vpop.f32.mrf.mxu0 }
 0x7fc   : > { %v3085_v62 = vpack.c.bf16 %v3061_v1, %v3059_v52  ;;  %v3010_v25 = vadd.f32 %v3009_v59, %v6123_v28  ;;  %v3062_v36 = vmax.f32 %v3008_v50, 0.0 }
 0x7fd   : > { %v3011_v17 = vpop.f32.mrf.mxu0 }
 0x7fe   : > { %v3012_v3 = vadd.f32 %v3011_v17, %v6126_v6  ;;  %3279 = vmatprep.mubr.bf16.mxu1 %v3085_v62  ;;  %v3063_v45 = vmax.f32 %v3010_v25, 0.0 }
 0x7ff   : > { %v3013_v27 = vpop.f32.mrf.mxu0  ;;  %3280 = vmatmul.mubr.bf16.gmra.mxu1 %v3084_v20 }
 0x800   : > { %v3014_v0 = vadd.f32 %v3013_v27, %v6123_v28  ;;  %v3064_v9 = vmax.f32 %v3012_v3, 0.0 }
 0x801   : > { %v3017_v26 = vpop.f32.mrf.mxu0 }
 0x802   : > { %v3065_v53 = vmax.f32 %v3014_v0, 0.0  ;;  %v3086_v16 = vpack.c.bf16 %v3064_v9, %v3062_v36  ;;  %v3018_v19 = vadd.f32 %v3017_v26, %v6126_v6 }
 0x803   : > { %v3019_v4 = vpop.f32.mrf.mxu0 }
 0x804   : > { %v3087_v57 = vpack.c.bf16 %v3065_v53, %v3063_v45  ;;  %v3020_v7 = vadd.f32 %v3019_v4, %v6123_v28  ;;  %v3066_v13 = vmax.f32 %v3018_v19, 0.0 }
 0x805   : > { %v3021_v54 = vpop.f32.mrf.mxu0 }
 0x806   : > { %v3022_v44 = vadd.f32 %v3021_v54, %v6126_v6  ;;  %3287 = vmatprep.mubr.bf16.mxu1 %v3087_v57  ;;  %v3067_v40 = vmax.f32 %v3020_v7, 0.0 }
 0x807   : > { %v3023_v12 = vpop.f32.mrf.mxu0  ;;  %3288 = vmatmul.mubr.bf16.gmra.mxu1 %v3086_v16 }
 0x808   : > { %v3024_v49 = vadd.f32 %v3023_v12, %v6123_v28  ;;  %v3068_v46 = vmax.f32 %v3022_v44, 0.0 }
 0x809   : > { %v3027_v10 = vpop.f32.mrf.mxu0 }
 0x80a   : > { %v3069_v35 = vmax.f32 %v3024_v49, 0.0  ;;  %v3088_v51 = vpack.c.bf16 %v3068_v46, %v3066_v13  ;;  %v3028_v30 = vadd.f32 %v3027_v10, %v6126_v6 }
 0x80b   : > { %v3029_v38 = vpop.f32.mrf.mxu0 }
 0x80c   : > { %v3089_v37 = vpack.c.bf16 %v3069_v35, %v3067_v40  ;;  %v3030_v23 = vadd.f32 %v3029_v38, %v6123_v28  ;;  %v3070_v34 = vmax.f32 %v3028_v30, 0.0 }
 0x80d   : > { %v3031_v11 = vpop.f32.mrf.mxu0 }
 0x80e   : > { %v3032_v42 = vadd.f32 %v3031_v11, %v6126_v6  ;;  %3295 = vmatprep.mubr.bf16.mxu1 %v3089_v37  ;;  %v3071_v21 = vmax.f32 %v3030_v23, 0.0 }
 0x80f   : > { %v3033_v60 = vpop.f32.mrf.mxu0  ;;  %3296 = vmatmul.mubr.bf16.gmra.mxu1 %v3088_v51 }
 0x810   : > { %v3034_v24 = vadd.f32 %v3033_v60, %v6123_v28  ;;  %v3072_v29 = vmax.f32 %v3032_v42, 0.0 }
 0x811   : > { %v3037_v47 = vpop.f32.mrf.mxu0 }
 0x812   : > { %v3073_v39 = vmax.f32 %v3034_v24, 0.0  ;;  %v3090_v56 = vpack.c.bf16 %v3072_v29, %v3070_v34  ;;  %v3038_v61 = vadd.f32 %v3037_v47, %v6126_v6 }
 0x813   : > { %v3039_v43 = vpop.f32.mrf.mxu0 }
 0x814   : > { %v3091_v14 = vpack.c.bf16 %v3073_v39, %v3071_v21  ;;  %v3040_v55 = vadd.f32 %v3039_v43, %v6123_v28  ;;  %v3074_v22 = vmax.f32 %v3038_v61, 0.0 }
 0x815   : > { %v3041_v2 = vpop.f32.mrf.mxu0 }
 0x816   : > { %v3042_v32 = vadd.f32 %v3041_v2, %v6126_v6  ;;  %3303 = vmatprep.mubr.bf16.mxu1 %v3091_v14  ;;  %v3075_v33 = vmax.f32 %v3040_v55, 0.0  ;;  %v6166_v6 = vld [vmem:[%s6262_s9 + $0x4] ss:$0 sm:$0xff] }
 0x817   : > { %v3043_v18 = vpop.f32.mrf.mxu0  ;;  %3304 = vmatmul.mubr.bf16.gmra.mxu1 %v3090_v56 }
 0x818   : > { %v3044_v31 = vadd.f32 %v3043_v18, %v6123_v28  ;;  %v3076_v41 = vmax.f32 %v3042_v32, 0.0 }
 0x81a   : > { %v3077_v48 = vmax.f32 %v3044_v31, 0.0  ;;  %v3092_v8 = vpack.c.bf16 %v3076_v41, %v3074_v22 }
 0x81c   : > { %v3093_v63 = vpack.c.bf16 %v3077_v48, %v3075_v33 }
 0x81e   : > { %3311 = vmatprep.mubr.bf16.mxu1 %v3093_v63 }
 0x81f   : > { %3312 = vmatmul.mubr.bf16.gmra.mxu1 %v3092_v8 }
 0x8a7   : > { %v4074_v5 = vpop.f32.mrf.mxu0 }
 0x8a9   : > { %v4075_v58 = vpop.f32.mrf.mxu0 }
 0x8aa   : > { %v4076_v52 = vadd.f32 %v4075_v58, %v4074_v5 }
 0x8ab   : > { %v4077_v28 = vpop.f32.mrf.mxu0 }
 0x8ac   : > { %v3258_v1 = vadd.f32 %v4076_v52, %v6166_v6 }
 0x8ad   : > { %v4078_v15 = vpop.f32.mrf.mxu0 }
 0x8ae   : > { %3320 = vst [vmem:[%s6169_s20] sm:$0xff] %v3258_v1  ;;  %v4079_v59 = vadd.f32 %v4078_v15, %v4077_v28 }
 0x8af   : > { %v4080_v62 = vpop.f32.mrf.mxu1 }
 0x8b0   : > { %v3261_v20 = vadd.f32 %v4079_v59, %v6166_v6 }
 0x8b1   : > { %v4081_v17 = vpop.f32.mrf.mxu1 }
 0x8b2   : > { %3321 = vst [vmem:[%s6169_s20 + $0x8] sm:$0xff] %v3261_v20  ;;  %v4082_v25 = vadd.f32 %v4081_v17, %v4080_v62 }
 0x8b3   : > { %v4083_v3 = vpop.f32.mrf.mxu1 }
 0x8b4   : > { %v3266_v50 = vadd.f32 %v4082_v25, %v6166_v6 }
 0x8b5   : > { %v4084_v27 = vpop.f32.mrf.mxu1 }
 0x8b6   : > { %3322 = vst [vmem:[%s6169_s20 + $0x10] sm:$0xff] %v3266_v50  ;;  %v4085_v0 = vadd.f32 %v4084_v27, %v4083_v3 }
 0x8b7   : > { %v4086_v9 = vpop.f32.mrf.mxu1 }
 0x8b8   : > { %v3269_v26 = vadd.f32 %v4085_v0, %v6166_v6 }
 0x8b9   : > { %v4087_v45 = vpop.f32.mrf.mxu1 }
 0x8ba   : > { %3323 = vst [vmem:[%s6169_s20 + $0x18] sm:$0xff] %v3269_v26  ;;  %v4088_v53 = vadd.f32 %v4087_v45, %v4086_v9 }
 0x8bb   : > { %v4089_v36 = vpop.f32.mrf.mxu1 }
 0x8bc   : > { %v3274_v4 = vadd.f32 %v4088_v53, %v6166_v6 }
 0x8bd   : > { %v4090_v57 = vpop.f32.mrf.mxu1 }
 0x8be   : > { %3324 = vst [vmem:[%s6169_s20 + $0x20] sm:$0xff] %v3274_v4  ;;  %v4091_v16 = vadd.f32 %v4090_v57, %v4089_v36 }
 0x8bf   : > { %v4092_v54 = vpop.f32.mrf.mxu1 }
 0x8c0   : > { %v3277_v7 = vadd.f32 %v4091_v16, %v6166_v6 }
 0x8c1   : > { %v4093_v44 = vpop.f32.mrf.mxu1 }
 0x8c2   : > { %3325 = vst [vmem:[%s6169_s20 + $0x28] sm:$0xff] %v3277_v7  ;;  %v4094_v19 = vadd.f32 %v4093_v44, %v4092_v54 }
 0x8c3   : > { %v4095_v12 = vpop.f32.mrf.mxu1 }
 0x8c4   : > { %v3282_v49 = vadd.f32 %v4094_v19, %v6166_v6 }
 0x8c5   : > { %v4096_v46 = vpop.f32.mrf.mxu1 }
 0x8c6   : > { %3326 = vst [vmem:[%s6169_s20 + $0x30] sm:$0xff] %v3282_v49  ;;  %v4097_v10 = vadd.f32 %v4096_v46, %v4095_v12 }
 0x8c7   : > { %v4098_v40 = vpop.f32.mrf.mxu1 }
 0x8c8   : > { %v3285_v35 = vadd.f32 %v4097_v10, %v6166_v6 }
 0x8c9   : > { %v4099_v13 = vpop.f32.mrf.mxu1 }
 0x8ca   : > { %3327 = vst [vmem:[%s6169_s20 + $0x38] sm:$0xff] %v3285_v35  ;;  %v4100_v38 = vadd.f32 %v4099_v13, %v4098_v40 }
 0x8cb   : > { %v4101_v37 = vpop.f32.mrf.mxu1 }
 0x8cc   : > { %v3290_v51 = vadd.f32 %v4100_v38, %v6166_v6 }
 0x8cd   : > { %v4102_v11 = vpop.f32.mrf.mxu1 }
 0x8ce   : > { %3328 = vst [vmem:[%s6169_s20 + $0x40] sm:$0xff] %v3290_v51  ;;  %v4103_v23 = vadd.f32 %v4102_v11, %v4101_v37 }
 0x8cf   : > { %v4104_v42 = vpop.f32.mrf.mxu1 }
 0x8d0   : > { %v3293_v30 = vadd.f32 %v4103_v23, %v6166_v6 }
 0x8d1   : > { %v4105_v60 = vpop.f32.mrf.mxu1 }
 0x8d2   : > { %3329 = vst [vmem:[%s6169_s20 + $0x48] sm:$0xff] %v3293_v30  ;;  %v4106_v24 = vadd.f32 %v4105_v60, %v4104_v42 }
 0x8d3   : > { %v4107_v29 = vpop.f32.mrf.mxu1 }
 0x8d4   : > { %v3298_v47 = vadd.f32 %v4106_v24, %v6166_v6 }
 0x8d5   : > { %v4108_v21 = vpop.f32.mrf.mxu1 }
 0x8d6   : > { %3330 = vst [vmem:[%s6169_s20 + $0x50] sm:$0xff] %v3298_v47  ;;  %v4109_v39 = vadd.f32 %v4108_v21, %v4107_v29 }
 0x8d7   : > { %v4110_v34 = vpop.f32.mrf.mxu1 }
 0x8d8   : > { %v3301_v43 = vadd.f32 %v4109_v39, %v6166_v6 }
 0x8d9   : > { %v4111_v14 = vpop.f32.mrf.mxu1 }
 0x8da   : > { %3331 = vst [vmem:[%s6169_s20 + $0x58] sm:$0xff] %v3301_v43  ;;  %v4112_v56 = vadd.f32 %v4111_v14, %v4110_v34 }
 0x8db   : > { %v4113_v2 = vpop.f32.mrf.mxu1 }
 0x8dc   : > { %v3306_v55 = vadd.f32 %v4112_v56, %v6166_v6 }
 0x8dd   : > { %v4114_v32 = vpop.f32.mrf.mxu1 }
 0x8de   : > { %3332 = vst [vmem:[%s6169_s20 + $0x60] sm:$0xff] %v3306_v55  ;;  %v4115_v61 = vadd.f32 %v4114_v32, %v4113_v2 }
 0x8df   : > { %v4116_v18 = vpop.f32.mrf.mxu1 }
 0x8e0   : > { %v3309_v31 = vadd.f32 %v4115_v61, %v6166_v6 }
 0x8e1   : > { %v4117_v41 = vpop.f32.mrf.mxu1 }
 0x8e2   : > { %3333 = vst [vmem:[%s6169_s20 + $0x68] sm:$0xff] %v3309_v31  ;;  %v4118_v33 = vadd.f32 %v4117_v41, %v4116_v18 }
 0x8e3   : > { %v4119_v48 = vpop.f32.mrf.mxu1 }
 0x8e4   : > { %v3314_v22 = vadd.f32 %v4118_v33, %v6166_v6 }
 0x8e5   : > { %v4120_v63 = vpop.f32.mrf.mxu1 }
 0x8e6   : > { %3334 = vst [vmem:[%s6169_s20 + $0x70] sm:$0xff] %v3314_v22  ;;  %v4121_v8 = vadd.f32 %v4120_v63, %v4119_v48 }
 0x8e8   : > { %v3317_v5 = vadd.f32 %v4121_v8, %v6166_v6 }
 0x8ea   : > { %3335 = vst [vmem:[%s6169_s20 + $0x78] sm:$0xff] %v3317_v5 }
 0x8eb   : > { %4534 = shalt.err (!%p4531_p2)
}
 0x8ec   : > { %s4535_s28 = scalar_lea.hbm %s6205_s18, 2048  ;;  %s4539_s11 = scalar_lea.hbm %s6263_s10, 4096 }
 0x8ed   : > { %p4536_p3 = scmp.ne.s32.totalorder %s6205_s18, %s4535_s28  ;;  %p4540_p8 = scmp.lt.s32.totalorder %s6205_s18, %s6263_s10 }
 0x8ee   : > { %p4541_p11 = scmp.lt.s32.totalorder %s4539_s11, %s4535_s28 }
 0x8ef   : > { %p4537_p4 = pnand %p4536_p3, %p4688_p5 }
 0x8f0   : > { %p4542_p9 = por %p4541_p11, %p4540_p8 }
 0x8f1   : > { %p4538_p7 = pneg %p4537_p4 }
 0x8f3   : > { %p4543_p10 = pnand %p4542_p9, %p4538_p7 }
 0x8f5   : > { %4546 = shalt.err (!%p4543_p10)
}
 0x8f6   : > { %s4593_s17 = smov 128   ;;  %s4594_s30 = smov 8  }
 0x8f7   : > { %4310 = dma.vmem_to_hbm [thread:$0]  (%p4688_p5), %s6207_s26, 2048, %s6205_s18, %s6213_s27, %s4593_s17, %s4593_s17, %s4594_s30  }
 0x8f8 PF: > { %p4322_p12 = scmp.ge.s32.totalorder %s4585_s16, 2  ;;  %s3365_s12 = sand.u32 1, %s4573_s13  }
 0x8f9   : > { %s3366_s28 = scalar_lea.sflag [#allocation3], %s3365_s12 }
 0x8fa   : > { %p4317_p13 = pnand %p4322_p12, %p4692_p6 }
 0x8fc   : > { %p4318_p0 = pneg %p4317_p13 }
 0x8fe   : > { %4568 = dma.done.wait (%p4318_p0), %s3366_s28, 2048  }
 0x8ff   : > { %4570 = vsyncadd (%p4318_p0), %s3366_s28, 4294965248  ;;  %p21_p1 = scmp.ge.s32.totalorder %s4675_s19, 4   ;;  %s6664_s13 = smov %s4577_s14 }
 0x900   : > { %s6665_s14 = smov %s4581_s15  ;;  %s6666_s15 = smov %s4686_s22 }
 0x901   : > { %s6667_s16 = smov %s4675_s19  ;;  %23 = sbr.rel (!%p21_p1) target bundleno = 4 (0x4), region = 114 }
 0x906   :  { %3371 = vsyncpa [#allocation3], 1 }
 0x907   :  { %3373 = vsyncpa [#allocation3 + $0x1], 1 }
 0x908   :  { %3374 = vsyncpa [#allocation4], 1 }
 0x909   :  { %3376 = vsyncpa [#allocation4 + $0x1], 1 }

</bundles_post_ra>
